<compile_context>
chip_gen: v6e
topology: v6e:2x2x1
jax: 0.10.0
libtpu: 0.0.40
codegen_flags: <defaults>
</compile_context>

<pallas_src>
import functools
import math

import jax
import jax.numpy as jnp
from jax.experimental import pallas as pl
from jax.experimental.pallas import tpu as pltpu


def _make_decoder_kernel(T, Bp, D, H, n_layers, out_pad):
    """Fused kernel: n_layers-deep bidirectional LSTM + fc_out.

    Ref layout (all whole-array VMEM):
      x_ref            : (T*Bp, D)      time-major, row t*Bp + b == x[t, b]
      per layer (3)    : wih (d_in, 8H)  [fwd gates | bwd gates] along N
                         whh (2H, 8H)    block-diag(W_hh_fwd, W_hh_bwd)
                         bias (1, 8H)    summed b_ih+b_hh, both directions
      fc_w_ref         : (2H, out_pad)   zero-padded along N to 128 lanes
      fc_b_ref         : (1, out_pad)
      pred_ref         : (T*Bp, out_pad)
      hid_ref/cell_ref : (2*n_layers*Bp, H)  row blocks [l0_f, l0_b, l1_f, ...]
    Gate order within each direction's 4H block is PyTorch's (i, f, g, o).
    """
    G = 4 * H
    n_w = 3 * n_layers

    def kernel(*refs):
        x_ref = refs[0]
        w_refs = refs[1:1 + n_w]
        fc_w_ref = refs[1 + n_w]
        fc_b_ref = refs[2 + n_w]
        pred_ref = refs[3 + n_w]
        hid_ref = refs[4 + n_w]
        cell_ref = refs[5 + n_w]

        seq_f = None                       # (T*Bp, H) fwd outputs, prev layer
        seq_b = None                       # (T*Bp, H) bwd outputs, prev layer
        hid_rows, cell_rows = [], []

        for layer in range(n_layers):
            wih = w_refs[3 * layer + 0][...]       # (d_in, 8H)
            whh = w_refs[3 * layer + 1][...]       # (2H, 8H) block-diagonal
            bias = w_refs[3 * layer + 2][...]      # (1, 8H)

            # ---- hoisted input projection, BOTH directions, bias fused ----
            if layer == 0:
                xw = jnp.dot(x_ref[...], wih,
                             preferred_element_type=jnp.float32) + bias
            else:
                # split-K over the two direction halves of the prev. output
                xw = (jnp.dot(seq_f, wih[:H, :],
                              preferred_element_type=jnp.float32)
                      + jnp.dot(seq_b, wih[H:, :],
                                preferred_element_type=jnp.float32)
                      + bias)
            # xw: (T*Bp, 8H); fwd gate pre-acts in lanes [0:4H], bwd in [4H:8H]

            # ---- fused serial recurrence: both chains advance per step ----
            h_cat = jnp.zeros((Bp, 2 * H), jnp.float32)   # [h_fwd | h_bwd]
            c_f = jnp.zeros((Bp, H), jnp.float32)
            c_b = jnp.zeros((Bp, H), jnp.float32)
            out_f = [None] * T
            out_b = [None] * T
            for t in range(T):
                tf = t                      # fwd chain walks 0..T-1
                tb = T - 1 - t              # bwd chain walks T-1..0
                # each piece is a full (8,128) vreg -> zero-cost lane concat
                xg = jnp.concatenate(
                    [xw[tf * Bp:(tf + 1) * Bp, :G],
                     xw[tb * Bp:(tb + 1) * Bp, G:]], axis=-1)   # (Bp, 8H)
                gates = xg + jnp.dot(h_cat, whh,
                                     preferred_element_type=jnp.float32)
                # full-tile activations (EUP), then slice gates
                sig = jax.nn.sigmoid(gates)
                th = jnp.tanh(gates)
                i_f = sig[:, 0 * H:1 * H]
                f_f = sig[:, 1 * H:2 * H]
                g_f = th[:, 2 * H:3 * H]
                o_f = sig[:, 3 * H:4 * H]
                i_b = sig[:, G + 0 * H:G + 1 * H]
                f_b = sig[:, G + 1 * H:G + 2 * H]
                g_b = th[:, G + 2 * H:G + 3 * H]
                o_b = sig[:, G + 3 * H:G + 4 * H]
                c_f = f_f * c_f + i_f * g_f
                c_b = f_b * c_b + i_b * g_b
                h_f = o_f * jnp.tanh(c_f)
                h_b = o_b * jnp.tanh(c_b)
                h_cat = jnp.concatenate([h_f, h_b], axis=-1)
                out_f[tf] = h_f
                out_b[tb] = h_b
            seq_f = jnp.concatenate(out_f, axis=0)         # (T*Bp, H)
            seq_b = jnp.concatenate(out_b, axis=0)         # (T*Bp, H)
            hid_rows += [h_f, h_b]
            cell_rows += [c_f, c_b]

        # ---- fc_out on the last layer's sequence, split-K over directions --
        fc_w = fc_w_ref[...]
        pred_ref[...] = (jnp.dot(seq_f, fc_w[:H, :],
                                 preferred_element_type=jnp.float32)
                         + jnp.dot(seq_b, fc_w[H:, :],
                                   preferred_element_type=jnp.float32)
                         + fc_b_ref[...])
        # single dense slab stores for hidden / cell
        hid_ref[...] = jnp.concatenate(hid_rows, axis=0)
        cell_ref[...] = jnp.concatenate(cell_rows, axis=0)

    return kernel


def _decoder_pallas(x2d, packed, fc_w, fc_b, *, T, Bp, D, H, n_layers,
                    out_pad):
    kernel = _make_decoder_kernel(T, Bp, D, H, n_layers, out_pad)

    def vmem():
        return pl.BlockSpec(memory_space=pltpu.MemorySpace.VMEM)

    n_in = 1 + len(packed) + 2
    out_shapes = (
        jax.ShapeDtypeStruct((T * Bp, out_pad), jnp.float32),
        jax.ShapeDtypeStruct((2 * n_layers * Bp, H), jnp.float32),
        jax.ShapeDtypeStruct((2 * n_layers * Bp, H), jnp.float32),
    )
    return pl.pallas_call(
        kernel,
        out_shape=out_shapes,
        in_specs=[vmem() for _ in range(n_in)],
        out_specs=tuple(vmem() for _ in range(3)),
    )(x2d, *packed, fc_w, fc_b)


def _pack_params(params, H, n_layers, output_dim, out_pad):
    """Pack per-(layer,dir) weights into per-layer fused tensors.

    wih_cat : (d_in, 8H)  = [W_ih_fwd.T | W_ih_bwd.T] along N
    whh_blk : (2H, 8H)    = blockdiag(W_hh_fwd.T, W_hh_bwd.T)
    b_cat   : (1, 8H)
    fc_w/fc_b zero-padded along N to out_pad (lane-dense kernel output).
    """
    G = 4 * H
    packed = []
    for layer in range(n_layers):
        wih_f, whh_f, b_f = params["lstm"][2 * layer + 0]
        wih_b, whh_b, b_b = params["lstm"][2 * layer + 1]
        wih_cat = jnp.concatenate([wih_f, wih_b], axis=1)          # (d_in, 8H)
        whh_blk = jnp.zeros((2 * H, 2 * G), jnp.float32)
        whh_blk = whh_blk.at[:H, :G].set(whh_f)
        whh_blk = whh_blk.at[H:, G:].set(whh_b)
        b_cat = jnp.concatenate([b_f, b_b], axis=1)                # (1, 8H)
        packed.extend((wih_cat, whh_blk, b_cat))
    fc_w_p = (jnp.zeros((2 * H, out_pad), jnp.float32)
              .at[:, :output_dim].set(params["fc_w"]))
    fc_b_p = (jnp.zeros((1, out_pad), jnp.float32)
              .at[:, :output_dim].set(params["fc_b"]))
    return packed, fc_w_p, fc_b_p


def init_decoder_params(key, input_dim, hid_dim, n_layers, output_dim):
    """Params mirroring nn.LSTM(bidirectional=True) + nn.Linear(2H, out).
    LSTM weights stored pre-transposed ((d_in,4H)/(H,4H)), biases summed."""
    bound = 1.0 / math.sqrt(hid_dim)
    lstm = []
    for layer in range(n_layers):
        d_in = input_dim if layer == 0 else 2 * hid_dim
        for _direction in range(2):
            key, k1, k2, k3, k4 = jax.random.split(key, 5)
            w_ih = jax.random.uniform(k1, (4 * hid_dim, d_in),
                                      minval=-bound, maxval=bound)
            w_hh = jax.random.uniform(k2, (4 * hid_dim, hid_dim),
                                      minval=-bound, maxval=bound)
            b_ih = jax.random.uniform(k3, (4 * hid_dim,),
                                      minval=-bound, maxval=bound)
            b_hh = jax.random.uniform(k4, (4 * hid_dim,),
                                      minval=-bound, maxval=bound)
            lstm.append((jnp.asarray(w_ih.T, jnp.float32),
                         jnp.asarray(w_hh.T, jnp.float32),
                         jnp.asarray((b_ih + b_hh)[None, :], jnp.float32)))
    fb = 1.0 / math.sqrt(2 * hid_dim)
    key, kw, kb = jax.random.split(key, 3)
    fc_w = jax.random.uniform(kw, (output_dim, 2 * hid_dim),
                              minval=-fb, maxval=fb)
    fc_b = jax.random.uniform(kb, (output_dim,), minval=-fb, maxval=fb)
    return {"lstm": lstm,
            "fc_w": jnp.asarray(fc_w.T, jnp.float32),           # (2H, out)
            "fc_b": jnp.asarray(fc_b[None, :], jnp.float32)}    # (1, out)


def decoder_forward(x_btd, len_, params, *, hid_dim, n_layers, output_dim):
    """Matches only_Decoder.forward: returns (prediction, hidden, cell).

    prediction : (batch, seq, output_dim)
    hidden     : (n_layers*2, batch, hid_dim)
    cell       : (n_layers*2, batch, hid_dim)
    `len_` is accepted for signature parity but (as in the PyTorch module)
    unused.
    """
    del len_
    B, T, D = x_btd.shape
    H = hid_dim
    Bp = max(8, ((B + 7) // 8) * 8)                 # sublane-pad the batch
    out_pad = ((output_dim + 127) // 128) * 128     # lane-dense fc output

    x = x_btd.astype(jnp.float32)
    if Bp != B:
        x = jnp.pad(x, ((0, Bp - B), (0, 0), (0, 0)))
    x2d = jnp.transpose(x, (1, 0, 2)).reshape(T * Bp, D)   # time-major

    packed, fc_w_p, fc_b_p = _pack_params(params, H, n_layers, output_dim,
                                          out_pad)

    pred2d, hid2d, cell2d = _decoder_pallas(
        x2d, packed, fc_w_p, fc_b_p,
        T=T, Bp=Bp, D=D, H=H, n_layers=n_layers, out_pad=out_pad)

    pred = pred2d.reshape(T, Bp, out_pad)[:, :B, :output_dim]
    pred = jnp.transpose(pred, (1, 0, 2))
    hid = hid2d.reshape(2 * n_layers, Bp, H)[:, :B, :]
    cell = cell2d.reshape(2 * n_layers, Bp, H)[:, :B, :]
    return pred, hid, cell


# -------- pure-JAX reference (sanity check only) ---------------------------
def _ref_decoder(x_btd, params, hid_dim, n_layers, output_dim):
    B, T, _ = x_btd.shape
    H = hid_dim
    layer_in = jnp.transpose(x_btd.astype(jnp.float32), (1, 0, 2))
    hids, cells = [], []
    for layer in range(n_layers):
        dir_outs = []
        for direction in range(2):
            w_ih_t, w_hh_t, bias = params["lstm"][2 * layer + direction]
            xs = layer_in[::-1] if direction == 1 else layer_in
            h = jnp.zeros((B, H), jnp.float32)
            c = jnp.zeros((B, H), jnp.float32)
            outs = []
            for t in range(T):
                gates = xs[t] @ w_ih_t + h @ w_hh_t + bias
                i = jax.nn.sigmoid(gates[:, 0 * H:1 * H])
                f = jax.nn.sigmoid(gates[:, 1 * H:2 * H])
                g = jnp.tanh(gates[:, 2 * H:3 * H])
                o = jax.nn.sigmoid(gates[:, 3 * H:4 * H])
                c = f * c + i * g
                h = o * jnp.tanh(c)
                outs.append(h)
            out = jnp.stack(outs, 0)
            if direction == 1:
                out = out[::-1]
            dir_outs.append(out)
            hids.append(h)
            cells.append(c)
        layer_in = jnp.concatenate(dir_outs, axis=-1)
    pred = layer_in @ params["fc_w"] + params["fc_b"]            # (T, B, out)
    pred = jnp.transpose(pred, (1, 0, 2))
    return pred, jnp.stack(hids, 0), jnp.stack(cells, 0)


if __name__ == "__main__":
    input_dim, hid_dim, n_layers, output_dim = 16, 32, 2, 16
    batch, seq = 2, 8

    key = jax.random.PRNGKey(0)
    key_x, key_p = jax.random.split(key)
    x = jax.random.normal(key_x, (batch, seq, input_dim), dtype=jnp.float32)
    len_ = jnp.full((batch,), seq, dtype=jnp.int32)   # unused by the module
    params = init_decoder_params(key_p, input_dim, hid_dim, n_layers,
                                 output_dim)

    fwd = jax.jit(functools.partial(decoder_forward, hid_dim=hid_dim,
                                    n_layers=n_layers, output_dim=output_dim))
    pred, hid, cell = fwd(x, len_, params)
    jax.block_until_ready((pred, hid, cell))

    assert pred.shape == (batch, seq, output_dim)
    assert hid.shape == (n_layers * 2, batch, hid_dim)
    assert cell.shape == (n_layers * 2, batch, hid_dim)

    pred_r, hid_r, cell_r = _ref_decoder(x, params, hid_dim, n_layers,
                                         output_dim)
    assert jnp.allclose(pred, pred_r, atol=1e-4, rtol=1e-4)
    assert jnp.allclose(hid, hid_r, atol=1e-4, rtol=1e-4)
    assert jnp.allclose(cell, cell_r, atol=1e-4, rtol=1e-4)

    print("KERNEL_OK")
</pallas_src>

<mosaic_0001>
module attributes {stable_mosaic.version = 11 : i64} {
  func.func @kernel(%arg0: memref<64x16xf32, #tpu.memory_space<vmem>>, %arg1: memref<16x256xf32, #tpu.memory_space<vmem>>, %arg2: memref<64x256xf32, #tpu.memory_space<vmem>>, %arg3: memref<1x256xf32, #tpu.memory_space<vmem>>, %arg4: memref<64x256xf32, #tpu.memory_space<vmem>>, %arg5: memref<64x256xf32, #tpu.memory_space<vmem>>, %arg6: memref<1x256xf32, #tpu.memory_space<vmem>>, %arg7: memref<64x128xf32, #tpu.memory_space<vmem>>, %arg8: memref<1x128xf32, #tpu.memory_space<vmem>>, %arg9: memref<64x128xf32, #tpu.memory_space<vmem>>, %arg10: memref<32x32xf32, #tpu.memory_space<vmem>>, %arg11: memref<32x32xf32, #tpu.memory_space<vmem>>) attributes {dimension_semantics = [], scalar_prefetch = 0 : i64, scratch_operands = 0 : i64, tpu.core_type = #tpu.core_type<tc>} {
    %c0 = arith.constant 0 : index
    %c0_0 = arith.constant 0 : index
    %0 = vector.load %arg1[%c0, %c0_0] : memref<16x256xf32, #tpu.memory_space<vmem>>, vector<16x256xf32>
    %c0_1 = arith.constant 0 : index
    %c0_2 = arith.constant 0 : index
    %1 = vector.load %arg2[%c0_1, %c0_2] : memref<64x256xf32, #tpu.memory_space<vmem>>, vector<64x256xf32>
    %c0_3 = arith.constant 0 : index
    %c0_4 = arith.constant 0 : index
    %2 = vector.load %arg3[%c0_3, %c0_4] : memref<1x256xf32, #tpu.memory_space<vmem>>, vector<1x256xf32>
    %c0_5 = arith.constant 0 : index
    %c0_6 = arith.constant 0 : index
    %3 = vector.load %arg0[%c0_5, %c0_6] : memref<64x16xf32, #tpu.memory_space<vmem>>, vector<64x16xf32>
    %cst = arith.constant dense<0.000000e+00> : vector<64x256xf32>
    %4 = tpu.matmul %3, %0, %cst {dimension_numbers = #tpu.dot_dimension_numbers<[1], [0], [0], [1], [0, 0, 1, 1], [], []>} : vector<64x16xf32>, vector<16x256xf32>, vector<64x256xf32> -> vector<64x256xf32>
    %5 = vector.broadcast %2 : vector<1x256xf32> to vector<64x256xf32>
    %6 = arith.addf %4, %5 : vector<64x256xf32>
    %cst_7 = arith.constant 0.000000e+00 : f32
    %7 = vector.broadcast %cst_7 : f32 to vector<8x64xf32>
    %cst_8 = arith.constant 0.000000e+00 : f32
    %8 = vector.broadcast %cst_8 : f32 to vector<8x32xf32>
    %cst_9 = arith.constant 0.000000e+00 : f32
    %9 = vector.broadcast %cst_9 : f32 to vector<8x32xf32>
    %10 = vector.extract_strided_slice %6 {offsets = [0, 0], sizes = [8, 128], strides = [1, 1]} : vector<64x256xf32> to vector<8x128xf32>
    %11 = vector.extract_strided_slice %6 {offsets = [56, 128], sizes = [8, 128], strides = [1, 1]} : vector<64x256xf32> to vector<8x128xf32>
    %12 = tpu.concatenate %10, %11 in 1 : vector<8x128xf32>, vector<8x128xf32> -> vector<8x256xf32>
    %cst_10 = arith.constant dense<0.000000e+00> : vector<8x256xf32>
    %13 = tpu.matmul %7, %1, %cst_10 {dimension_numbers = #tpu.dot_dimension_numbers<[1], [0], [0], [1], [0, 0, 1, 1], [], []>} : vector<8x64xf32>, vector<64x256xf32>, vector<8x256xf32> -> vector<8x256xf32>
    %14 = arith.addf %12, %13 : vector<8x256xf32>
    %15 = arith.negf %14 : vector<8x256xf32>
    %16 = math.exp %15 : vector<8x256xf32>
    %cst_11 = arith.constant 1.000000e+00 : f32
    %17 = vector.broadcast %cst_11 : f32 to vector<8x256xf32>
    %18 = arith.addf %17, %16 : vector<8x256xf32>
    %19 = arith.divf %17, %18 : vector<8x256xf32>
    %20 = math.tanh %14 : vector<8x256xf32>
    %21 = vector.extract_strided_slice %19 {offsets = [0, 0], sizes = [8, 32], strides = [1, 1]} : vector<8x256xf32> to vector<8x32xf32>
    %22 = vector.extract_strided_slice %19 {offsets = [0, 32], sizes = [8, 32], strides = [1, 1]} : vector<8x256xf32> to vector<8x32xf32>
    %23 = vector.extract_strided_slice %20 {offsets = [0, 64], sizes = [8, 32], strides = [1, 1]} : vector<8x256xf32> to vector<8x32xf32>
    %24 = vector.extract_strided_slice %19 {offsets = [0, 96], sizes = [8, 32], strides = [1, 1]} : vector<8x256xf32> to vector<8x32xf32>
    %25 = vector.extract_strided_slice %19 {offsets = [0, 128], sizes = [8, 32], strides = [1, 1]} : vector<8x256xf32> to vector<8x32xf32>
    %26 = vector.extract_strided_slice %19 {offsets = [0, 160], sizes = [8, 32], strides = [1, 1]} : vector<8x256xf32> to vector<8x32xf32>
    %27 = vector.extract_strided_slice %20 {offsets = [0, 192], sizes = [8, 32], strides = [1, 1]} : vector<8x256xf32> to vector<8x32xf32>
    %28 = vector.extract_strided_slice %19 {offsets = [0, 224], sizes = [8, 32], strides = [1, 1]} : vector<8x256xf32> to vector<8x32xf32>
    %29 = arith.mulf %22, %8 : vector<8x32xf32>
    %30 = arith.mulf %21, %23 : vector<8x32xf32>
    %31 = arith.addf %29, %30 : vector<8x32xf32>
    %32 = arith.mulf %26, %9 : vector<8x32xf32>
    %33 = arith.mulf %25, %27 : vector<8x32xf32>
    %34 = arith.addf %32, %33 : vector<8x32xf32>
    %35 = math.tanh %31 : vector<8x32xf32>
    %36 = arith.mulf %24, %35 : vector<8x32xf32>
    %37 = math.tanh %34 : vector<8x32xf32>
    %38 = arith.mulf %28, %37 : vector<8x32xf32>
    %39 = tpu.concatenate %36, %38 in 1 : vector<8x32xf32>, vector<8x32xf32> -> vector<8x64xf32>
    %40 = vector.extract_strided_slice %6 {offsets = [8, 0], sizes = [8, 128], strides = [1, 1]} : vector<64x256xf32> to vector<8x128xf32>
    %41 = vector.extract_strided_slice %6 {offsets = [48, 128], sizes = [8, 128], strides = [1, 1]} : vector<64x256xf32> to vector<8x128xf32>
    %42 = tpu.concatenate %40, %41 in 1 : vector<8x128xf32>, vector<8x128xf32> -> vector<8x256xf32>
    %cst_12 = arith.constant dense<0.000000e+00> : vector<8x256xf32>
    %43 = tpu.matmul %39, %1, %cst_12 {dimension_numbers = #tpu.dot_dimension_numbers<[1], [0], [0], [1], [0, 0, 1, 1], [], []>} : vector<8x64xf32>, vector<64x256xf32>, vector<8x256xf32> -> vector<8x256xf32>
    %44 = arith.addf %42, %43 : vector<8x256xf32>
    %45 = arith.negf %44 : vector<8x256xf32>
    %46 = math.exp %45 : vector<8x256xf32>
    %cst_13 = arith.constant 1.000000e+00 : f32
    %47 = vector.broadcast %cst_13 : f32 to vector<8x256xf32>
    %48 = arith.addf %47, %46 : vector<8x256xf32>
    %49 = arith.divf %47, %48 : vector<8x256xf32>
    %50 = math.tanh %44 : vector<8x256xf32>
    %51 = vector.extract_strided_slice %49 {offsets = [0, 0], sizes = [8, 32], strides = [1, 1]} : vector<8x256xf32> to vector<8x32xf32>
    %52 = vector.extract_strided_slice %49 {offsets = [0, 32], sizes = [8, 32], strides = [1, 1]} : vector<8x256xf32> to vector<8x32xf32>
    %53 = vector.extract_strided_slice %50 {offsets = [0, 64], sizes = [8, 32], strides = [1, 1]} : vector<8x256xf32> to vector<8x32xf32>
    %54 = vector.extract_strided_slice %49 {offsets = [0, 96], sizes = [8, 32], strides = [1, 1]} : vector<8x256xf32> to vector<8x32xf32>
    %55 = vector.extract_strided_slice %49 {offsets = [0, 128], sizes = [8, 32], strides = [1, 1]} : vector<8x256xf32> to vector<8x32xf32>
    %56 = vector.extract_strided_slice %49 {offsets = [0, 160], sizes = [8, 32], strides = [1, 1]} : vector<8x256xf32> to vector<8x32xf32>
    %57 = vector.extract_strided_slice %50 {offsets = [0, 192], sizes = [8, 32], strides = [1, 1]} : vector<8x256xf32> to vector<8x32xf32>
    %58 = vector.extract_strided_slice %49 {offsets = [0, 224], sizes = [8, 32], strides = [1, 1]} : vector<8x256xf32> to vector<8x32xf32>
    %59 = arith.mulf %52, %31 : vector<8x32xf32>
    %60 = arith.mulf %51, %53 : vector<8x32xf32>
    %61 = arith.addf %59, %60 : vector<8x32xf32>
    %62 = arith.mulf %56, %34 : vector<8x32xf32>
    %63 = arith.mulf %55, %57 : vector<8x32xf32>
    %64 = arith.addf %62, %63 : vector<8x32xf32>
    %65 = math.tanh %61 : vector<8x32xf32>
    %66 = arith.mulf %54, %65 : vector<8x32xf32>
    %67 = math.tanh %64 : vector<8x32xf32>
    %68 = arith.mulf %58, %67 : vector<8x32xf32>
    %69 = tpu.concatenate %66, %68 in 1 : vector<8x32xf32>, vector<8x32xf32> -> vector<8x64xf32>
    %70 = vector.extract_strided_slice %6 {offsets = [16, 0], sizes = [8, 128], strides = [1, 1]} : vector<64x256xf32> to vector<8x128xf32>
    %71 = vector.extract_strided_slice %6 {offsets = [40, 128], sizes = [8, 128], strides = [1, 1]} : vector<64x256xf32> to vector<8x128xf32>
    %72 = tpu.concatenate %70, %71 in 1 : vector<8x128xf32>, vector<8x128xf32> -> vector<8x256xf32>
    %cst_14 = arith.constant dense<0.000000e+00> : vector<8x256xf32>
    %73 = tpu.matmul %69, %1, %cst_14 {dimension_numbers = #tpu.dot_dimension_numbers<[1], [0], [0], [1], [0, 0, 1, 1], [], []>} : vector<8x64xf32>, vector<64x256xf32>, vector<8x256xf32> -> vector<8x256xf32>
    %74 = arith.addf %72, %73 : vector<8x256xf32>
    %75 = arith.negf %74 : vector<8x256xf32>
    %76 = math.exp %75 : vector<8x256xf32>
    %cst_15 = arith.constant 1.000000e+00 : f32
    %77 = vector.broadcast %cst_15 : f32 to vector<8x256xf32>
    %78 = arith.addf %77, %76 : vector<8x256xf32>
    %79 = arith.divf %77, %78 : vector<8x256xf32>
    %80 = math.tanh %74 : vector<8x256xf32>
    %81 = vector.extract_strided_slice %79 {offsets = [0, 0], sizes = [8, 32], strides = [1, 1]} : vector<8x256xf32> to vector<8x32xf32>
    %82 = vector.extract_strided_slice %79 {offsets = [0, 32], sizes = [8, 32], strides = [1, 1]} : vector<8x256xf32> to vector<8x32xf32>
    %83 = vector.extract_strided_slice %80 {offsets = [0, 64], sizes = [8, 32], strides = [1, 1]} : vector<8x256xf32> to vector<8x32xf32>
    %84 = vector.extract_strided_slice %79 {offsets = [0, 96], sizes = [8, 32], strides = [1, 1]} : vector<8x256xf32> to vector<8x32xf32>
    %85 = vector.extract_strided_slice %79 {offsets = [0, 128], sizes = [8, 32], strides = [1, 1]} : vector<8x256xf32> to vector<8x32xf32>
    %86 = vector.extract_strided_slice %79 {offsets = [0, 160], sizes = [8, 32], strides = [1, 1]} : vector<8x256xf32> to vector<8x32xf32>
    %87 = vector.extract_strided_slice %80 {offsets = [0, 192], sizes = [8, 32], strides = [1, 1]} : vector<8x256xf32> to vector<8x32xf32>
    %88 = vector.extract_strided_slice %79 {offsets = [0, 224], sizes = [8, 32], strides = [1, 1]} : vector<8x256xf32> to vector<8x32xf32>
    %89 = arith.mulf %82, %61 : vector<8x32xf32>
    %90 = arith.mulf %81, %83 : vector<8x32xf32>
    %91 = arith.addf %89, %90 : vector<8x32xf32>
    %92 = arith.mulf %86, %64 : vector<8x32xf32>
    %93 = arith.mulf %85, %87 : vector<8x32xf32>
    %94 = arith.addf %92, %93 : vector<8x32xf32>
    %95 = math.tanh %91 : vector<8x32xf32>
    %96 = arith.mulf %84, %95 : vector<8x32xf32>
    %97 = math.tanh %94 : vector<8x32xf32>
    %98 = arith.mulf %88, %97 : vector<8x32xf32>
    %99 = tpu.concatenate %96, %98 in 1 : vector<8x32xf32>, vector<8x32xf32> -> vector<8x64xf32>
    %100 = vector.extract_strided_slice %6 {offsets = [24, 0], sizes = [8, 128], strides = [1, 1]} : vector<64x256xf32> to vector<8x128xf32>
    %101 = vector.extract_strided_slice %6 {offsets = [32, 128], sizes = [8, 128], strides = [1, 1]} : vector<64x256xf32> to vector<8x128xf32>
    %102 = tpu.concatenate %100, %101 in 1 : vector<8x128xf32>, vector<8x128xf32> -> vector<8x256xf32>
    %cst_16 = arith.constant dense<0.000000e+00> : vector<8x256xf32>
    %103 = tpu.matmul %99, %1, %cst_16 {dimension_numbers = #tpu.dot_dimension_numbers<[1], [0], [0], [1], [0, 0, 1, 1], [], []>} : vector<8x64xf32>, vector<64x256xf32>, vector<8x256xf32> -> vector<8x256xf32>
    %104 = arith.addf %102, %103 : vector<8x256xf32>
    %105 = arith.negf %104 : vector<8x256xf32>
    %106 = math.exp %105 : vector<8x256xf32>
    %cst_17 = arith.constant 1.000000e+00 : f32
    %107 = vector.broadcast %cst_17 : f32 to vector<8x256xf32>
    %108 = arith.addf %107, %106 : vector<8x256xf32>
    %109 = arith.divf %107, %108 : vector<8x256xf32>
    %110 = math.tanh %104 : vector<8x256xf32>
    %111 = vector.extract_strided_slice %109 {offsets = [0, 0], sizes = [8, 32], strides = [1, 1]} : vector<8x256xf32> to vector<8x32xf32>
    %112 = vector.extract_strided_slice %109 {offsets = [0, 32], sizes = [8, 32], strides = [1, 1]} : vector<8x256xf32> to vector<8x32xf32>
    %113 = vector.extract_strided_slice %110 {offsets = [0, 64], sizes = [8, 32], strides = [1, 1]} : vector<8x256xf32> to vector<8x32xf32>
    %114 = vector.extract_strided_slice %109 {offsets = [0, 96], sizes = [8, 32], strides = [1, 1]} : vector<8x256xf32> to vector<8x32xf32>
    %115 = vector.extract_strided_slice %109 {offsets = [0, 128], sizes = [8, 32], strides = [1, 1]} : vector<8x256xf32> to vector<8x32xf32>
    %116 = vector.extract_strided_slice %109 {offsets = [0, 160], sizes = [8, 32], strides = [1, 1]} : vector<8x256xf32> to vector<8x32xf32>
    %117 = vector.extract_strided_slice %110 {offsets = [0, 192], sizes = [8, 32], strides = [1, 1]} : vector<8x256xf32> to vector<8x32xf32>
    %118 = vector.extract_strided_slice %109 {offsets = [0, 224], sizes = [8, 32], strides = [1, 1]} : vector<8x256xf32> to vector<8x32xf32>
    %119 = arith.mulf %112, %91 : vector<8x32xf32>
    %120 = arith.mulf %111, %113 : vector<8x32xf32>
    %121 = arith.addf %119, %120 : vector<8x32xf32>
    %122 = arith.mulf %116, %94 : vector<8x32xf32>
    %123 = arith.mulf %115, %117 : vector<8x32xf32>
    %124 = arith.addf %122, %123 : vector<8x32xf32>
    %125 = math.tanh %121 : vector<8x32xf32>
    %126 = arith.mulf %114, %125 : vector<8x32xf32>
    %127 = math.tanh %124 : vector<8x32xf32>
    %128 = arith.mulf %118, %127 : vector<8x32xf32>
    %129 = tpu.concatenate %126, %128 in 1 : vector<8x32xf32>, vector<8x32xf32> -> vector<8x64xf32>
    %130 = vector.extract_strided_slice %6 {offsets = [32, 0], sizes = [8, 128], strides = [1, 1]} : vector<64x256xf32> to vector<8x128xf32>
    %131 = vector.extract_strided_slice %6 {offsets = [24, 128], sizes = [8, 128], strides = [1, 1]} : vector<64x256xf32> to vector<8x128xf32>
    %132 = tpu.concatenate %130, %131 in 1 : vector<8x128xf32>, vector<8x128xf32> -> vector<8x256xf32>
    %cst_18 = arith.constant dense<0.000000e+00> : vector<8x256xf32>
    %133 = tpu.matmul %129, %1, %cst_18 {dimension_numbers = #tpu.dot_dimension_numbers<[1], [0], [0], [1], [0, 0, 1, 1], [], []>} : vector<8x64xf32>, vector<64x256xf32>, vector<8x256xf32> -> vector<8x256xf32>
    %134 = arith.addf %132, %133 : vector<8x256xf32>
    %135 = arith.negf %134 : vector<8x256xf32>
    %136 = math.exp %135 : vector<8x256xf32>
    %cst_19 = arith.constant 1.000000e+00 : f32
    %137 = vector.broadcast %cst_19 : f32 to vector<8x256xf32>
    %138 = arith.addf %137, %136 : vector<8x256xf32>
    %139 = arith.divf %137, %138 : vector<8x256xf32>
    %140 = math.tanh %134 : vector<8x256xf32>
    %141 = vector.extract_strided_slice %139 {offsets = [0, 0], sizes = [8, 32], strides = [1, 1]} : vector<8x256xf32> to vector<8x32xf32>
    %142 = vector.extract_strided_slice %139 {offsets = [0, 32], sizes = [8, 32], strides = [1, 1]} : vector<8x256xf32> to vector<8x32xf32>
    %143 = vector.extract_strided_slice %140 {offsets = [0, 64], sizes = [8, 32], strides = [1, 1]} : vector<8x256xf32> to vector<8x32xf32>
    %144 = vector.extract_strided_slice %139 {offsets = [0, 96], sizes = [8, 32], strides = [1, 1]} : vector<8x256xf32> to vector<8x32xf32>
    %145 = vector.extract_strided_slice %139 {offsets = [0, 128], sizes = [8, 32], strides = [1, 1]} : vector<8x256xf32> to vector<8x32xf32>
    %146 = vector.extract_strided_slice %139 {offsets = [0, 160], sizes = [8, 32], strides = [1, 1]} : vector<8x256xf32> to vector<8x32xf32>
    %147 = vector.extract_strided_slice %140 {offsets = [0, 192], sizes = [8, 32], strides = [1, 1]} : vector<8x256xf32> to vector<8x32xf32>
    %148 = vector.extract_strided_slice %139 {offsets = [0, 224], sizes = [8, 32], strides = [1, 1]} : vector<8x256xf32> to vector<8x32xf32>
    %149 = arith.mulf %142, %121 : vector<8x32xf32>
    %150 = arith.mulf %141, %143 : vector<8x32xf32>
    %151 = arith.addf %149, %150 : vector<8x32xf32>
    %152 = arith.mulf %146, %124 : vector<8x32xf32>
    %153 = arith.mulf %145, %147 : vector<8x32xf32>
    %154 = arith.addf %152, %153 : vector<8x32xf32>
    %155 = math.tanh %151 : vector<8x32xf32>
    %156 = arith.mulf %144, %155 : vector<8x32xf32>
    %157 = math.tanh %154 : vector<8x32xf32>
    %158 = arith.mulf %148, %157 : vector<8x32xf32>
    %159 = tpu.concatenate %156, %158 in 1 : vector<8x32xf32>, vector<8x32xf32> -> vector<8x64xf32>
    %160 = vector.extract_strided_slice %6 {offsets = [40, 0], sizes = [8, 128], strides = [1, 1]} : vector<64x256xf32> to vector<8x128xf32>
    %161 = vector.extract_strided_slice %6 {offsets = [16, 128], sizes = [8, 128], strides = [1, 1]} : vector<64x256xf32> to vector<8x128xf32>
    %162 = tpu.concatenate %160, %161 in 1 : vector<8x128xf32>, vector<8x128xf32> -> vector<8x256xf32>
    %cst_20 = arith.constant dense<0.000000e+00> : vector<8x256xf32>
    %163 = tpu.matmul %159, %1, %cst_20 {dimension_numbers = #tpu.dot_dimension_numbers<[1], [0], [0], [1], [0, 0, 1, 1], [], []>} : vector<8x64xf32>, vector<64x256xf32>, vector<8x256xf32> -> vector<8x256xf32>
    %164 = arith.addf %162, %163 : vector<8x256xf32>
    %165 = arith.negf %164 : vector<8x256xf32>
    %166 = math.exp %165 : vector<8x256xf32>
    %cst_21 = arith.constant 1.000000e+00 : f32
    %167 = vector.broadcast %cst_21 : f32 to vector<8x256xf32>
    %168 = arith.addf %167, %166 : vector<8x256xf32>
    %169 = arith.divf %167, %168 : vector<8x256xf32>
    %170 = math.tanh %164 : vector<8x256xf32>
    %171 = vector.extract_strided_slice %169 {offsets = [0, 0], sizes = [8, 32], strides = [1, 1]} : vector<8x256xf32> to vector<8x32xf32>
    %172 = vector.extract_strided_slice %169 {offsets = [0, 32], sizes = [8, 32], strides = [1, 1]} : vector<8x256xf32> to vector<8x32xf32>
    %173 = vector.extract_strided_slice %170 {offsets = [0, 64], sizes = [8, 32], strides = [1, 1]} : vector<8x256xf32> to vector<8x32xf32>
    %174 = vector.extract_strided_slice %169 {offsets = [0, 96], sizes = [8, 32], strides = [1, 1]} : vector<8x256xf32> to vector<8x32xf32>
    %175 = vector.extract_strided_slice %169 {offsets = [0, 128], sizes = [8, 32], strides = [1, 1]} : vector<8x256xf32> to vector<8x32xf32>
    %176 = vector.extract_strided_slice %169 {offsets = [0, 160], sizes = [8, 32], strides = [1, 1]} : vector<8x256xf32> to vector<8x32xf32>
    %177 = vector.extract_strided_slice %170 {offsets = [0, 192], sizes = [8, 32], strides = [1, 1]} : vector<8x256xf32> to vector<8x32xf32>
    %178 = vector.extract_strided_slice %169 {offsets = [0, 224], sizes = [8, 32], strides = [1, 1]} : vector<8x256xf32> to vector<8x32xf32>
    %179 = arith.mulf %172, %151 : vector<8x32xf32>
    %180 = arith.mulf %171, %173 : vector<8x32xf32>
    %181 = arith.addf %179, %180 : vector<8x32xf32>
    %182 = arith.mulf %176, %154 : vector<8x32xf32>
    %183 = arith.mulf %175, %177 : vector<8x32xf32>
    %184 = arith.addf %182, %183 : vector<8x32xf32>
    %185 = math.tanh %181 : vector<8x32xf32>
    %186 = arith.mulf %174, %185 : vector<8x32xf32>
    %187 = math.tanh %184 : vector<8x32xf32>
    %188 = arith.mulf %178, %187 : vector<8x32xf32>
    %189 = tpu.concatenate %186, %188 in 1 : vector<8x32xf32>, vector<8x32xf32> -> vector<8x64xf32>
    %190 = vector.extract_strided_slice %6 {offsets = [48, 0], sizes = [8, 128], strides = [1, 1]} : vector<64x256xf32> to vector<8x128xf32>
    %191 = vector.extract_strided_slice %6 {offsets = [8, 128], sizes = [8, 128], strides = [1, 1]} : vector<64x256xf32> to vector<8x128xf32>
    %192 = tpu.concatenate %190, %191 in 1 : vector<8x128xf32>, vector<8x128xf32> -> vector<8x256xf32>
    %cst_22 = arith.constant dense<0.000000e+00> : vector<8x256xf32>
    %193 = tpu.matmul %189, %1, %cst_22 {dimension_numbers = #tpu.dot_dimension_numbers<[1], [0], [0], [1], [0, 0, 1, 1], [], []>} : vector<8x64xf32>, vector<64x256xf32>, vector<8x256xf32> -> vector<8x256xf32>
    %194 = arith.addf %192, %193 : vector<8x256xf32>
    %195 = arith.negf %194 : vector<8x256xf32>
    %196 = math.exp %195 : vector<8x256xf32>
    %cst_23 = arith.constant 1.000000e+00 : f32
    %197 = vector.broadcast %cst_23 : f32 to vector<8x256xf32>
    %198 = arith.addf %197, %196 : vector<8x256xf32>
    %199 = arith.divf %197, %198 : vector<8x256xf32>
    %200 = math.tanh %194 : vector<8x256xf32>
    %201 = vector.extract_strided_slice %199 {offsets = [0, 0], sizes = [8, 32], strides = [1, 1]} : vector<8x256xf32> to vector<8x32xf32>
    %202 = vector.extract_strided_slice %199 {offsets = [0, 32], sizes = [8, 32], strides = [1, 1]} : vector<8x256xf32> to vector<8x32xf32>
    %203 = vector.extract_strided_slice %200 {offsets = [0, 64], sizes = [8, 32], strides = [1, 1]} : vector<8x256xf32> to vector<8x32xf32>
    %204 = vector.extract_strided_slice %199 {offsets = [0, 96], sizes = [8, 32], strides = [1, 1]} : vector<8x256xf32> to vector<8x32xf32>
    %205 = vector.extract_strided_slice %199 {offsets = [0, 128], sizes = [8, 32], strides = [1, 1]} : vector<8x256xf32> to vector<8x32xf32>
    %206 = vector.extract_strided_slice %199 {offsets = [0, 160], sizes = [8, 32], strides = [1, 1]} : vector<8x256xf32> to vector<8x32xf32>
    %207 = vector.extract_strided_slice %200 {offsets = [0, 192], sizes = [8, 32], strides = [1, 1]} : vector<8x256xf32> to vector<8x32xf32>
    %208 = vector.extract_strided_slice %199 {offsets = [0, 224], sizes = [8, 32], strides = [1, 1]} : vector<8x256xf32> to vector<8x32xf32>
    %209 = arith.mulf %202, %181 : vector<8x32xf32>
    %210 = arith.mulf %201, %203 : vector<8x32xf32>
    %211 = arith.addf %209, %210 : vector<8x32xf32>
    %212 = arith.mulf %206, %184 : vector<8x32xf32>
    %213 = arith.mulf %205, %207 : vector<8x32xf32>
    %214 = arith.addf %212, %213 : vector<8x32xf32>
    %215 = math.tanh %211 : vector<8x32xf32>
    %216 = arith.mulf %204, %215 : vector<8x32xf32>
    %217 = math.tanh %214 : vector<8x32xf32>
    %218 = arith.mulf %208, %217 : vector<8x32xf32>
    %219 = tpu.concatenate %216, %218 in 1 : vector<8x32xf32>, vector<8x32xf32> -> vector<8x64xf32>
    %220 = vector.extract_strided_slice %6 {offsets = [56, 0], sizes = [8, 128], strides = [1, 1]} : vector<64x256xf32> to vector<8x128xf32>
    %221 = vector.extract_strided_slice %6 {offsets = [0, 128], sizes = [8, 128], strides = [1, 1]} : vector<64x256xf32> to vector<8x128xf32>
    %222 = tpu.concatenate %220, %221 in 1 : vector<8x128xf32>, vector<8x128xf32> -> vector<8x256xf32>
    %cst_24 = arith.constant dense<0.000000e+00> : vector<8x256xf32>
    %223 = tpu.matmul %219, %1, %cst_24 {dimension_numbers = #tpu.dot_dimension_numbers<[1], [0], [0], [1], [0, 0, 1, 1], [], []>} : vector<8x64xf32>, vector<64x256xf32>, vector<8x256xf32> -> vector<8x256xf32>
    %224 = arith.addf %222, %223 : vector<8x256xf32>
    %225 = arith.negf %224 : vector<8x256xf32>
    %226 = math.exp %225 : vector<8x256xf32>
    %cst_25 = arith.constant 1.000000e+00 : f32
    %227 = vector.broadcast %cst_25 : f32 to vector<8x256xf32>
    %228 = arith.addf %227, %226 : vector<8x256xf32>
    %229 = arith.divf %227, %228 : vector<8x256xf32>
    %230 = math.tanh %224 : vector<8x256xf32>
    %231 = vector.extract_strided_slice %229 {offsets = [0, 0], sizes = [8, 32], strides = [1, 1]} : vector<8x256xf32> to vector<8x32xf32>
    %232 = vector.extract_strided_slice %229 {offsets = [0, 32], sizes = [8, 32], strides = [1, 1]} : vector<8x256xf32> to vector<8x32xf32>
    %233 = vector.extract_strided_slice %230 {offsets = [0, 64], sizes = [8, 32], strides = [1, 1]} : vector<8x256xf32> to vector<8x32xf32>
    %234 = vector.extract_strided_slice %229 {offsets = [0, 96], sizes = [8, 32], strides = [1, 1]} : vector<8x256xf32> to vector<8x32xf32>
    %235 = vector.extract_strided_slice %229 {offsets = [0, 128], sizes = [8, 32], strides = [1, 1]} : vector<8x256xf32> to vector<8x32xf32>
    %236 = vector.extract_strided_slice %229 {offsets = [0, 160], sizes = [8, 32], strides = [1, 1]} : vector<8x256xf32> to vector<8x32xf32>
    %237 = vector.extract_strided_slice %230 {offsets = [0, 192], sizes = [8, 32], strides = [1, 1]} : vector<8x256xf32> to vector<8x32xf32>
    %238 = vector.extract_strided_slice %229 {offsets = [0, 224], sizes = [8, 32], strides = [1, 1]} : vector<8x256xf32> to vector<8x32xf32>
    %239 = arith.mulf %232, %211 : vector<8x32xf32>
    %240 = arith.mulf %231, %233 : vector<8x32xf32>
    %241 = arith.addf %239, %240 : vector<8x32xf32>
    %242 = arith.mulf %236, %214 : vector<8x32xf32>
    %243 = arith.mulf %235, %237 : vector<8x32xf32>
    %244 = arith.addf %242, %243 : vector<8x32xf32>
    %245 = math.tanh %241 : vector<8x32xf32>
    %246 = arith.mulf %234, %245 : vector<8x32xf32>
    %247 = math.tanh %244 : vector<8x32xf32>
    %248 = arith.mulf %238, %247 : vector<8x32xf32>
    %249 = tpu.concatenate %36, %66, %96, %126, %156, %186, %216, %246 in 0 : vector<8x32xf32>, vector<8x32xf32>, vector<8x32xf32>, vector<8x32xf32>, vector<8x32xf32>, vector<8x32xf32>, vector<8x32xf32>, vector<8x32xf32> -> vector<64x32xf32>
    %250 = tpu.concatenate %248, %218, %188, %158, %128, %98, %68, %38 in 0 : vector<8x32xf32>, vector<8x32xf32>, vector<8x32xf32>, vector<8x32xf32>, vector<8x32xf32>, vector<8x32xf32>, vector<8x32xf32>, vector<8x32xf32> -> vector<64x32xf32>
    %c0_26 = arith.constant 0 : index
    %c0_27 = arith.constant 0 : index
    %251 = vector.load %arg4[%c0_26, %c0_27] : memref<64x256xf32, #tpu.memory_space<vmem>>, vector<64x256xf32>
    %c0_28 = arith.constant 0 : index
    %c0_29 = arith.constant 0 : index
    %252 = vector.load %arg5[%c0_28, %c0_29] : memref<64x256xf32, #tpu.memory_space<vmem>>, vector<64x256xf32>
    %c0_30 = arith.constant 0 : index
    %c0_31 = arith.constant 0 : index
    %253 = vector.load %arg6[%c0_30, %c0_31] : memref<1x256xf32, #tpu.memory_space<vmem>>, vector<1x256xf32>
    %254 = vector.extract_strided_slice %251 {offsets = [0, 0], sizes = [32, 256], strides = [1, 1]} : vector<64x256xf32> to vector<32x256xf32>
    %cst_32 = arith.constant dense<0.000000e+00> : vector<64x256xf32>
    %255 = tpu.matmul %249, %254, %cst_32 {dimension_numbers = #tpu.dot_dimension_numbers<[1], [0], [0], [1], [0, 0, 1, 1], [], []>} : vector<64x32xf32>, vector<32x256xf32>, vector<64x256xf32> -> vector<64x256xf32>
    %256 = vector.extract_strided_slice %251 {offsets = [32, 0], sizes = [32, 256], strides = [1, 1]} : vector<64x256xf32> to vector<32x256xf32>
    %cst_33 = arith.constant dense<0.000000e+00> : vector<64x256xf32>
    %257 = tpu.matmul %250, %256, %cst_33 {dimension_numbers = #tpu.dot_dimension_numbers<[1], [0], [0], [1], [0, 0, 1, 1], [], []>} : vector<64x32xf32>, vector<32x256xf32>, vector<64x256xf32> -> vector<64x256xf32>
    %258 = arith.addf %255, %257 : vector<64x256xf32>
    %259 = vector.broadcast %253 : vector<1x256xf32> to vector<64x256xf32>
    %260 = arith.addf %258, %259 : vector<64x256xf32>
    %cst_34 = arith.constant 0.000000e+00 : f32
    %261 = vector.broadcast %cst_34 : f32 to vector<8x64xf32>
    %cst_35 = arith.constant 0.000000e+00 : f32
    %262 = vector.broadcast %cst_35 : f32 to vector<8x32xf32>
    %cst_36 = arith.constant 0.000000e+00 : f32
    %263 = vector.broadcast %cst_36 : f32 to vector<8x32xf32>
    %264 = vector.extract_strided_slice %260 {offsets = [0, 0], sizes = [8, 128], strides = [1, 1]} : vector<64x256xf32> to vector<8x128xf32>
    %265 = vector.extract_strided_slice %260 {offsets = [56, 128], sizes = [8, 128], strides = [1, 1]} : vector<64x256xf32> to vector<8x128xf32>
    %266 = tpu.concatenate %264, %265 in 1 : vector<8x128xf32>, vector<8x128xf32> -> vector<8x256xf32>
    %cst_37 = arith.constant dense<0.000000e+00> : vector<8x256xf32>
    %267 = tpu.matmul %261, %252, %cst_37 {dimension_numbers = #tpu.dot_dimension_numbers<[1], [0], [0], [1], [0, 0, 1, 1], [], []>} : vector<8x64xf32>, vector<64x256xf32>, vector<8x256xf32> -> vector<8x256xf32>
    %268 = arith.addf %266, %267 : vector<8x256xf32>
    %269 = arith.negf %268 : vector<8x256xf32>
    %270 = math.exp %269 : vector<8x256xf32>
    %cst_38 = arith.constant 1.000000e+00 : f32
    %271 = vector.broadcast %cst_38 : f32 to vector<8x256xf32>
    %272 = arith.addf %271, %270 : vector<8x256xf32>
    %273 = arith.divf %271, %272 : vector<8x256xf32>
    %274 = math.tanh %268 : vector<8x256xf32>
    %275 = vector.extract_strided_slice %273 {offsets = [0, 0], sizes = [8, 32], strides = [1, 1]} : vector<8x256xf32> to vector<8x32xf32>
    %276 = vector.extract_strided_slice %273 {offsets = [0, 32], sizes = [8, 32], strides = [1, 1]} : vector<8x256xf32> to vector<8x32xf32>
    %277 = vector.extract_strided_slice %274 {offsets = [0, 64], sizes = [8, 32], strides = [1, 1]} : vector<8x256xf32> to vector<8x32xf32>
    %278 = vector.extract_strided_slice %273 {offsets = [0, 96], sizes = [8, 32], strides = [1, 1]} : vector<8x256xf32> to vector<8x32xf32>
    %279 = vector.extract_strided_slice %273 {offsets = [0, 128], sizes = [8, 32], strides = [1, 1]} : vector<8x256xf32> to vector<8x32xf32>
    %280 = vector.extract_strided_slice %273 {offsets = [0, 160], sizes = [8, 32], strides = [1, 1]} : vector<8x256xf32> to vector<8x32xf32>
    %281 = vector.extract_strided_slice %274 {offsets = [0, 192], sizes = [8, 32], strides = [1, 1]} : vector<8x256xf32> to vector<8x32xf32>
    %282 = vector.extract_strided_slice %273 {offsets = [0, 224], sizes = [8, 32], strides = [1, 1]} : vector<8x256xf32> to vector<8x32xf32>
    %283 = arith.mulf %276, %262 : vector<8x32xf32>
    %284 = arith.mulf %275, %277 : vector<8x32xf32>
    %285 = arith.addf %283, %284 : vector<8x32xf32>
    %286 = arith.mulf %280, %263 : vector<8x32xf32>
    %287 = arith.mulf %279, %281 : vector<8x32xf32>
    %288 = arith.addf %286, %287 : vector<8x32xf32>
    %289 = math.tanh %285 : vector<8x32xf32>
    %290 = arith.mulf %278, %289 : vector<8x32xf32>
    %291 = math.tanh %288 : vector<8x32xf32>
    %292 = arith.mulf %282, %291 : vector<8x32xf32>
    %293 = tpu.concatenate %290, %292 in 1 : vector<8x32xf32>, vector<8x32xf32> -> vector<8x64xf32>
    %294 = vector.extract_strided_slice %260 {offsets = [8, 0], sizes = [8, 128], strides = [1, 1]} : vector<64x256xf32> to vector<8x128xf32>
    %295 = vector.extract_strided_slice %260 {offsets = [48, 128], sizes = [8, 128], strides = [1, 1]} : vector<64x256xf32> to vector<8x128xf32>
    %296 = tpu.concatenate %294, %295 in 1 : vector<8x128xf32>, vector<8x128xf32> -> vector<8x256xf32>
    %cst_39 = arith.constant dense<0.000000e+00> : vector<8x256xf32>
    %297 = tpu.matmul %293, %252, %cst_39 {dimension_numbers = #tpu.dot_dimension_numbers<[1], [0], [0], [1], [0, 0, 1, 1], [], []>} : vector<8x64xf32>, vector<64x256xf32>, vector<8x256xf32> -> vector<8x256xf32>
    %298 = arith.addf %296, %297 : vector<8x256xf32>
    %299 = arith.negf %298 : vector<8x256xf32>
    %300 = math.exp %299 : vector<8x256xf32>
    %cst_40 = arith.constant 1.000000e+00 : f32
    %301 = vector.broadcast %cst_40 : f32 to vector<8x256xf32>
    %302 = arith.addf %301, %300 : vector<8x256xf32>
    %303 = arith.divf %301, %302 : vector<8x256xf32>
    %304 = math.tanh %298 : vector<8x256xf32>
    %305 = vector.extract_strided_slice %303 {offsets = [0, 0], sizes = [8, 32], strides = [1, 1]} : vector<8x256xf32> to vector<8x32xf32>
    %306 = vector.extract_strided_slice %303 {offsets = [0, 32], sizes = [8, 32], strides = [1, 1]} : vector<8x256xf32> to vector<8x32xf32>
    %307 = vector.extract_strided_slice %304 {offsets = [0, 64], sizes = [8, 32], strides = [1, 1]} : vector<8x256xf32> to vector<8x32xf32>
    %308 = vector.extract_strided_slice %303 {offsets = [0, 96], sizes = [8, 32], strides = [1, 1]} : vector<8x256xf32> to vector<8x32xf32>
    %309 = vector.extract_strided_slice %303 {offsets = [0, 128], sizes = [8, 32], strides = [1, 1]} : vector<8x256xf32> to vector<8x32xf32>
    %310 = vector.extract_strided_slice %303 {offsets = [0, 160], sizes = [8, 32], strides = [1, 1]} : vector<8x256xf32> to vector<8x32xf32>
    %311 = vector.extract_strided_slice %304 {offsets = [0, 192], sizes = [8, 32], strides = [1, 1]} : vector<8x256xf32> to vector<8x32xf32>
    %312 = vector.extract_strided_slice %303 {offsets = [0, 224], sizes = [8, 32], strides = [1, 1]} : vector<8x256xf32> to vector<8x32xf32>
    %313 = arith.mulf %306, %285 : vector<8x32xf32>
    %314 = arith.mulf %305, %307 : vector<8x32xf32>
    %315 = arith.addf %313, %314 : vector<8x32xf32>
    %316 = arith.mulf %310, %288 : vector<8x32xf32>
    %317 = arith.mulf %309, %311 : vector<8x32xf32>
    %318 = arith.addf %316, %317 : vector<8x32xf32>
    %319 = math.tanh %315 : vector<8x32xf32>
    %320 = arith.mulf %308, %319 : vector<8x32xf32>
    %321 = math.tanh %318 : vector<8x32xf32>
    %322 = arith.mulf %312, %321 : vector<8x32xf32>
    %323 = tpu.concatenate %320, %322 in 1 : vector<8x32xf32>, vector<8x32xf32> -> vector<8x64xf32>
    %324 = vector.extract_strided_slice %260 {offsets = [16, 0], sizes = [8, 128], strides = [1, 1]} : vector<64x256xf32> to vector<8x128xf32>
    %325 = vector.extract_strided_slice %260 {offsets = [40, 128], sizes = [8, 128], strides = [1, 1]} : vector<64x256xf32> to vector<8x128xf32>
    %326 = tpu.concatenate %324, %325 in 1 : vector<8x128xf32>, vector<8x128xf32> -> vector<8x256xf32>
    %cst_41 = arith.constant dense<0.000000e+00> : vector<8x256xf32>
    %327 = tpu.matmul %323, %252, %cst_41 {dimension_numbers = #tpu.dot_dimension_numbers<[1], [0], [0], [1], [0, 0, 1, 1], [], []>} : vector<8x64xf32>, vector<64x256xf32>, vector<8x256xf32> -> vector<8x256xf32>
    %328 = arith.addf %326, %327 : vector<8x256xf32>
    %329 = arith.negf %328 : vector<8x256xf32>
    %330 = math.exp %329 : vector<8x256xf32>
    %cst_42 = arith.constant 1.000000e+00 : f32
    %331 = vector.broadcast %cst_42 : f32 to vector<8x256xf32>
    %332 = arith.addf %331, %330 : vector<8x256xf32>
    %333 = arith.divf %331, %332 : vector<8x256xf32>
    %334 = math.tanh %328 : vector<8x256xf32>
    %335 = vector.extract_strided_slice %333 {offsets = [0, 0], sizes = [8, 32], strides = [1, 1]} : vector<8x256xf32> to vector<8x32xf32>
    %336 = vector.extract_strided_slice %333 {offsets = [0, 32], sizes = [8, 32], strides = [1, 1]} : vector<8x256xf32> to vector<8x32xf32>
    %337 = vector.extract_strided_slice %334 {offsets = [0, 64], sizes = [8, 32], strides = [1, 1]} : vector<8x256xf32> to vector<8x32xf32>
    %338 = vector.extract_strided_slice %333 {offsets = [0, 96], sizes = [8, 32], strides = [1, 1]} : vector<8x256xf32> to vector<8x32xf32>
    %339 = vector.extract_strided_slice %333 {offsets = [0, 128], sizes = [8, 32], strides = [1, 1]} : vector<8x256xf32> to vector<8x32xf32>
    %340 = vector.extract_strided_slice %333 {offsets = [0, 160], sizes = [8, 32], strides = [1, 1]} : vector<8x256xf32> to vector<8x32xf32>
    %341 = vector.extract_strided_slice %334 {offsets = [0, 192], sizes = [8, 32], strides = [1, 1]} : vector<8x256xf32> to vector<8x32xf32>
    %342 = vector.extract_strided_slice %333 {offsets = [0, 224], sizes = [8, 32], strides = [1, 1]} : vector<8x256xf32> to vector<8x32xf32>
    %343 = arith.mulf %336, %315 : vector<8x32xf32>
    %344 = arith.mulf %335, %337 : vector<8x32xf32>
    %345 = arith.addf %343, %344 : vector<8x32xf32>
    %346 = arith.mulf %340, %318 : vector<8x32xf32>
    %347 = arith.mulf %339, %341 : vector<8x32xf32>
    %348 = arith.addf %346, %347 : vector<8x32xf32>
    %349 = math.tanh %345 : vector<8x32xf32>
    %350 = arith.mulf %338, %349 : vector<8x32xf32>
    %351 = math.tanh %348 : vector<8x32xf32>
    %352 = arith.mulf %342, %351 : vector<8x32xf32>
    %353 = tpu.concatenate %350, %352 in 1 : vector<8x32xf32>, vector<8x32xf32> -> vector<8x64xf32>
    %354 = vector.extract_strided_slice %260 {offsets = [24, 0], sizes = [8, 128], strides = [1, 1]} : vector<64x256xf32> to vector<8x128xf32>
    %355 = vector.extract_strided_slice %260 {offsets = [32, 128], sizes = [8, 128], strides = [1, 1]} : vector<64x256xf32> to vector<8x128xf32>
    %356 = tpu.concatenate %354, %355 in 1 : vector<8x128xf32>, vector<8x128xf32> -> vector<8x256xf32>
    %cst_43 = arith.constant dense<0.000000e+00> : vector<8x256xf32>
    %357 = tpu.matmul %353, %252, %cst_43 {dimension_numbers = #tpu.dot_dimension_numbers<[1], [0], [0], [1], [0, 0, 1, 1], [], []>} : vector<8x64xf32>, vector<64x256xf32>, vector<8x256xf32> -> vector<8x256xf32>
    %358 = arith.addf %356, %357 : vector<8x256xf32>
    %359 = arith.negf %358 : vector<8x256xf32>
    %360 = math.exp %359 : vector<8x256xf32>
    %cst_44 = arith.constant 1.000000e+00 : f32
    %361 = vector.broadcast %cst_44 : f32 to vector<8x256xf32>
    %362 = arith.addf %361, %360 : vector<8x256xf32>
    %363 = arith.divf %361, %362 : vector<8x256xf32>
    %364 = math.tanh %358 : vector<8x256xf32>
    %365 = vector.extract_strided_slice %363 {offsets = [0, 0], sizes = [8, 32], strides = [1, 1]} : vector<8x256xf32> to vector<8x32xf32>
    %366 = vector.extract_strided_slice %363 {offsets = [0, 32], sizes = [8, 32], strides = [1, 1]} : vector<8x256xf32> to vector<8x32xf32>
    %367 = vector.extract_strided_slice %364 {offsets = [0, 64], sizes = [8, 32], strides = [1, 1]} : vector<8x256xf32> to vector<8x32xf32>
    %368 = vector.extract_strided_slice %363 {offsets = [0, 96], sizes = [8, 32], strides = [1, 1]} : vector<8x256xf32> to vector<8x32xf32>
    %369 = vector.extract_strided_slice %363 {offsets = [0, 128], sizes = [8, 32], strides = [1, 1]} : vector<8x256xf32> to vector<8x32xf32>
    %370 = vector.extract_strided_slice %363 {offsets = [0, 160], sizes = [8, 32], strides = [1, 1]} : vector<8x256xf32> to vector<8x32xf32>
    %371 = vector.extract_strided_slice %364 {offsets = [0, 192], sizes = [8, 32], strides = [1, 1]} : vector<8x256xf32> to vector<8x32xf32>
    %372 = vector.extract_strided_slice %363 {offsets = [0, 224], sizes = [8, 32], strides = [1, 1]} : vector<8x256xf32> to vector<8x32xf32>
    %373 = arith.mulf %366, %345 : vector<8x32xf32>
    %374 = arith.mulf %365, %367 : vector<8x32xf32>
    %375 = arith.addf %373, %374 : vector<8x32xf32>
    %376 = arith.mulf %370, %348 : vector<8x32xf32>
    %377 = arith.mulf %369, %371 : vector<8x32xf32>
    %378 = arith.addf %376, %377 : vector<8x32xf32>
    %379 = math.tanh %375 : vector<8x32xf32>
    %380 = arith.mulf %368, %379 : vector<8x32xf32>
    %381 = math.tanh %378 : vector<8x32xf32>
    %382 = arith.mulf %372, %381 : vector<8x32xf32>
    %383 = tpu.concatenate %380, %382 in 1 : vector<8x32xf32>, vector<8x32xf32> -> vector<8x64xf32>
    %384 = vector.extract_strided_slice %260 {offsets = [32, 0], sizes = [8, 128], strides = [1, 1]} : vector<64x256xf32> to vector<8x128xf32>
    %385 = vector.extract_strided_slice %260 {offsets = [24, 128], sizes = [8, 128], strides = [1, 1]} : vector<64x256xf32> to vector<8x128xf32>
    %386 = tpu.concatenate %384, %385 in 1 : vector<8x128xf32>, vector<8x128xf32> -> vector<8x256xf32>
    %cst_45 = arith.constant dense<0.000000e+00> : vector<8x256xf32>
    %387 = tpu.matmul %383, %252, %cst_45 {dimension_numbers = #tpu.dot_dimension_numbers<[1], [0], [0], [1], [0, 0, 1, 1], [], []>} : vector<8x64xf32>, vector<64x256xf32>, vector<8x256xf32> -> vector<8x256xf32>
    %388 = arith.addf %386, %387 : vector<8x256xf32>
    %389 = arith.negf %388 : vector<8x256xf32>
    %390 = math.exp %389 : vector<8x256xf32>
    %cst_46 = arith.constant 1.000000e+00 : f32
    %391 = vector.broadcast %cst_46 : f32 to vector<8x256xf32>
    %392 = arith.addf %391, %390 : vector<8x256xf32>
    %393 = arith.divf %391, %392 : vector<8x256xf32>
    %394 = math.tanh %388 : vector<8x256xf32>
    %395 = vector.extract_strided_slice %393 {offsets = [0, 0], sizes = [8, 32], strides = [1, 1]} : vector<8x256xf32> to vector<8x32xf32>
    %396 = vector.extract_strided_slice %393 {offsets = [0, 32], sizes = [8, 32], strides = [1, 1]} : vector<8x256xf32> to vector<8x32xf32>
    %397 = vector.extract_strided_slice %394 {offsets = [0, 64], sizes = [8, 32], strides = [1, 1]} : vector<8x256xf32> to vector<8x32xf32>
    %398 = vector.extract_strided_slice %393 {offsets = [0, 96], sizes = [8, 32], strides = [1, 1]} : vector<8x256xf32> to vector<8x32xf32>
    %399 = vector.extract_strided_slice %393 {offsets = [0, 128], sizes = [8, 32], strides = [1, 1]} : vector<8x256xf32> to vector<8x32xf32>
    %400 = vector.extract_strided_slice %393 {offsets = [0, 160], sizes = [8, 32], strides = [1, 1]} : vector<8x256xf32> to vector<8x32xf32>
    %401 = vector.extract_strided_slice %394 {offsets = [0, 192], sizes = [8, 32], strides = [1, 1]} : vector<8x256xf32> to vector<8x32xf32>
    %402 = vector.extract_strided_slice %393 {offsets = [0, 224], sizes = [8, 32], strides = [1, 1]} : vector<8x256xf32> to vector<8x32xf32>
    %403 = arith.mulf %396, %375 : vector<8x32xf32>
    %404 = arith.mulf %395, %397 : vector<8x32xf32>
    %405 = arith.addf %403, %404 : vector<8x32xf32>
    %406 = arith.mulf %400, %378 : vector<8x32xf32>
    %407 = arith.mulf %399, %401 : vector<8x32xf32>
    %408 = arith.addf %406, %407 : vector<8x32xf32>
    %409 = math.tanh %405 : vector<8x32xf32>
    %410 = arith.mulf %398, %409 : vector<8x32xf32>
    %411 = math.tanh %408 : vector<8x32xf32>
    %412 = arith.mulf %402, %411 : vector<8x32xf32>
    %413 = tpu.concatenate %410, %412 in 1 : vector<8x32xf32>, vector<8x32xf32> -> vector<8x64xf32>
    %414 = vector.extract_strided_slice %260 {offsets = [40, 0], sizes = [8, 128], strides = [1, 1]} : vector<64x256xf32> to vector<8x128xf32>
    %415 = vector.extract_strided_slice %260 {offsets = [16, 128], sizes = [8, 128], strides = [1, 1]} : vector<64x256xf32> to vector<8x128xf32>
    %416 = tpu.concatenate %414, %415 in 1 : vector<8x128xf32>, vector<8x128xf32> -> vector<8x256xf32>
    %cst_47 = arith.constant dense<0.000000e+00> : vector<8x256xf32>
    %417 = tpu.matmul %413, %252, %cst_47 {dimension_numbers = #tpu.dot_dimension_numbers<[1], [0], [0], [1], [0, 0, 1, 1], [], []>} : vector<8x64xf32>, vector<64x256xf32>, vector<8x256xf32> -> vector<8x256xf32>
    %418 = arith.addf %416, %417 : vector<8x256xf32>
    %419 = arith.negf %418 : vector<8x256xf32>
    %420 = math.exp %419 : vector<8x256xf32>
    %cst_48 = arith.constant 1.000000e+00 : f32
    %421 = vector.broadcast %cst_48 : f32 to vector<8x256xf32>
    %422 = arith.addf %421, %420 : vector<8x256xf32>
    %423 = arith.divf %421, %422 : vector<8x256xf32>
    %424 = math.tanh %418 : vector<8x256xf32>
    %425 = vector.extract_strided_slice %423 {offsets = [0, 0], sizes = [8, 32], strides = [1, 1]} : vector<8x256xf32> to vector<8x32xf32>
    %426 = vector.extract_strided_slice %423 {offsets = [0, 32], sizes = [8, 32], strides = [1, 1]} : vector<8x256xf32> to vector<8x32xf32>
    %427 = vector.extract_strided_slice %424 {offsets = [0, 64], sizes = [8, 32], strides = [1, 1]} : vector<8x256xf32> to vector<8x32xf32>
    %428 = vector.extract_strided_slice %423 {offsets = [0, 96], sizes = [8, 32], strides = [1, 1]} : vector<8x256xf32> to vector<8x32xf32>
    %429 = vector.extract_strided_slice %423 {offsets = [0, 128], sizes = [8, 32], strides = [1, 1]} : vector<8x256xf32> to vector<8x32xf32>
    %430 = vector.extract_strided_slice %423 {offsets = [0, 160], sizes = [8, 32], strides = [1, 1]} : vector<8x256xf32> to vector<8x32xf32>
    %431 = vector.extract_strided_slice %424 {offsets = [0, 192], sizes = [8, 32], strides = [1, 1]} : vector<8x256xf32> to vector<8x32xf32>
    %432 = vector.extract_strided_slice %423 {offsets = [0, 224], sizes = [8, 32], strides = [1, 1]} : vector<8x256xf32> to vector<8x32xf32>
    %433 = arith.mulf %426, %405 : vector<8x32xf32>
    %434 = arith.mulf %425, %427 : vector<8x32xf32>
    %435 = arith.addf %433, %434 : vector<8x32xf32>
    %436 = arith.mulf %430, %408 : vector<8x32xf32>
    %437 = arith.mulf %429, %431 : vector<8x32xf32>
    %438 = arith.addf %436, %437 : vector<8x32xf32>
    %439 = math.tanh %435 : vector<8x32xf32>
    %440 = arith.mulf %428, %439 : vector<8x32xf32>
    %441 = math.tanh %438 : vector<8x32xf32>
    %442 = arith.mulf %432, %441 : vector<8x32xf32>
    %443 = tpu.concatenate %440, %442 in 1 : vector<8x32xf32>, vector<8x32xf32> -> vector<8x64xf32>
    %444 = vector.extract_strided_slice %260 {offsets = [48, 0], sizes = [8, 128], strides = [1, 1]} : vector<64x256xf32> to vector<8x128xf32>
    %445 = vector.extract_strided_slice %260 {offsets = [8, 128], sizes = [8, 128], strides = [1, 1]} : vector<64x256xf32> to vector<8x128xf32>
    %446 = tpu.concatenate %444, %445 in 1 : vector<8x128xf32>, vector<8x128xf32> -> vector<8x256xf32>
    %cst_49 = arith.constant dense<0.000000e+00> : vector<8x256xf32>
    %447 = tpu.matmul %443, %252, %cst_49 {dimension_numbers = #tpu.dot_dimension_numbers<[1], [0], [0], [1], [0, 0, 1, 1], [], []>} : vector<8x64xf32>, vector<64x256xf32>, vector<8x256xf32> -> vector<8x256xf32>
    %448 = arith.addf %446, %447 : vector<8x256xf32>
    %449 = arith.negf %448 : vector<8x256xf32>
    %450 = math.exp %449 : vector<8x256xf32>
    %cst_50 = arith.constant 1.000000e+00 : f32
    %451 = vector.broadcast %cst_50 : f32 to vector<8x256xf32>
    %452 = arith.addf %451, %450 : vector<8x256xf32>
    %453 = arith.divf %451, %452 : vector<8x256xf32>
    %454 = math.tanh %448 : vector<8x256xf32>
    %455 = vector.extract_strided_slice %453 {offsets = [0, 0], sizes = [8, 32], strides = [1, 1]} : vector<8x256xf32> to vector<8x32xf32>
    %456 = vector.extract_strided_slice %453 {offsets = [0, 32], sizes = [8, 32], strides = [1, 1]} : vector<8x256xf32> to vector<8x32xf32>
    %457 = vector.extract_strided_slice %454 {offsets = [0, 64], sizes = [8, 32], strides = [1, 1]} : vector<8x256xf32> to vector<8x32xf32>
    %458 = vector.extract_strided_slice %453 {offsets = [0, 96], sizes = [8, 32], strides = [1, 1]} : vector<8x256xf32> to vector<8x32xf32>
    %459 = vector.extract_strided_slice %453 {offsets = [0, 128], sizes = [8, 32], strides = [1, 1]} : vector<8x256xf32> to vector<8x32xf32>
    %460 = vector.extract_strided_slice %453 {offsets = [0, 160], sizes = [8, 32], strides = [1, 1]} : vector<8x256xf32> to vector<8x32xf32>
    %461 = vector.extract_strided_slice %454 {offsets = [0, 192], sizes = [8, 32], strides = [1, 1]} : vector<8x256xf32> to vector<8x32xf32>
    %462 = vector.extract_strided_slice %453 {offsets = [0, 224], sizes = [8, 32], strides = [1, 1]} : vector<8x256xf32> to vector<8x32xf32>
    %463 = arith.mulf %456, %435 : vector<8x32xf32>
    %464 = arith.mulf %455, %457 : vector<8x32xf32>
    %465 = arith.addf %463, %464 : vector<8x32xf32>
    %466 = arith.mulf %460, %438 : vector<8x32xf32>
    %467 = arith.mulf %459, %461 : vector<8x32xf32>
    %468 = arith.addf %466, %467 : vector<8x32xf32>
    %469 = math.tanh %465 : vector<8x32xf32>
    %470 = arith.mulf %458, %469 : vector<8x32xf32>
    %471 = math.tanh %468 : vector<8x32xf32>
    %472 = arith.mulf %462, %471 : vector<8x32xf32>
    %473 = tpu.concatenate %470, %472 in 1 : vector<8x32xf32>, vector<8x32xf32> -> vector<8x64xf32>
    %474 = vector.extract_strided_slice %260 {offsets = [56, 0], sizes = [8, 128], strides = [1, 1]} : vector<64x256xf32> to vector<8x128xf32>
    %475 = vector.extract_strided_slice %260 {offsets = [0, 128], sizes = [8, 128], strides = [1, 1]} : vector<64x256xf32> to vector<8x128xf32>
    %476 = tpu.concatenate %474, %475 in 1 : vector<8x128xf32>, vector<8x128xf32> -> vector<8x256xf32>
    %cst_51 = arith.constant dense<0.000000e+00> : vector<8x256xf32>
    %477 = tpu.matmul %473, %252, %cst_51 {dimension_numbers = #tpu.dot_dimension_numbers<[1], [0], [0], [1], [0, 0, 1, 1], [], []>} : vector<8x64xf32>, vector<64x256xf32>, vector<8x256xf32> -> vector<8x256xf32>
    %478 = arith.addf %476, %477 : vector<8x256xf32>
    %479 = arith.negf %478 : vector<8x256xf32>
    %480 = math.exp %479 : vector<8x256xf32>
    %cst_52 = arith.constant 1.000000e+00 : f32
    %481 = vector.broadcast %cst_52 : f32 to vector<8x256xf32>
    %482 = arith.addf %481, %480 : vector<8x256xf32>
    %483 = arith.divf %481, %482 : vector<8x256xf32>
    %484 = math.tanh %478 : vector<8x256xf32>
    %485 = vector.extract_strided_slice %483 {offsets = [0, 0], sizes = [8, 32], strides = [1, 1]} : vector<8x256xf32> to vector<8x32xf32>
    %486 = vector.extract_strided_slice %483 {offsets = [0, 32], sizes = [8, 32], strides = [1, 1]} : vector<8x256xf32> to vector<8x32xf32>
    %487 = vector.extract_strided_slice %484 {offsets = [0, 64], sizes = [8, 32], strides = [1, 1]} : vector<8x256xf32> to vector<8x32xf32>
    %488 = vector.extract_strided_slice %483 {offsets = [0, 96], sizes = [8, 32], strides = [1, 1]} : vector<8x256xf32> to vector<8x32xf32>
    %489 = vector.extract_strided_slice %483 {offsets = [0, 128], sizes = [8, 32], strides = [1, 1]} : vector<8x256xf32> to vector<8x32xf32>
    %490 = vector.extract_strided_slice %483 {offsets = [0, 160], sizes = [8, 32], strides = [1, 1]} : vector<8x256xf32> to vector<8x32xf32>
    %491 = vector.extract_strided_slice %484 {offsets = [0, 192], sizes = [8, 32], strides = [1, 1]} : vector<8x256xf32> to vector<8x32xf32>
    %492 = vector.extract_strided_slice %483 {offsets = [0, 224], sizes = [8, 32], strides = [1, 1]} : vector<8x256xf32> to vector<8x32xf32>
    %493 = arith.mulf %486, %465 : vector<8x32xf32>
    %494 = arith.mulf %485, %487 : vector<8x32xf32>
    %495 = arith.addf %493, %494 : vector<8x32xf32>
    %496 = arith.mulf %490, %468 : vector<8x32xf32>
    %497 = arith.mulf %489, %491 : vector<8x32xf32>
    %498 = arith.addf %496, %497 : vector<8x32xf32>
    %499 = math.tanh %495 : vector<8x32xf32>
    %500 = arith.mulf %488, %499 : vector<8x32xf32>
    %501 = math.tanh %498 : vector<8x32xf32>
    %502 = arith.mulf %492, %501 : vector<8x32xf32>
    %503 = tpu.concatenate %290, %320, %350, %380, %410, %440, %470, %500 in 0 : vector<8x32xf32>, vector<8x32xf32>, vector<8x32xf32>, vector<8x32xf32>, vector<8x32xf32>, vector<8x32xf32>, vector<8x32xf32>, vector<8x32xf32> -> vector<64x32xf32>
    %504 = tpu.concatenate %502, %472, %442, %412, %382, %352, %322, %292 in 0 : vector<8x32xf32>, vector<8x32xf32>, vector<8x32xf32>, vector<8x32xf32>, vector<8x32xf32>, vector<8x32xf32>, vector<8x32xf32>, vector<8x32xf32> -> vector<64x32xf32>
    %c0_53 = arith.constant 0 : index
    %c0_54 = arith.constant 0 : index
    %505 = vector.load %arg7[%c0_53, %c0_54] : memref<64x128xf32, #tpu.memory_space<vmem>>, vector<64x128xf32>
    %506 = vector.extract_strided_slice %505 {offsets = [0, 0], sizes = [32, 128], strides = [1, 1]} : vector<64x128xf32> to vector<32x128xf32>
    %cst_55 = arith.constant dense<0.000000e+00> : vector<64x128xf32>
    %507 = tpu.matmul %503, %506, %cst_55 {dimension_numbers = #tpu.dot_dimension_numbers<[1], [0], [0], [1], [0, 0, 1, 1], [], []>} : vector<64x32xf32>, vector<32x128xf32>, vector<64x128xf32> -> vector<64x128xf32>
    %508 = vector.extract_strided_slice %505 {offsets = [32, 0], sizes = [32, 128], strides = [1, 1]} : vector<64x128xf32> to vector<32x128xf32>
    %cst_56 = arith.constant dense<0.000000e+00> : vector<64x128xf32>
    %509 = tpu.matmul %504, %508, %cst_56 {dimension_numbers = #tpu.dot_dimension_numbers<[1], [0], [0], [1], [0, 0, 1, 1], [], []>} : vector<64x32xf32>, vector<32x128xf32>, vector<64x128xf32> -> vector<64x128xf32>
    %510 = arith.addf %507, %509 : vector<64x128xf32>
    %c0_57 = arith.constant 0 : index
    %c0_58 = arith.constant 0 : index
    %511 = vector.load %arg8[%c0_57, %c0_58] : memref<1x128xf32, #tpu.memory_space<vmem>>, vector<1x128xf32>
    %512 = vector.broadcast %511 : vector<1x128xf32> to vector<64x128xf32>
    %513 = arith.addf %510, %512 : vector<64x128xf32>
    %c0_59 = arith.constant 0 : index
    %c0_60 = arith.constant 0 : index
    %514 = vector.load %arg9[%c0_59, %c0_60] : memref<64x128xf32, #tpu.memory_space<vmem>>, vector<64x128xf32>
    tpu.vector_store %arg9[%c0_59, %c0_60], %513 {strides = array<i32>} : memref<64x128xf32, #tpu.memory_space<vmem>>, vector<64x128xf32>,
    %515 = tpu.concatenate %246, %248, %500, %502 in 0 : vector<8x32xf32>, vector<8x32xf32>, vector<8x32xf32>, vector<8x32xf32> -> vector<32x32xf32>
    %c0_61 = arith.constant 0 : index
    %c0_62 = arith.constant 0 : index
    %516 = vector.load %arg10[%c0_61, %c0_62] : memref<32x32xf32, #tpu.memory_space<vmem>>, vector<32x32xf32>
    tpu.vector_store %arg10[%c0_61, %c0_62], %515 {strides = array<i32>} : memref<32x32xf32, #tpu.memory_space<vmem>>, vector<32x32xf32>,
    %517 = tpu.concatenate %241, %244, %495, %498 in 0 : vector<8x32xf32>, vector<8x32xf32>, vector<8x32xf32>, vector<8x32xf32> -> vector<32x32xf32>
    %c0_63 = arith.constant 0 : index
    %c0_64 = arith.constant 0 : index
    %518 = vector.load %arg11[%c0_63, %c0_64] : memref<32x32xf32, #tpu.memory_space<vmem>>, vector<32x32xf32>
    tpu.vector_store %arg11[%c0_63, %c0_64], %517 {strides = array<i32>} : memref<32x32xf32, #tpu.memory_space<vmem>>, vector<32x32xf32>,
    return
  }
}

</mosaic_0001>

<bundles_post_ra>
// kernel: decoder_forward.1
= control target key start
LH: loop header
LB: loop body
LE: loop exit
PB: predicated region body
PF: predicated region fallthrough
CT: control target
= control target key end

     0   :  { %v3412_v3 = vmov 0.0   ;;  %vm75_vm0 = vcmask 130048   ;;  %v65_v29 = vlaneseq  ;;  %s3414_s14 = smov 32   ;;  %vm346_vm1 = vcmask 261120   ;;  %s3415_s29 = smov 96   ;;  %s4646_s1 = inlined_call_operand.vmem [shape: f32[16,256], index: 1, kind: input, shape index: {}]   ;;  %s4647_s2 = inlined_call_operand.vmem [shape: f32[64,256], index: 2, kind: input, shape index: {}]   ;;  %s4648_s0 = inlined_call_operand.vmem [shape: f32[64,16], index: 0, kind: input, shape index: {}]   ;;  %s4649_s3 = inlined_call_operand.vmem [shape: f32[1,256], index: 3, kind: input, shape index: {}]   ;;  %s4650_s4 = inlined_call_operand.vmem [shape: f32[64,256], index: 4, kind: input, shape index: {}]   ;;  %s4651_s5 = inlined_call_operand.vmem [shape: f32[64,256], index: 5, kind: input, shape index: {}]   ;;  %s4652_s10 = inlined_call_operand.vmem [shape: f32[32,32], index: 10, kind: output, shape index: {1}]   ;;  %s4653_s6 = inlined_call_operand.vmem [shape: f32[1,256], index: 6, kind: input, shape index: {}]   ;;  %s4654_s7 = inlined_call_operand.vmem [shape: f32[64,128], index: 7, kind: input, shape index: {}]   ;;  %s4655_s11 = inlined_call_operand.vmem [shape: f32[32,32], index: 11, kind: output, shape index: {2}]   ;;  %s4656_s8 = inlined_call_operand.vmem [shape: f32[1,128], index: 8, kind: input, shape index: {}]   ;;  %s4657_s9 = inlined_call_operand.vmem [shape: f32[64,128], index: 9, kind: output, shape index: {0}]  }
   0x1   :  { %v38_v0 = vld [vmem:[%s4646_s1 + $0x18] sm:$0xff]  ;;  %v37_v2 = vld [vmem:[%s4646_s1 + $0x10] sm:$0xff]  ;;  %164 = vmatprep.mubr.f32.mxu0 %v3412_v3  ;;  %281 = vmatprep.mubr.f32.mxu1 %v3412_v3  ;;  %v36_v5 = vld [vmem:[%s4646_s1 + $0x8] sm:$0xff]  ;;  %vm213_vm2 = vcmask 523264  }
   0x2   :  { %v3482_v1 = vld [vmem:[%s4647_s2 + $0x78] sm:$0xff]  ;;  %128 = vmatprep.subr.mxu0 %v38_v0  ;;  %v3493_v4 = vld [vmem:[%s4647_s2 + $0x70] sm:$0xff]  ;;  %v3501_v6 = vld [vmem:[%s4647_s2 + $0x68] sm:$0xff]  ;;  %v3662_v30 = vshrl.u32 %v65_v29, 7 }
   0x3   :  { %233 = vmatprep.subr.mxu1 %v3482_v1  ;;  %129 = vmatpush1.msra.mxu0 %v37_v2  ;;  %v35_v7 = vld [vmem:[%s4646_s1] sm:$0xff]  ;;  %v3519_v10 = vld [vmem:[%s4647_s2 + $0x58] sm:$0xff]  ;;  %v3524_v11 = vld [vmem:[%s4647_s2 + $0x50] sm:$0xff] }
   0x4   :  { %234 = vmatpush1.msra.mxu1 %v3493_v4  ;;  %v3510_v8 = vld [vmem:[%s4647_s2 + $0x60] sm:$0xff]  ;;  %130 = vmatprep.subr.mxu0 %v36_v5  ;;  %v3530_v12 = vld [vmem:[%s4647_s2 + $0x48] sm:$0xff]  ;;  %v3547_v15 = vld [vmem:[%s4647_s2 + $0x38] sm:$0xff]  ;;  %v71_v31 = vsub.s32 1, %v3662_v30  ;;  %v67_v33 = vsub.s32 0, %v3662_v30 }
   0x5   :  { %v56_v9 = vld [vmem:[%s4648_s0] sm:$0xff]  ;;  %235 = vmatprep.subr.mxu1 %v3501_v6  ;;  %131 = vmatpush1.msra.mxu0 %v35_v7  ;;  %v57_v14 = vld [vmem:[%s4648_s0 + $0x8] sm:$0xff]  ;;  %v3553_v16 = vld [vmem:[%s4647_s2 + $0x30] sm:$0xff] }
   0x6   :  { %236 = vmatpush1.msra.mxu1 %v3510_v8  ;;  %2993 = vmatmul.mubr.msk.f32.vlgmr.msra.gmra.mxu0 %vm75_vm0, %v56_v9  ;;  %v3537_v13 = vld [vmem:[%s4647_s2 + $0x40] sm:$0xff]  ;;  %v3560_v17 = vld [vmem:[%s4647_s2 + $0x28] sm:$0xff]  ;;  %v58_v19 = vld [vmem:[%s4648_s0 + $0x10] sm:$0xff] }
   0x7   :  { %237 = vmatprep.subr.mxu1 %v3519_v10  ;;  %170 = vmatprep.mubr.f32.mxu0 %v3412_v3  ;;  %v3568_v18 = vld [vmem:[%s4647_s2 + $0x20] sm:$0xff]  ;;  %v3578_v20 = vld [vmem:[%s4647_s2 + $0x18] sm:$0xff]  ;;  %v3584_v21 = vld [vmem:[%s4647_s2 + $0x10] sm:$0xff] }
   0x8   :  { %238 = vmatpush1.msra.mxu1 %v3524_v11  ;;  %500 = vmatprep.subr.mxu0 %v3482_v1  ;;  %v3591_v22 = vld [vmem:[%s4647_s2 + $0x8] sm:$0xff]  ;;  %v3599_v23 = vld [vmem:[%s4647_s2] sm:$0xff]  ;;  %v59_v24 = vld [vmem:[%s4648_s0 + $0x18] sm:$0xff] }
   0x9   :  { %239 = vmatprep.subr.mxu1 %v3530_v12  ;;  %501 = vmatpush1.msra.mxu0 %v3493_v4  ;;  %v60_v25 = vld [vmem:[%s4648_s0 + $0x20] sm:$0xff]  ;;  %v61_v26 = vld [vmem:[%s4648_s0 + $0x28] sm:$0xff]  ;;  %v62_v27 = vld [vmem:[%s4648_s0 + $0x30] sm:$0xff] }
   0xa   :  { %240 = vmatpush1.msra.mxu1 %v3537_v13  ;;  %2994 = vmatmul.mubr.msk.f32.gmra.mxu0 %vm75_vm0, %v57_v14  ;;  %v63_v28 = vld [vmem:[%s4648_s0 + $0x38] sm:$0xff]  ;;  %v55_v32 = vld [vmem:[%s4649_s3] sm:$0x3]  ;;  %s3413_s3 = smov 64  }
   0xb   :  { %241 = vmatprep.subr.mxu1 %v3547_v15  ;;  %176 = vmatprep.mubr.f32.mxu0 %v3412_v3  ;;  %v72_v34 = vrot.slane %v55_v32, %v71_v31  ;;  %v68_v37 = vrot.slane %v55_v32, %v67_v33 }
   0xc   :  { %242 = vmatpush1.msra.mxu1 %v3553_v16  ;;  %502 = vmatprep.subr.mxu0 %v3501_v6 }
   0xd   :  { %243 = vmatprep.subr.mxu1 %v3560_v17  ;;  %503 = vmatpush1.msra.mxu0 %v3510_v8 }
   0xe   :  { %244 = vmatpush1.msra.mxu1 %v3568_v18  ;;  %2995 = vmatmul.mubr.msk.f32.gmra.mxu0 %vm75_vm0, %v58_v19 }
   0xf   :  { %245 = vmatprep.subr.mxu1 %v3578_v20  ;;  %182 = vmatprep.mubr.f32.mxu0 %v3412_v3 }
  0x10   :  { %246 = vmatpush1.msra.mxu1 %v3584_v21  ;;  %504 = vmatprep.subr.mxu0 %v3519_v10 }
  0x11   :  { %247 = vmatprep.subr.mxu1 %v3591_v22  ;;  %505 = vmatpush1.msra.mxu0 %v3524_v11 }
  0x12   :  { %248 = vmatpush1.msra.mxu1 %v3599_v23  ;;  %2996 = vmatmul.mubr.msk.f32.gmra.mxu0 %vm75_vm0, %v59_v24 }
  0x13   :  { %282 = vmatmul.mubr.f32.vlgmr.msra.gmra.mxu1 %v3412_v3  ;;  %188 = vmatprep.mubr.f32.mxu0 %v3412_v3 }
  0x14   :  { %367 = vmatprep.subr.mxu1 %v3482_v1  ;;  %415 = vmatprep.mubr.f32.mxu1 %v3412_v3 }
  0x15   :  { %368 = vmatpush1.msra.mxu1 %v3493_v4  ;;  %506 = vmatprep.subr.mxu0 %v3530_v12 }
  0x16   :  { %369 = vmatprep.subr.mxu1 %v3501_v6  ;;  %2997 = vmatmul.mubr.msk.f32.gmra.mxu0 %vm75_vm0, %v60_v25 }
  0x17   :  { %370 = vmatpush1.msra.mxu1 %v3510_v8  ;;  %194 = vmatprep.mubr.f32.mxu0 %v3412_v3 }
  0x18   :  { %371 = vmatprep.subr.mxu1 %v3519_v10  ;;  %507 = vmatpush1.msra.mxu0 %v3537_v13 }
  0x19   :  { %372 = vmatpush1.msra.mxu1 %v3524_v11  ;;  %508 = vmatprep.subr.mxu0 %v3547_v15 }
  0x1a   :  { %373 = vmatprep.subr.mxu1 %v3530_v12  ;;  %2998 = vmatmul.mubr.msk.f32.gmra.mxu0 %vm75_vm0, %v61_v26 }
  0x1b   :  { %374 = vmatpush1.msra.mxu1 %v3537_v13  ;;  %200 = vmatprep.mubr.f32.mxu0 %v3412_v3 }
  0x1c   :  { %375 = vmatprep.subr.mxu1 %v3547_v15  ;;  %509 = vmatpush1.msra.mxu0 %v3553_v16 }
  0x1d   :  { %376 = vmatpush1.msra.mxu1 %v3553_v16  ;;  %510 = vmatprep.subr.mxu0 %v3560_v17 }
  0x1e   :  { %377 = vmatprep.subr.mxu1 %v3560_v17  ;;  %2999 = vmatmul.mubr.msk.f32.gmra.mxu0 %vm75_vm0, %v62_v27 }
  0x1f   :  { %378 = vmatpush1.msra.mxu1 %v3568_v18  ;;  %206 = vmatprep.mubr.f32.mxu0 %v3412_v3 }
  0x20   :  { %379 = vmatprep.subr.mxu1 %v3578_v20  ;;  %511 = vmatpush1.msra.mxu0 %v3568_v18 }
  0x21   :  { %380 = vmatpush1.msra.mxu1 %v3584_v21  ;;  %512 = vmatprep.subr.mxu0 %v3578_v20 }
  0x22   :  { %381 = vmatprep.subr.mxu1 %v3591_v22  ;;  %3000 = vmatmul.mubr.msk.f32.gmra.mxu0 %vm75_vm0, %v63_v28 }
  0x23   :  { %382 = vmatpush1.msra.mxu1 %v3599_v23  ;;  %513 = vmatpush1.msra.mxu0 %v3584_v21 }
  0x24   :  { %548 = vmatprep.mubr.f32.mxu0 %v3412_v3  ;;  %514 = vmatprep.subr.mxu0 %v3591_v22 }
  0x25   :  { %633 = vmatprep.subr.mxu1 %v3482_v1  ;;  %515 = vmatpush1.msra.mxu0 %v3599_v23 }
  0x26   :  { %766 = vmatprep.subr.mxu0 %v3482_v1 }
  0xc6   :  { %v166_v35 = vpop.f32.mrf.mxu0 }
  0xc7   :  { %v167_v46 = vadd.f32 %v166_v35, %v68_v37 }
  0xc8   :  { %v168_v36 = vpop.f32.mrf.mxu0 }
  0xc9   :  { %v3673_v38 = vadd.f32 %v168_v36, %v72_v34 }
  0xca   :  { %v172_v39 = vpop.f32.mrf.mxu0 }
  0xcb   :  { %v3675_v40 = vadd.f32 %v172_v39, %v68_v37 }
  0xcc   :  { %v174_v41 = vpop.f32.mrf.mxu0 }
  0xcd   :  { %v3677_v42 = vadd.f32 %v174_v41, %v72_v34 }
  0xce   :  { %v178_v43 = vpop.f32.mrf.mxu0 }
  0xcf   :  { %v3679_v44 = vadd.f32 %v178_v43, %v68_v37 }
  0xd0   :  { %v180_v45 = vpop.f32.mrf.mxu0 }
  0xd1   :  { %v3681_v47 = vadd.f32 %v180_v45, %v72_v34 }
  0xd2   :  { %v184_v48 = vpop.f32.mrf.mxu0 }
  0xd3   :  { %v283_v49 = vpop.f32.mrf.mxu1  ;;  %v3683_v50 = vadd.f32 %v184_v48, %v68_v37 }
  0xd4   :  { %v288_v51 = vadd.f32 %v283_v49, %v167_v46  ;;  %v186_v52 = vpop.f32.mrf.mxu0 }
  0xd5   :  { %v3685_v53 = vadd.f32 %v186_v52, %v72_v34  ;;  %v285_v24 = vpop.f32.mrf.mxu1 }
  0xd6   :  { %3156 = vtanh.f32 %v288_v51  ;;  %v190_v54 = vpop.f32.mrf.mxu0  ;;  %v3001_v27 = vmul.f32 -1.442695, %v288_v51 }
  0xd7   :  { %v3687_v55 = vadd.f32 %v190_v54, %v68_v37 }
  0xd8   :  { %v192_v56 = vpop.f32.mrf.mxu0 }
  0xd9   :  { %v3689_v57 = vadd.f32 %v192_v56, %v72_v34 }
  0xda   :  { %v196_v58 = vpop.f32.mrf.mxu0 }
  0xdb   :  { %v3691_v59 = vadd.f32 %v196_v58, %v68_v37 }
  0xdc   :  { %v198_v60 = vpop.f32.mrf.mxu0 }
  0xdd   :  { %v3693_v61 = vadd.f32 %v198_v60, %v72_v34 }
  0xde   :  { %v202_v62 = vpop.f32.mrf.mxu0 }
  0xdf   :  { %v3695_v63 = vadd.f32 %v202_v62, %v68_v37 }
  0xe0   :  { %v204_v0 = vpop.f32.mrf.mxu0 }
  0xe1   :  { %v3697_v2 = vadd.f32 %v204_v0, %v72_v34 }
  0xe2   :  { %v208_v7 = vpop.f32.mrf.mxu0 }
  0xe3   :  { %v3157_v5 = vpop.eup %3156  ;;  %v3699_v9 = vadd.f32 %v208_v7, %v68_v37 }
  0xe4   :  { %306 = vrot.lane.b32.xlu0 %v3157_v5, %s3413_s3  ;;  %v210_v14 = vpop.f32.mrf.mxu0 }
  0xe5   :  { %v211_v19 = vadd.f32 %v210_v14, %v72_v34 }
  0xe7   :  { %v289_v25 = vadd.f32 %v285_v24, %v211_v19 }
  0xe9   :  { %3158 = vtanh.f32 %v289_v25  ;;  %v3002_v32 = vmul.f32 -1.442695, %v289_v25 }
  0xea   :  { %3160 = vpow2.f32 %v3001_v27 }
  0xf6   :  { %v3159_v26 = vpop.eup %3158 }
  0xf7   :  { %317 = vrot.lane.b32.xlu0 %v3159_v26, %s3413_s3  ;;  %v3161_v28 = vpop.eup %3160 }
  0xf8   :  { %v296_v29 = vadd.f32 1.0, %v3161_v28 }
  0xfa   :  { %3162 = vrcp.f32 %v296_v29 }
  0xfb   :  { %3164 = vpow2.f32 %v3002_v32 }
 0x107   :  { %v3163_v35 = vpop.eup %3162 }
 0x108   :  { %v3165_v36 = vpop.eup %3164  ;;  %v304_v46 = vmul.f32 0.0, %v3163_v35 }
 0x109   :  { %v297_v41 = vadd.f32 1.0, %v3165_v36 }
 0x10b   :  { %3166 = vrcp.f32 %v297_v41 }
 0x118   :  { %v3167_v34 = vpop.eup %3166 }
 0x119   :  { %v315_v52 = vmul.f32 0.0, %v3167_v34 }
 0x156   :  { %v307_v37 = vpop.permute.xlu0 %306 }
 0x157   :  { %v309_v39 = vmul.f32 %v3163_v35, %v307_v37 }
 0x159   :  { %311 = vrot.lane.b32.xlu1 %v309_v39, %s3414_s14 }
 0x169   :  { %v318_v43 = vpop.permute.xlu0 %317 }
 0x16a   :  { %v320_v45 = vmul.f32 %v3167_v34, %v318_v43 }
 0x16c   :  { %322 = vrot.lane.b32.xlu1 %v320_v45, %s3414_s14 }
 0x1cb   :  { %v312_v48 = vpop.permute.xlu1 %311 }
 0x1cc   :  { %v3705_v49 = vadd.f32 %v312_v48, %v304_v46 }
 0x1ce   :  { %3168 = vtanh.f32 %v3705_v49 }
 0x1db   :  { %v3169_v51 = vpop.eup %3168 }
 0x1dc   :  { %328 = vrot.lane.b32.xlu0 %v3169_v51, %s3413_s3 }
 0x1de   :  { %v323_v54 = vpop.permute.xlu1 %322 }
 0x1df   :  { %v3709_v56 = vadd.f32 %v323_v54, %v315_v52 }
 0x1e1   :  { %3170 = vtanh.f32 %v3709_v56 }
 0x1ee   :  { %v3171_v58 = vpop.eup %3170 }
 0x1ef   :  { %334 = vrot.lane.b32.xlu1 %v3171_v58, %s3413_s3 }
 0x24e   :  { %v329_v60 = vpop.permute.xlu0 %328 }
 0x24f   :  { %v331_v62 = vmul.f32 %v3163_v35, %v329_v60 }
 0x251   :  { %339 = vrot.lane.b32.xlu0 %v331_v62, %s3414_s14 }
 0x261   :  { %v335_v0 = vpop.permute.xlu1 %334 }
 0x262   :  { %v3714_v5 = vmul.f32 %v3167_v34, %v335_v0 }
 0x264   :  { %343 = vrot.lane.b32.xlu1 %v3714_v5, %s3413_s3 }
 0x2c3   :  { %v3718_v7 = vpop.permute.xlu0 %339 }
 0x2d6   :  { %v344_v14 = vpop.permute.xlu1 %343 }
 0x2d7   :  { %v347_v19 = vsel %vm346_vm1, %v3718_v7, %v344_v14 }
 0x2d8   :  { %3003 = vmatmul.mubr.msk.f32.vlgmr.msra.gmra.mxu1 %vm213_vm2, %v347_v19 }
 0x2d9   :  { %634 = vmatpush1.msra.mxu1 %v3493_v4  ;;  %681 = vmatprep.mubr.f32.mxu1 %v3412_v3 }
 0x2da   :  { %635 = vmatprep.subr.mxu1 %v3501_v6 }
 0x2db   :  { %636 = vmatpush1.msra.mxu1 %v3510_v8 }
 0x2dc   :  { %637 = vmatprep.subr.mxu1 %v3519_v10 }
 0x2dd   :  { %638 = vmatpush1.msra.mxu1 %v3524_v11 }
 0x2de   :  { %639 = vmatprep.subr.mxu1 %v3530_v12 }
 0x2df   :  { %640 = vmatpush1.msra.mxu1 %v3537_v13 }
 0x2e0   :  { %641 = vmatprep.subr.mxu1 %v3547_v15 }
 0x2e1   :  { %642 = vmatpush1.msra.mxu1 %v3553_v16 }
 0x2e2   :  { %643 = vmatprep.subr.mxu1 %v3560_v17 }
 0x2e3   :  { %644 = vmatpush1.msra.mxu1 %v3568_v18 }
 0x2e4   :  { %645 = vmatprep.subr.mxu1 %v3578_v20 }
 0x2e5   :  { %646 = vmatpush1.msra.mxu1 %v3584_v21 }
 0x2e6   :  { %647 = vmatprep.subr.mxu1 %v3591_v22 }
 0x2e7   :  { %648 = vmatpush1.msra.mxu1 %v3599_v23 }
 0x2e8   :  { %899 = vmatprep.subr.mxu1 %v3482_v1 }
 0x398   :  { %v417_v24 = vpop.f32.mrf.mxu1 }
 0x399   :  { %v422_v25 = vadd.f32 %v417_v24, %v3675_v40 }
 0x39a   :  { %v419_v26 = vpop.f32.mrf.mxu1 }
 0x39b   :  { %3172 = vtanh.f32 %v422_v25  ;;  %v423_v27 = vadd.f32 %v419_v26, %v3697_v2  ;;  %v3004_v32 = vmul.f32 -1.442695, %v422_v25 }
 0x39d   :  { %3174 = vtanh.f32 %v423_v27  ;;  %v3005_v35 = vmul.f32 -1.442695, %v423_v27 }
 0x39e   :  { %3176 = vpow2.f32 %v3004_v32 }
 0x39f   :  { %3178 = vpow2.f32 %v3005_v35 }
 0x3a8   :  { %v3173_v28 = vpop.eup %3172 }
 0x3a9   :  { %440 = vrot.lane.b32.xlu0 %v3173_v28, %s3413_s3 }
 0x3aa   :  { %v3175_v29 = vpop.eup %3174 }
 0x3ab   :  { %451 = vrot.lane.b32.xlu1 %v3175_v29, %s3413_s3  ;;  %v3177_v36 = vpop.eup %3176 }
 0x3ac   :  { %v3179_v37 = vpop.eup %3178  ;;  %v430_v39 = vadd.f32 1.0, %v3177_v36 }
 0x3ad   :  { %v431_v41 = vadd.f32 1.0, %v3179_v37 }
 0x3ae   :  { %3180 = vrcp.f32 %v430_v39 }
 0x3af   :  { %3182 = vrcp.f32 %v431_v41 }
 0x3bb   :  { %v3181_v40 = vpop.eup %3180 }
 0x3bc   :  { %v3183_v43 = vpop.eup %3182  ;;  %v438_v48 = vmul.f32 %v3181_v40, %v3705_v49 }
 0x3bd   :  { %v449_v54 = vmul.f32 %v3183_v43, %v3709_v56 }
 0x41b   :  { %v441_v34 = vpop.permute.xlu0 %440 }
 0x41c   :  { %v443_v2 = vmul.f32 %v3181_v40, %v441_v34 }
 0x41d   :  { %v452_v45 = vpop.permute.xlu1 %451 }
 0x41e   :  { %445 = vrot.lane.b32.xlu0 %v443_v2, %s3414_s14  ;;  %v454_v46 = vmul.f32 %v3183_v43, %v452_v45 }
 0x420   :  { %456 = vrot.lane.b32.xlu1 %v454_v46, %s3414_s14 }
 0x490   :  { %v446_v51 = vpop.permute.xlu0 %445 }
 0x491   :  { %v3747_v52 = vadd.f32 %v446_v51, %v438_v48 }
 0x492   :  { %v457_v58 = vpop.permute.xlu1 %456 }
 0x493   :  { %3184 = vtanh.f32 %v3747_v52  ;;  %v3751_v60 = vadd.f32 %v457_v58, %v449_v54 }
 0x495   :  { %3186 = vtanh.f32 %v3751_v60 }
 0x4a0   :  { %v3185_v62 = vpop.eup %3184 }
 0x4a1   :  { %462 = vrot.lane.b32.xlu0 %v3185_v62, %s3413_s3 }
 0x4a2   :  { %v3187_v0 = vpop.eup %3186 }
 0x4a3   :  { %468 = vrot.lane.b32.xlu1 %v3187_v0, %s3413_s3 }
 0x513   :  { %v463_v14 = vpop.permute.xlu0 %462 }
 0x514   :  { %v465_v49 = vmul.f32 %v3181_v40, %v463_v14 }
 0x515   :  { %v469_v19 = vpop.permute.xlu1 %468 }
 0x516   :  { %473 = vrot.lane.b32.xlu0 %v465_v49, %s3414_s14  ;;  %v3757_v24 = vmul.f32 %v3183_v43, %v469_v19 }
 0x518   :  { %477 = vrot.lane.b32.xlu1 %v3757_v24, %s3413_s3 }
 0x588   :  { %v3761_v56 = vpop.permute.xlu0 %473 }
 0x58a   :  { %v478_v25 = vpop.permute.xlu1 %477 }
 0x58b   :  { %v480_v26 = vsel %vm346_vm1, %v3761_v56, %v478_v25 }
 0x58c   :  { %3006 = vmatmul.mubr.msk.f32.vlgmr.msra.gmra.mxu0 %vm213_vm2, %v480_v26 }
 0x58d   :  { %767 = vmatpush1.msra.mxu0 %v3493_v4  ;;  %814 = vmatprep.mubr.f32.mxu0 %v3412_v3 }
 0x58e   :  { %768 = vmatprep.subr.mxu0 %v3501_v6 }
 0x58f   :  { %769 = vmatpush1.msra.mxu0 %v3510_v8 }
 0x590   :  { %770 = vmatprep.subr.mxu0 %v3519_v10 }
 0x591   :  { %771 = vmatpush1.msra.mxu0 %v3524_v11 }
 0x592   :  { %772 = vmatprep.subr.mxu0 %v3530_v12 }
 0x593   :  { %773 = vmatpush1.msra.mxu0 %v3537_v13 }
 0x594   :  { %774 = vmatprep.subr.mxu0 %v3547_v15 }
 0x595   :  { %775 = vmatpush1.msra.mxu0 %v3553_v16 }
 0x596   :  { %776 = vmatprep.subr.mxu0 %v3560_v17 }
 0x597   :  { %777 = vmatpush1.msra.mxu0 %v3568_v18 }
 0x598   :  { %778 = vmatprep.subr.mxu0 %v3578_v20 }
 0x599   :  { %779 = vmatpush1.msra.mxu0 %v3584_v21 }
 0x59a   :  { %780 = vmatprep.subr.mxu0 %v3591_v22 }
 0x59b   :  { %781 = vmatpush1.msra.mxu0 %v3599_v23 }
 0x59c   :  { %1032 = vmatprep.subr.mxu0 %v3482_v1 }
 0x64c   :  { %v550_v27 = vpop.f32.mrf.mxu0 }
 0x64d   :  { %v555_v28 = vadd.f32 %v550_v27, %v3679_v44 }
 0x64e   :  { %v552_v29 = vpop.f32.mrf.mxu0 }
 0x64f   :  { %3188 = vtanh.f32 %v555_v28  ;;  %v556_v32 = vadd.f32 %v552_v29, %v3693_v61  ;;  %v3007_v37 = vmul.f32 -1.442695, %v555_v28 }
 0x651   :  { %3190 = vtanh.f32 %v556_v32  ;;  %v3008_v39 = vmul.f32 -1.442695, %v556_v32 }
 0x652   :  { %3192 = vpow2.f32 %v3007_v37 }
 0x653   :  { %3194 = vpow2.f32 %v3008_v39 }
 0x65c   :  { %v3189_v35 = vpop.eup %3188 }
 0x65d   :  { %573 = vrot.lane.b32.xlu0 %v3189_v35, %s3413_s3 }
 0x65e   :  { %v3191_v36 = vpop.eup %3190 }
 0x65f   :  { %584 = vrot.lane.b32.xlu1 %v3191_v36, %s3413_s3  ;;  %v3193_v41 = vpop.eup %3192 }
 0x660   :  { %v3195_v40 = vpop.eup %3194  ;;  %v563_v34 = vadd.f32 1.0, %v3193_v41 }
 0x661   :  { %v564_v2 = vadd.f32 1.0, %v3195_v40 }
 0x662   :  { %3196 = vrcp.f32 %v563_v34 }
 0x663   :  { %3198 = vrcp.f32 %v564_v2 }
 0x66f   :  { %v3197_v44 = vpop.eup %3196 }
 0x670   :  { %v3199_v45 = vpop.eup %3198  ;;  %v571_v51 = vmul.f32 %v3197_v44, %v3747_v52 }
 0x671   :  { %v582_v62 = vmul.f32 %v3199_v45, %v3751_v60 }
 0x6cf   :  { %v574_v43 = vpop.permute.xlu0 %573 }
 0x6d0   :  { %v576_v61 = vmul.f32 %v3197_v44, %v574_v43 }
 0x6d1   :  { %v585_v46 = vpop.permute.xlu1 %584 }
 0x6d2   :  { %578 = vrot.lane.b32.xlu0 %v576_v61, %s3414_s14  ;;  %v587_v48 = vmul.f32 %v3199_v45, %v585_v46 }
 0x6d4   :  { %589 = vrot.lane.b32.xlu1 %v587_v48, %s3414_s14 }
 0x744   :  { %v579_v54 = vpop.permute.xlu0 %578 }
 0x745   :  { %v3790_v58 = vadd.f32 %v579_v54, %v571_v51 }
 0x746   :  { %v590_v0 = vpop.permute.xlu1 %589 }
 0x747   :  { %3200 = vtanh.f32 %v3790_v58  ;;  %v3794_v14 = vadd.f32 %v590_v0, %v582_v62 }
 0x749   :  { %3202 = vtanh.f32 %v3794_v14 }
 0x754   :  { %v3201_v49 = vpop.eup %3200 }
 0x755   :  { %595 = vrot.lane.b32.xlu0 %v3201_v49, %s3413_s3 }
 0x756   :  { %v3203_v19 = vpop.eup %3202 }
 0x757   :  { %601 = vrot.lane.b32.xlu1 %v3203_v19, %s3413_s3 }
 0x7c7   :  { %v596_v25 = vpop.permute.xlu0 %595 }
 0x7c8   :  { %v598_v52 = vmul.f32 %v3197_v44, %v596_v25 }
 0x7c9   :  { %v602_v26 = vpop.permute.xlu1 %601 }
 0x7ca   :  { %606 = vrot.lane.b32.xlu0 %v598_v52, %s3414_s14  ;;  %v3800_v27 = vmul.f32 %v3199_v45, %v602_v26 }
 0x7cc   :  { %610 = vrot.lane.b32.xlu1 %v3800_v27, %s3413_s3 }
 0x83c   :  { %v3804_v60 = vpop.permute.xlu0 %606 }
 0x83e   :  { %v611_v28 = vpop.permute.xlu1 %610 }
 0x83f   :  { %v613_v29 = vsel %vm346_vm1, %v3804_v60, %v611_v28 }
 0x840   :  { %3009 = vmatmul.mubr.msk.f32.vlgmr.msra.gmra.mxu1 %vm213_vm2, %v613_v29 }
 0x841   :  { %900 = vmatpush1.msra.mxu1 %v3493_v4  ;;  %947 = vmatprep.mubr.f32.mxu1 %v3412_v3 }
 0x842   :  { %901 = vmatprep.subr.mxu1 %v3501_v6 }
 0x843   :  { %902 = vmatpush1.msra.mxu1 %v3510_v8 }
 0x844   :  { %903 = vmatprep.subr.mxu1 %v3519_v10 }
 0x845   :  { %904 = vmatpush1.msra.mxu1 %v3524_v11 }
 0x846   :  { %905 = vmatprep.subr.mxu1 %v3530_v12 }
 0x847   :  { %906 = vmatpush1.msra.mxu1 %v3537_v13 }
 0x848   :  { %907 = vmatprep.subr.mxu1 %v3547_v15 }
 0x849   :  { %908 = vmatpush1.msra.mxu1 %v3553_v16 }
 0x84a   :  { %909 = vmatprep.subr.mxu1 %v3560_v17 }
 0x84b   :  { %910 = vmatpush1.msra.mxu1 %v3568_v18 }
 0x84c   :  { %911 = vmatprep.subr.mxu1 %v3578_v20 }
 0x84d   :  { %912 = vmatpush1.msra.mxu1 %v3584_v21 }
 0x84e   :  { %913 = vmatprep.subr.mxu1 %v3591_v22 }
 0x84f   :  { %914 = vmatpush1.msra.mxu1 %v3599_v23 }
 0x850   :  { %1165 = vmatprep.subr.mxu1 %v3482_v1 }
 0x900   :  { %v683_v32 = vpop.f32.mrf.mxu1 }
 0x901   :  { %v688_v35 = vadd.f32 %v683_v32, %v3683_v50 }
 0x902   :  { %v685_v36 = vpop.f32.mrf.mxu1 }
 0x903   :  { %3204 = vtanh.f32 %v688_v35  ;;  %v689_v37 = vadd.f32 %v685_v36, %v3689_v57  ;;  %v3010_v40 = vmul.f32 -1.442695, %v688_v35 }
 0x905   :  { %3206 = vtanh.f32 %v689_v37  ;;  %v3011_v34 = vmul.f32 -1.442695, %v689_v37 }
 0x906   :  { %3208 = vpow2.f32 %v3010_v40 }
 0x907   :  { %3210 = vpow2.f32 %v3011_v34 }
 0x910   :  { %v3205_v39 = vpop.eup %3204 }
 0x911   :  { %706 = vrot.lane.b32.xlu0 %v3205_v39, %s3413_s3 }
 0x912   :  { %v3207_v41 = vpop.eup %3206 }
 0x913   :  { %717 = vrot.lane.b32.xlu1 %v3207_v41, %s3413_s3  ;;  %v3209_v2 = vpop.eup %3208 }
 0x914   :  { %v3211_v1 = vpop.eup %3210  ;;  %v696_v44 = vadd.f32 1.0, %v3209_v2 }
 0x915   :  { %v697_v43 = vadd.f32 1.0, %v3211_v1 }
 0x916   :  { %3212 = vrcp.f32 %v696_v44 }
 0x917   :  { %3214 = vrcp.f32 %v697_v43 }
 0x923   :  { %v3213_v50 = vpop.eup %3212 }
 0x924   :  { %v3215_v45 = vpop.eup %3214  ;;  %v704_v51 = vmul.f32 %v3213_v50, %v3790_v58 }
 0x925   :  { %v715_v0 = vmul.f32 %v3215_v45, %v3794_v14 }
 0x983   :  { %v707_v61 = vpop.permute.xlu0 %706 }
 0x984   :  { %v709_v57 = vmul.f32 %v3213_v50, %v707_v61 }
 0x985   :  { %v718_v46 = vpop.permute.xlu1 %717 }
 0x986   :  { %711 = vrot.lane.b32.xlu0 %v709_v57, %s3414_s14  ;;  %v720_v48 = vmul.f32 %v3215_v45, %v718_v46 }
 0x988   :  { %722 = vrot.lane.b32.xlu1 %v720_v48, %s3414_s14 }
 0x9f8   :  { %v712_v54 = vpop.permute.xlu0 %711 }
 0x9f9   :  { %v3833_v62 = vadd.f32 %v712_v54, %v704_v51 }
 0x9fa   :  { %v723_v49 = vpop.permute.xlu1 %722 }
 0x9fb   :  { %3216 = vtanh.f32 %v3833_v62  ;;  %v3837_v19 = vadd.f32 %v723_v49, %v715_v0 }
 0x9fd   :  { %3218 = vtanh.f32 %v3837_v19 }
 0xa08   :  { %v3217_v25 = vpop.eup %3216 }
 0xa09   :  { %728 = vrot.lane.b32.xlu0 %v3217_v25, %s3413_s3 }
 0xa0a   :  { %v3219_v52 = vpop.eup %3218 }
 0xa0b   :  { %734 = vrot.lane.b32.xlu1 %v3219_v52, %s3413_s3 }
 0xa7b   :  { %v729_v26 = vpop.permute.xlu0 %728 }
 0xa7c   :  { %v731_v58 = vmul.f32 %v3213_v50, %v729_v26 }
 0xa7d   :  { %v735_v28 = vpop.permute.xlu1 %734 }
 0xa7e   :  { %739 = vrot.lane.b32.xlu0 %v731_v58, %s3414_s14  ;;  %v3843_v29 = vmul.f32 %v3215_v45, %v735_v28 }
 0xa80   :  { %743 = vrot.lane.b32.xlu1 %v3843_v29, %s3413_s3 }
 0xaf0   :  { %v3847_v14 = vpop.permute.xlu0 %739 }
 0xaf2   :  { %v744_v32 = vpop.permute.xlu1 %743 }
 0xaf3   :  { %v746_v35 = vsel %vm346_vm1, %v3847_v14, %v744_v32 }
 0xaf4   :  { %3012 = vmatmul.mubr.msk.f32.vlgmr.msra.gmra.mxu0 %vm213_vm2, %v746_v35 }
 0xaf5   :  { %1033 = vmatpush1.msra.mxu0 %v3493_v4  ;;  %1080 = vmatprep.mubr.f32.mxu0 %v3412_v3 }
 0xaf6   :  { %1034 = vmatprep.subr.mxu0 %v3501_v6 }
 0xaf7   :  { %1035 = vmatpush1.msra.mxu0 %v3510_v8 }
 0xaf8   :  { %1036 = vmatprep.subr.mxu0 %v3519_v10 }
 0xaf9   :  { %1037 = vmatpush1.msra.mxu0 %v3524_v11 }
 0xafa   :  { %1038 = vmatprep.subr.mxu0 %v3530_v12 }
 0xafb   :  { %1039 = vmatpush1.msra.mxu0 %v3537_v13 }
 0xafc   :  { %1040 = vmatprep.subr.mxu0 %v3547_v15 }
 0xafd   :  { %1041 = vmatpush1.msra.mxu0 %v3553_v16 }
 0xafe   :  { %1042 = vmatprep.subr.mxu0 %v3560_v17 }
 0xaff   :  { %1043 = vmatpush1.msra.mxu0 %v3568_v18 }
 0xb00   :  { %1044 = vmatprep.subr.mxu0 %v3578_v20 }
 0xb01   :  { %1045 = vmatpush1.msra.mxu0 %v3584_v21 }
 0xb02   :  { %1046 = vmatprep.subr.mxu0 %v3591_v22 }
 0xb03   :  { %1047 = vmatpush1.msra.mxu0 %v3599_v23 }
 0xbb4   :  { %v816_v36 = vpop.f32.mrf.mxu0 }
 0xbb5   :  { %v821_v37 = vadd.f32 %v816_v36, %v3687_v55 }
 0xbb6   :  { %v818_v39 = vpop.f32.mrf.mxu0 }
 0xbb7   :  { %3220 = vtanh.f32 %v821_v37  ;;  %v822_v41 = vadd.f32 %v818_v39, %v3685_v53  ;;  %v3013_v2 = vmul.f32 -1.442695, %v821_v37 }
 0xbb9   :  { %3222 = vtanh.f32 %v822_v41  ;;  %v3014_v1 = vmul.f32 -1.442695, %v822_v41 }
 0xbba   :  { %3224 = vpow2.f32 %v3013_v2 }
 0xbbb   :  { %3226 = vpow2.f32 %v3014_v1 }
 0xbc4   :  { %v3221_v40 = vpop.eup %3220 }
 0xbc5   :  { %839 = vrot.lane.b32.xlu0 %v3221_v40, %s3413_s3 }
 0xbc6   :  { %v3223_v34 = vpop.eup %3222 }
 0xbc7   :  { %850 = vrot.lane.b32.xlu1 %v3223_v34, %s3413_s3  ;;  %v3225_v44 = vpop.eup %3224 }
 0xbc8   :  { %v3227_v43 = vpop.eup %3226  ;;  %v829_v50 = vadd.f32 1.0, %v3225_v44 }
 0xbc9   :  { %v830_v61 = vadd.f32 1.0, %v3227_v43 }
 0xbca   :  { %3228 = vrcp.f32 %v829_v50 }
 0xbcb   :  { %3230 = vrcp.f32 %v830_v61 }
 0xbd7   :  { %v3229_v55 = vpop.eup %3228 }
 0xbd8   :  { %v3231_v45 = vpop.eup %3230  ;;  %v837_v51 = vmul.f32 %v3229_v55, %v3833_v62 }
 0xbd9   :  { %v848_v49 = vmul.f32 %v3231_v45, %v3837_v19 }
 0xc37   :  { %v840_v57 = vpop.permute.xlu0 %839 }
 0xc38   :  { %v842_v53 = vmul.f32 %v3229_v55, %v840_v57 }
 0xc39   :  { %v851_v46 = vpop.permute.xlu1 %850 }
 0xc3a   :  { %844 = vrot.lane.b32.xlu0 %v842_v53, %s3414_s14  ;;  %v853_v48 = vmul.f32 %v3231_v45, %v851_v46 }
 0xc3c   :  { %855 = vrot.lane.b32.xlu1 %v853_v48, %s3414_s14 }
 0xcac   :  { %v845_v54 = vpop.permute.xlu0 %844 }
 0xcad   :  { %v3875_v0 = vadd.f32 %v845_v54, %v837_v51 }
 0xcae   :  { %v856_v25 = vpop.permute.xlu1 %855 }
 0xcaf   :  { %3232 = vtanh.f32 %v3875_v0  ;;  %v3879_v52 = vadd.f32 %v856_v25, %v848_v49 }
 0xcb1   :  { %3234 = vtanh.f32 %v3879_v52 }
 0xcbc   :  { %v3233_v26 = vpop.eup %3232 }
 0xcbd   :  { %861 = vrot.lane.b32.xlu0 %v3233_v26, %s3413_s3 }
 0xcbe   :  { %v3235_v58 = vpop.eup %3234 }
 0xcbf   :  { %867 = vrot.lane.b32.xlu1 %v3235_v58, %s3413_s3 }
 0xd2f   :  { %v862_v28 = vpop.permute.xlu0 %861 }
 0xd30   :  { %v864_v62 = vmul.f32 %v3229_v55, %v862_v28 }
 0xd31   :  { %v868_v32 = vpop.permute.xlu1 %867 }
 0xd32   :  { %872 = vrot.lane.b32.xlu0 %v864_v62, %s3414_s14  ;;  %v3885_v35 = vmul.f32 %v3231_v45, %v868_v32 }
 0xd34   :  { %876 = vrot.lane.b32.xlu1 %v3885_v35, %s3413_s3 }
 0xda4   :  { %v3889_v19 = vpop.permute.xlu0 %872 }
 0xda6   :  { %v877_v36 = vpop.permute.xlu1 %876 }
 0xda7   :  { %v879_v37 = vsel %vm346_vm1, %v3889_v19, %v877_v36 }
 0xda8   :  { %3015 = vmatmul.mubr.msk.f32.vlgmr.msra.gmra.mxu1 %vm213_vm2, %v879_v37 }
 0xda9   :  { %1166 = vmatpush1.msra.mxu1 %v3493_v4  ;;  %1213 = vmatprep.mubr.f32.mxu1 %v3412_v3 }
 0xdaa   :  { %1167 = vmatprep.subr.mxu1 %v3501_v6 }
 0xdab   :  { %1168 = vmatpush1.msra.mxu1 %v3510_v8 }
 0xdac   :  { %1169 = vmatprep.subr.mxu1 %v3519_v10 }
 0xdad   :  { %1170 = vmatpush1.msra.mxu1 %v3524_v11 }
 0xdae   :  { %1171 = vmatprep.subr.mxu1 %v3530_v12 }
 0xdaf   :  { %1172 = vmatpush1.msra.mxu1 %v3537_v13 }
 0xdb0   :  { %1173 = vmatprep.subr.mxu1 %v3547_v15 }
 0xdb1   :  { %1174 = vmatpush1.msra.mxu1 %v3553_v16 }
 0xdb2   :  { %1175 = vmatprep.subr.mxu1 %v3560_v17 }
 0xdb3   :  { %1176 = vmatpush1.msra.mxu1 %v3568_v18 }
 0xdb4   :  { %1177 = vmatprep.subr.mxu1 %v3578_v20 }
 0xdb5   :  { %1178 = vmatpush1.msra.mxu1 %v3584_v21 }
 0xdb6   :  { %1179 = vmatprep.subr.mxu1 %v3591_v22 }
 0xdb7   :  { %1180 = vmatpush1.msra.mxu1 %v3599_v23 }
 0xe68   :  { %v949_v4 = vpop.f32.mrf.mxu1 }
 0xe69   :  { %v954_v6 = vadd.f32 %v949_v4, %v3691_v59 }
 0xe6a   :  { %v951_v8 = vpop.f32.mrf.mxu1 }
 0xe6b   :  { %3236 = vtanh.f32 %v954_v6  ;;  %v955_v10 = vadd.f32 %v951_v8, %v3681_v47  ;;  %v3016_v13 = vmul.f32 -1.442695, %v954_v6 }
 0xe6d   :  { %3238 = vtanh.f32 %v955_v10  ;;  %v3017_v15 = vmul.f32 -1.442695, %v955_v10 }
 0xe6e   :  { %3240 = vpow2.f32 %v3016_v13 }
 0xe6f   :  { %3242 = vpow2.f32 %v3017_v15 }
 0xe78   :  { %v3237_v11 = vpop.eup %3236 }
 0xe79   :  { %972 = vrot.lane.b32.xlu0 %v3237_v11, %s3413_s3 }
 0xe7a   :  { %v3239_v12 = vpop.eup %3238 }
 0xe7b   :  { %983 = vrot.lane.b32.xlu1 %v3239_v12, %s3413_s3  ;;  %v3241_v16 = vpop.eup %3240 }
 0xe7c   :  { %v3243_v17 = vpop.eup %3242  ;;  %v962_v18 = vadd.f32 1.0, %v3241_v16 }
 0xe7d   :  { %v963_v20 = vadd.f32 1.0, %v3243_v17 }
 0xe7e   :  { %3244 = vrcp.f32 %v962_v18 }
 0xe7f   :  { %3246 = vrcp.f32 %v963_v20  ;;  %v1277_v20 = vld [vmem:[%s4650_s4 + $0x38] sm:$0xff] }
 0xe80   :  { %1492 = vmatprep.subr.mxu1 %v1277_v20 }
 0xe8b   :  { %v3245_v21 = vpop.eup %3244 }
 0xe8c   :  { %v3247_v47 = vpop.eup %3246  ;;  %v970_v41 = vmul.f32 %v3245_v21, %v3875_v0 }
 0xe8d   :  { %v981_v2 = vmul.f32 %v3247_v47, %v3879_v52 }
 0xeeb   :  { %v973_v22 = vpop.permute.xlu0 %972 }
 0xeec   :  { %v975_v23 = vmul.f32 %v3245_v21, %v973_v22 }
 0xeed   :  { %v984_v59 = vpop.permute.xlu1 %983 }
 0xeee   :  { %977 = vrot.lane.b32.xlu0 %v975_v23, %s3414_s14  ;;  %v986_v39 = vmul.f32 %v3247_v47, %v984_v59 }
 0xef0   :  { %988 = vrot.lane.b32.xlu1 %v986_v39, %s3414_s14 }
 0xf60   :  { %v978_v40 = vpop.permute.xlu0 %977 }
 0xf61   :  { %v980_v34 = vadd.f32 %v978_v40, %v970_v41  ;;  %v1276_v41 = vld [vmem:[%s4650_s4 + $0x30] sm:$0xff] }
 0xf62   :  { %v989_v1 = vpop.permute.xlu1 %988 }
 0xf63   :  { %3248 = vtanh.f32 %v980_v34  ;;  %v991_v44 = vadd.f32 %v989_v1, %v981_v2  ;;  %v1274_v2 = vld [vmem:[%s4650_s4 + $0x20] sm:$0xff]  ;;  %v1273_v1 = vld [vmem:[%s4650_s4 + $0x18] sm:$0xff] }
 0xf65   :  { %3250 = vtanh.f32 %v991_v44 }
 0xf70   :  { %v3249_v43 = vpop.eup %3248 }
 0xf71   :  { %994 = vrot.lane.b32.xlu0 %v3249_v43, %s3413_s3  ;;  %v1271_v43 = vld [vmem:[%s4650_s4 + $0x8] sm:$0xff] }
 0xf72   :  { %v3251_v50 = vpop.eup %3250 }
 0xf73   :  { %1000 = vrot.lane.b32.xlu1 %v3251_v50, %s3413_s3  ;;  %v1270_v50 = vld [vmem:[%s4650_s4] sm:$0xff] }
 0xfe3   :  { %v995_v61 = vpop.permute.xlu0 %994 }
 0xfe4   :  { %v997_v55 = vmul.f32 %v3245_v21, %v995_v61 }
 0xfe5   :  { %v1001_v57 = vpop.permute.xlu1 %1000 }
 0xfe6   :  { %1005 = vrot.lane.b32.xlu0 %v997_v55, %s3414_s14  ;;  %v3921_v53 = vmul.f32 %v3247_v47, %v1001_v57 }
 0xfe8   :  { %1009 = vrot.lane.b32.xlu1 %v3921_v53, %s3413_s3 }
0x1058   :  { %v3925_v45 = vpop.permute.xlu0 %1005 }
0x105a   :  { %v1010_v46 = vpop.permute.xlu1 %1009 }
0x105b   :  { %v1012_v48 = vsel %vm346_vm1, %v3925_v45, %v1010_v46 }
0x105c   :  { %3018 = vmatmul.mubr.msk.f32.vlgmr.msra.gmra.mxu0 %vm213_vm2, %v1012_v48 }
0x105d   :  { %1400 = vmatprep.mubr.f32.mxu0 %v3412_v3 }
0x111c   :  { %v1082_v51 = vpop.f32.mrf.mxu0 }
0x111d   :  { %v1087_v54 = vadd.f32 %v1082_v51, %v3695_v63 }
0x111e   :  { %v1084_v0 = vpop.f32.mrf.mxu0 }
0x111f   :  { %3252 = vtanh.f32 %v1087_v54  ;;  %v1088_v49 = vadd.f32 %v1084_v0, %v3677_v42  ;;  %v3019_v26 = vmul.f32 -1.442695, %v1087_v54 }
0x1121   :  { %3254 = vtanh.f32 %v1088_v49  ;;  %v3020_v58 = vmul.f32 -1.442695, %v1088_v49 }
0x1122   :  { %3256 = vpow2.f32 %v3019_v26 }
0x1123   :  { %3258 = vpow2.f32 %v3020_v58 }
0x112c   :  { %v3253_v25 = vpop.eup %3252 }
0x112d   :  { %1105 = vrot.lane.b32.xlu0 %v3253_v25, %s3413_s3 }
0x112e   :  { %v3255_v52 = vpop.eup %3254 }
0x112f   :  { %1116 = vrot.lane.b32.xlu1 %v3255_v52, %s3413_s3  ;;  %v3257_v28 = vpop.eup %3256 }
0x1130   :  { %v3259_v62 = vpop.eup %3258  ;;  %v1095_v32 = vadd.f32 1.0, %v3257_v28 }
0x1131   :  { %v1096_v36 = vadd.f32 1.0, %v3259_v62 }
0x1132   :  { %3260 = vrcp.f32 %v1095_v32 }
0x1133   :  { %3262 = vrcp.f32 %v1096_v36 }
0x113f   :  { %v3261_v63 = vpop.eup %3260 }
0x1140   :  { %v3263_v4 = vpop.eup %3262  ;;  %v1103_v10 = vmul.f32 %v3261_v63, %v980_v34  ;;  %v1275_v34 = vld [vmem:[%s4650_s4 + $0x28] sm:$0xff] }
0x1141   :  { %v1114_v13 = vmul.f32 %v3263_v4, %v991_v44  ;;  %v1272_v44 = vld [vmem:[%s4650_s4 + $0x10] sm:$0xff] }
0x119f   :  { %v1106_v37 = vpop.permute.xlu0 %1105 }
0x11a0   :  { %v1108_v42 = vmul.f32 %v3261_v63, %v1106_v37  ;;  %v1285_v37 = vld [vmem:[%s4650_s4 + $0x78] sm:$0xff] }
0x11a1   :  { %v1117_v6 = vpop.permute.xlu1 %1116  ;;  %1360 = vmatprep.subr.mxu0 %v1285_v37 }
0x11a2   :  { %1110 = vrot.lane.b32.xlu0 %v1108_v42, %s3414_s14  ;;  %v1119_v8 = vmul.f32 %v3263_v4, %v1117_v6  ;;  %v1284_v42 = vld [vmem:[%s4650_s4 + $0x70] sm:$0xff]  ;;  %v1282_v6 = vld [vmem:[%s4650_s4 + $0x60] sm:$0xff] }
0x11a3   :  { %1361 = vmatpush1.msra.mxu0 %v1284_v42 }
0x11a4   :  { %1121 = vrot.lane.b32.xlu1 %v1119_v8, %s3414_s14  ;;  %v4039_v8 = vld [vmem:[%s4651_s5 + $0x78] sm:$0xff] }
0x1214   :  { %v1111_v11 = vpop.permute.xlu0 %1110 }
0x1215   :  { %v3937_v12 = vadd.f32 %v1111_v11, %v1103_v10  ;;  %v1280_v10 = vld [vmem:[%s4650_s4 + $0x50] sm:$0xff]  ;;  %v1279_v11 = vld [vmem:[%s4650_s4 + $0x48] sm:$0xff] }
0x1216   :  { %v1122_v15 = vpop.permute.xlu1 %1121 }
0x1217   :  { %3264 = vtanh.f32 %v3937_v12  ;;  %v3940_v16 = vadd.f32 %v1122_v15, %v1114_v13  ;;  %v4064_v13 = vld [vmem:[%s4651_s5 + $0x68] sm:$0xff]  ;;  %v4076_v15 = vld [vmem:[%s4651_s5 + $0x58] sm:$0xff] }
0x1219   :  { %3266 = vtanh.f32 %v3940_v16 }
0x1224   :  { %v3265_v17 = vpop.eup %3264 }
0x1225   :  { %1127 = vrot.lane.b32.xlu0 %v3265_v17, %s3413_s3  ;;  %v4088_v17 = vld [vmem:[%s4651_s5 + $0x48] sm:$0xff] }
0x1226   :  { %v3267_v18 = vpop.eup %3266 }
0x1227   :  { %1133 = vrot.lane.b32.xlu1 %v3267_v18, %s3413_s3 }
0x1297   :  { %v1128_v21 = vpop.permute.xlu0 %1127 }
0x1298   :  { %v1130_v22 = vmul.f32 %v3261_v63, %v1128_v21  ;;  %v4095_v21 = vld [vmem:[%s4651_s5 + $0x40] sm:$0xff] }
0x1299   :  { %v1134_v23 = vpop.permute.xlu1 %1133 }
0x129a   :  { %1138 = vrot.lane.b32.xlu0 %v1130_v22, %s3414_s14  ;;  %v3949_v47 = vmul.f32 %v3263_v4, %v1134_v23  ;;  %v1283_v4 = vld [vmem:[%s4650_s4 + $0x68] sm:$0xff]  ;;  %v4101_v22 = vld [vmem:[%s4651_s5 + $0x38] sm:$0xff]  ;;  %v4108_v23 = vld [vmem:[%s4651_s5 + $0x30] sm:$0xff] }
0x129b   :  { %1362 = vmatprep.subr.mxu0 %v1283_v4 }
0x129c   :  { %1142 = vrot.lane.b32.xlu1 %v3949_v47, %s3413_s3  ;;  %1363 = vmatpush1.msra.mxu0 %v1282_v6 }
0x130c   :  { %v1139_v59 = vpop.permute.xlu0 %1138 }
0x130e   :  { %v1143_v39 = vpop.permute.xlu1 %1142 }
0x130f   :  { %v1145_v40 = vsel %vm346_vm1, %v1139_v59, %v1143_v39 }
0x1310   :  { %3021 = vmatmul.mubr.msk.f32.vlgmr.msra.gmra.mxu1 %vm213_vm2, %v1145_v40 }
0x1311   :  { %1493 = vmatpush1.msra.mxu1 %v1276_v41  ;;  %1532 = vmatprep.mubr.f32.mxu1 %v3412_v3  ;;  %v4136_v41 = vld [vmem:[%s4651_s5 + $0x10] sm:$0xff] }
0x1312   :  { %1494 = vmatprep.subr.mxu1 %v1275_v34  ;;  %v4151_v34 = vld [vmem:[%s4651_s5] sm:$0xff] }
0x1313   :  { %1495 = vmatpush1.msra.mxu1 %v1274_v2 }
0x1314   :  { %1496 = vmatprep.subr.mxu1 %v1273_v1 }
0x1315   :  { %1497 = vmatpush1.msra.mxu1 %v1272_v44 }
0x1316   :  { %1498 = vmatprep.subr.mxu1 %v1271_v43 }
0x1317   :  { %1499 = vmatpush1.msra.mxu1 %v1270_v50 }
0x1318   :  { %3032 = vmatmul.mubr.msk.f32.vlgmr.msra.gmra.mxu1 %vm346_vm1, %v3718_v7  ;;  %1757 = vmatprep.subr.mxu1 %v4039_v8 }
0x1319   :  { %1538 = vmatprep.mubr.f32.mxu1 %v3412_v3 }
0x131c   :  { %3033 = vmatmul.mubr.msk.f32.gmra.mxu1 %vm346_vm1, %v3761_v56 }
0x131d   :  { %1544 = vmatprep.mubr.f32.mxu1 %v3412_v3 }
0x1320   :  { %3034 = vmatmul.mubr.msk.f32.gmra.mxu1 %vm346_vm1, %v3804_v60 }
0x1321   :  { %1550 = vmatprep.mubr.f32.mxu1 %v3412_v3 }
0x1324   :  { %3035 = vmatmul.mubr.msk.f32.gmra.mxu1 %vm346_vm1, %v3847_v14 }
0x1325   :  { %1556 = vmatprep.mubr.f32.mxu1 %v3412_v3 }
0x1328   :  { %3036 = vmatmul.mubr.msk.f32.gmra.mxu1 %vm346_vm1, %v3889_v19 }
0x1329   :  { %1562 = vmatprep.mubr.f32.mxu1 %v3412_v3 }
0x132c   :  { %3037 = vmatmul.mubr.msk.f32.gmra.mxu1 %vm346_vm1, %v3925_v45 }
0x132d   :  { %1568 = vmatprep.mubr.f32.mxu1 %v3412_v3 }
0x1330   :  { %3038 = vmatmul.mubr.msk.f32.gmra.mxu1 %vm346_vm1, %v1139_v59  ;;  %v4122_v59 = vld [vmem:[%s4651_s5 + $0x20] sm:$0xff] }
0x1331   :  { %1574 = vmatprep.mubr.f32.mxu1 %v3412_v3 }
0x13d0   :  { %v1215_v7 = vpop.f32.mrf.mxu1 }
0x13d1   :  { %v1220_v56 = vadd.f32 %v1215_v7, %v3699_v9 }
0x13d2   :  { %v1217_v60 = vpop.f32.mrf.mxu1 }
0x13d3   :  { %3268 = vtanh.f32 %v1220_v56  ;;  %v1221_v14 = vadd.f32 %v1217_v60, %v3673_v38  ;;  %v3022_v55 = vmul.f32 -1.442695, %v1220_v56 }
0x13d5   :  { %3270 = vtanh.f32 %v1221_v14  ;;  %v3023_v57 = vmul.f32 -1.442695, %v1221_v14 }
0x13d6   :  { %3272 = vpow2.f32 %v3022_v55 }
0x13d7   :  { %3274 = vpow2.f32 %v3023_v57 }
0x13d8   :  { %v1534_v14 = vpop.f32.mrf.mxu1 }
0x13e0   :  { %v3269_v19 = vpop.eup %3268 }
0x13e1   :  { %1238 = vrot.lane.b32.xlu1 %v3269_v19, %s3413_s3  ;;  %v1536_v19 = vpop.f32.mrf.mxu1 }
0x13e2   :  { %v3271_v61 = vpop.eup %3270 }
0x13e3   :  { %1249 = vrot.lane.b32.xlu0 %v3271_v61, %s3413_s3  ;;  %v3273_v45 = vpop.eup %3272  ;;  %v1540_v61 = vpop.f32.mrf.mxu1 }
0x13e4   :  { %v3275_v46 = vpop.eup %3274  ;;  %v1228_v48 = vadd.f32 1.0, %v3273_v45 }
0x13e5   :  { %v1229_v51 = vadd.f32 1.0, %v3275_v46  ;;  %v1542_v55 = vpop.f32.mrf.mxu1 }
0x13e6   :  { %3276 = vrcp.f32 %v1228_v48 }
0x13e7   :  { %3278 = vrcp.f32 %v1229_v51  ;;  %v1546_v57 = vpop.f32.mrf.mxu1 }
0x13e9   :  { %v1548_v45 = vpop.f32.mrf.mxu1 }
0x13eb   :  { %v1552_v46 = vpop.f32.mrf.mxu1 }
0x13ed   :  { %v1554_v48 = vpop.f32.mrf.mxu1 }
0x13f3   :  { %v4001_v9 = vpop.eup %3276 }
0x13f4   :  { %v3279_v0 = vpop.eup %3278  ;;  %v1236_v52 = vmul.f32 %v4001_v9, %v3937_v12  ;;  %v1278_v12 = vld [vmem:[%s4650_s4 + $0x40] sm:$0xff] }
0x13f5   :  { %v1247_v28 = vmul.f32 %v3279_v0, %v3940_v16  ;;  %v4083_v16 = vld [vmem:[%s4651_s5 + $0x50] sm:$0xff] }
0x1453   :  { %v1239_v38 = vpop.permute.xlu1 %1238 }
0x1454   :  { %v1241_v54 = vmul.f32 %v4001_v9, %v1239_v38 }
0x1455   :  { %v1250_v49 = vpop.permute.xlu0 %1249 }
0x1456   :  { %1243 = vrot.lane.b32.xlu1 %v1241_v54, %s3414_s14  ;;  %v1252_v25 = vmul.f32 %v3279_v0, %v1250_v49  ;;  %v1558_v49 = vpop.f32.mrf.mxu1 }
0x1458   :  { %1254 = vrot.lane.b32.xlu0 %v1252_v25, %s3414_s14  ;;  %v1560_v37 = vpop.f32.mrf.mxu1 }
0x14c8   :  { %v1244_v26 = vpop.permute.xlu1 %1243 }
0x14c9   :  { %v4008_v58 = vadd.f32 %v1244_v26, %v1236_v52 }
0x14ca   :  { %v1255_v62 = vpop.permute.xlu0 %1254 }
0x14cb   :  { %3280 = vtanh.f32 %v4008_v58  ;;  %v4012_v32 = vadd.f32 %v1255_v62, %v1247_v28 }
0x14cd   :  { %3282 = vtanh.f32 %v4012_v32 }
0x14d8   :  { %v3281_v36 = vpop.eup %3280 }
0x14d9   :  { %1260 = vrot.lane.b32.xlu1 %v3281_v36, %s3413_s3 }
0x14da   :  { %v3283_v63 = vpop.eup %3282 }
0x14db   :  { %1266 = vrot.lane.b32.xlu0 %v3283_v63, %s3413_s3 }
0x14dd   :  { %1306 = vrot.lane.b32.xlu1 %v3949_v47, %s3414_s14  ;;  %v4115_v47 = vld [vmem:[%s4651_s5 + $0x28] sm:$0xff] }
0x14e1   :  { %1310 = vrot.lane.b32.xlu1 %v3885_v35, %s3414_s14  ;;  %v1281_v35 = vld [vmem:[%s4650_s4 + $0x58] sm:$0xff] }
0x14e2   :  { %1364 = vmatprep.subr.mxu0 %v1281_v35 }
0x14e3   :  { %1365 = vmatpush1.msra.mxu0 %v1280_v10 }
0x14e4   :  { %1366 = vmatprep.subr.mxu0 %v1279_v11  ;;  %v1564_v11 = vpop.f32.mrf.mxu1 }
0x14e5   :  { %1314 = vrot.lane.b32.xlu1 %v3800_v27, %s3414_s14  ;;  %1367 = vmatpush1.msra.mxu0 %v1278_v12  ;;  %v4059_v27 = vld [vmem:[%s4651_s5 + $0x70] sm:$0xff] }
0x14e6   :  { %1624 = vmatprep.subr.mxu0 %v4039_v8  ;;  %1758 = vmatpush1.msra.mxu1 %v4059_v27 }
0x14e7   :  { %1759 = vmatprep.subr.mxu1 %v4064_v13 }
0x14e9   :  { %1318 = vrot.lane.b32.xlu1 %v3714_v5, %s3414_s14  ;;  %v4071_v5 = vld [vmem:[%s4651_s5 + $0x60] sm:$0xff] }
0x14ea   :  { %1760 = vmatpush1.msra.mxu1 %v4071_v5 }
0x14eb   :  { %1761 = vmatprep.subr.mxu1 %v4076_v15 }
0x14ec   :  { %1762 = vmatpush1.msra.mxu1 %v4083_v16 }
0x14ed   :  { %1763 = vmatprep.subr.mxu1 %v4088_v17 }
0x14ee   :  { %1764 = vmatpush1.msra.mxu1 %v4095_v21 }
0x14ef   :  { %1765 = vmatprep.subr.mxu1 %v4101_v22 }
0x14f0   :  { %1766 = vmatpush1.msra.mxu1 %v4108_v23 }
0x14f1   :  { %1767 = vmatprep.subr.mxu1 %v4115_v47 }
0x14f2   :  { %1768 = vmatpush1.msra.mxu1 %v4122_v59 }
0x154b   :  { %v1261_v39 = vpop.permute.xlu1 %1260 }
0x154c   :  { %v1263_v40 = vmul.f32 %v4001_v9, %v1261_v39  ;;  %v1302_v9 = vld [vmem:[%s4653_s6] sm:$0x3] }
0x154d   :  { %v1267_v18 = vpop.permute.xlu0 %1266  ;;  %v1589_v38 = vrot.slane %v1302_v9, %v71_v31  ;;  %v1585_v26 = vrot.slane %v1302_v9, %v67_v33 }
0x154e   :  { %v1269_v20 = vmul.f32 %v3279_v0, %v1267_v18 }
0x154f   :  { %v1307_v2 = vpop.permute.xlu1 %1306 }
0x1550   :  { %1304 = vrot.lane.b32.xlu0 %v1269_v20, %s3414_s14 }
0x1553   :  { %v1311_v43 = vpop.permute.xlu1 %1310 }
0x1554   :  { %1308 = vrot.lane.b32.xlu0 %v3921_v53, %s3414_s14  ;;  %v4129_v53 = vld [vmem:[%s4651_s5 + $0x18] sm:$0xff] }
0x1555   :  { %1769 = vmatprep.subr.mxu1 %v4129_v53 }
0x1556   :  { %1770 = vmatpush1.msra.mxu1 %v4136_v41 }
0x1557   :  { %v1315_v56 = vpop.permute.xlu1 %1314 }
0x1558   :  { %1312 = vrot.lane.b32.xlu0 %v3843_v29, %s3414_s14  ;;  %v4143_v29 = vld [vmem:[%s4651_s5 + $0x8] sm:$0xff] }
0x1559   :  { %1771 = vmatprep.subr.mxu1 %v4143_v29 }
0x155a   :  { %1772 = vmatpush1.msra.mxu1 %v4151_v34 }
0x155b   :  { %2023 = vmatprep.subr.mxu1 %v4039_v8  ;;  %v1319_v60 = vpop.permute.xlu1 %1318 }
0x155c   :  { %1316 = vrot.lane.b32.xlu0 %v3757_v24, %s3414_s14 }
0x1560   :  { %1450 = vrot.lane.b32.xlu0 %v1263_v40, %s3414_s14  ;;  %v1566_v40 = vpop.f32.mrf.mxu1 }
0x15c2   :  { %v1305_v24 = vpop.permute.xlu0 %1304 }
0x15c3   :  { %2958 = vst.msk [vmem:[%s4652_s10 + $0x8] sm:$0xff] %vm346_vm1, %v1305_v24  ;;  %3024 = vmatmul.mubr.msk.f32.vlgmr.msra.gmra.mxu0 %vm346_vm1, %v1305_v24 }
0x15c4   :  { %1625 = vmatpush1.msra.mxu0 %v4059_v27  ;;  %1406 = vmatprep.mubr.f32.mxu0 %v3412_v3 }
0x15c5   :  { %1626 = vmatprep.subr.mxu0 %v4064_v13 }
0x15c6   :  { %v1309_v1 = vpop.permute.xlu0 %1308  ;;  %1627 = vmatpush1.msra.mxu0 %v4071_v5 }
0x15c7   :  { %3025 = vmatmul.mubr.msk.f32.gmra.mxu0 %vm346_vm1, %v1307_v2  ;;  %1628 = vmatprep.subr.mxu0 %v4076_v15 }
0x15c8   :  { %1412 = vmatprep.mubr.f32.mxu0 %v3412_v3  ;;  %1629 = vmatpush1.msra.mxu0 %v4083_v16 }
0x15c9   :  { %1630 = vmatprep.subr.mxu0 %v4088_v17 }
0x15ca   :  { %v1313_v44 = vpop.permute.xlu0 %1312  ;;  %1631 = vmatpush1.msra.mxu0 %v4095_v21 }
0x15cb   :  { %3026 = vmatmul.mubr.msk.f32.gmra.mxu0 %vm346_vm1, %v1309_v1  ;;  %1632 = vmatprep.subr.mxu0 %v4101_v22 }
0x15cc   :  { %1418 = vmatprep.mubr.f32.mxu0 %v3412_v3  ;;  %1633 = vmatpush1.msra.mxu0 %v4108_v23 }
0x15cd   :  { %1634 = vmatprep.subr.mxu0 %v4115_v47 }
0x15ce   :  { %v1317_v50 = vpop.permute.xlu0 %1316  ;;  %1635 = vmatpush1.msra.mxu0 %v4122_v59 }
0x15cf   :  { %3027 = vmatmul.mubr.msk.f32.gmra.mxu0 %vm346_vm1, %v1311_v43  ;;  %1636 = vmatprep.subr.mxu0 %v4129_v53 }
0x15d0   :  { %1424 = vmatprep.mubr.f32.mxu0 %v3412_v3  ;;  %1637 = vmatpush1.msra.mxu0 %v4136_v41 }
0x15d1   :  { %1638 = vmatprep.subr.mxu0 %v4143_v29 }
0x15d2   :  { %v1451_v7 = vpop.permute.xlu0 %1450  ;;  %1639 = vmatpush1.msra.mxu0 %v4151_v34 }
0x15d3   :  { %2957 = vst.msk [vmem:[%s4652_s10] sm:$0xff] %vm346_vm1, %v1451_v7  ;;  %3028 = vmatmul.mubr.msk.f32.gmra.mxu0 %vm346_vm1, %v1313_v44  ;;  %3039 = vmatmul.mubr.msk.f32.gmra.mxu1 %vm346_vm1, %v1451_v7  ;;  %v1570_v7 = vpop.f32.mrf.mxu1 }
0x15d4   :  { %1430 = vmatprep.mubr.f32.mxu0 %v3412_v3  ;;  %1805 = vmatprep.mubr.f32.mxu1 %v3412_v3 }
0x15d5   :  { %1890 = vmatprep.subr.mxu0 %v4039_v8 }
0x15d7   :  { %3029 = vmatmul.mubr.msk.f32.gmra.mxu0 %vm346_vm1, %v1315_v56 }
0x15d8   :  { %1436 = vmatprep.mubr.f32.mxu0 %v3412_v3 }
0x15db   :  { %3030 = vmatmul.mubr.msk.f32.gmra.mxu0 %vm346_vm1, %v1317_v50 }
0x15dc   :  { %1442 = vmatprep.mubr.f32.mxu0 %v3412_v3 }
0x15df   :  { %3031 = vmatmul.mubr.msk.f32.gmra.mxu0 %vm346_vm1, %v1319_v60 }
0x15e0   :  { %1672 = vmatprep.mubr.f32.mxu0 %v3412_v3 }
0x15e3   :  { %1673 = vmatmul.mubr.f32.vlgmr.msra.gmra.mxu0 %v3412_v3 }
0x15e4   :  { %1891 = vmatpush1.msra.mxu0 %v4059_v27  ;;  %1938 = vmatprep.mubr.f32.mxu0 %v3412_v3 }
0x15e5   :  { %1892 = vmatprep.subr.mxu0 %v4064_v13 }
0x15e6   :  { %1893 = vmatpush1.msra.mxu0 %v4071_v5 }
0x15e7   :  { %1894 = vmatprep.subr.mxu0 %v4076_v15 }
0x15e8   :  { %1895 = vmatpush1.msra.mxu0 %v4083_v16 }
0x15e9   :  { %1896 = vmatprep.subr.mxu0 %v4088_v17 }
0x15ea   :  { %1897 = vmatpush1.msra.mxu0 %v4095_v21 }
0x15eb   :  { %1898 = vmatprep.subr.mxu0 %v4101_v22 }
0x15ec   :  { %1899 = vmatpush1.msra.mxu0 %v4108_v23 }
0x15ed   :  { %1900 = vmatprep.subr.mxu0 %v4115_v47 }
0x15ee   :  { %1901 = vmatpush1.msra.mxu0 %v4122_v59 }
0x15ef   :  { %1902 = vmatprep.subr.mxu0 %v4129_v53 }
0x15f0   :  { %1903 = vmatpush1.msra.mxu0 %v4136_v41 }
0x15f1   :  { %1904 = vmatprep.subr.mxu0 %v4143_v29 }
0x15f2   :  { %1905 = vmatpush1.msra.mxu0 %v4151_v34 }
0x15f3   :  { %2156 = vmatprep.subr.mxu0 %v4039_v8 }
0x1683   :  { %v1402_v51 = vpop.f32.mrf.mxu0 }
0x1685   :  { %v1404_v54 = vpop.f32.mrf.mxu0 }
0x1686   :  { %v1537_v0 = vadd.f32 %v1536_v19, %v1404_v54 }
0x1687   :  { %v1408_v25 = vpop.f32.mrf.mxu0 }
0x1688   :  { %v1541_v52 = vadd.f32 %v1540_v61, %v1408_v25  ;;  %v4223_v28 = vadd.f32 %v1589_v38, %v1537_v0 }
0x1689   :  { %v1410_v62 = vpop.f32.mrf.mxu0 }
0x168a   :  { %v1543_v36 = vadd.f32 %v1542_v55, %v1410_v62  ;;  %v4225_v63 = vadd.f32 %v1585_v26, %v1541_v52 }
0x168b   :  { %v1414_v42 = vpop.f32.mrf.mxu0 }
0x168c   :  { %v1547_v4 = vadd.f32 %v1546_v57, %v1414_v42  ;;  %v4227_v6 = vadd.f32 %v1589_v38, %v1543_v36 }
0x168d   :  { %v1416_v31 = vpop.f32.mrf.mxu0 }
0x168e   :  { %v1549_v35 = vadd.f32 %v1548_v45, %v1416_v31  ;;  %v4229_v10 = vadd.f32 %v1585_v26, %v1547_v4  ;;  %v1572_v45 = vpop.f32.mrf.mxu1 }
0x168f   :  { %v1420_v12 = vpop.f32.mrf.mxu0 }
0x1690   :  { %v1553_v18 = vadd.f32 %v1552_v46, %v1420_v12  ;;  %v4231_v30 = vadd.f32 %v1589_v38, %v1549_v35 }
0x1691   :  { %v1422_v33 = vpop.f32.mrf.mxu0 }
0x1692   :  { %v1555_v20 = vadd.f32 %v1554_v48, %v1422_v33  ;;  %v4233_v39 = vadd.f32 %v1585_v26, %v1553_v18 }
0x1693   :  { %v1426_v24 = vpop.f32.mrf.mxu0  ;;  %v1576_v54 = vpop.f32.mrf.mxu1 }
0x1694   :  { %v1559_v2 = vadd.f32 %v1558_v49, %v1426_v24  ;;  %v4235_v1 = vadd.f32 %v1589_v38, %v1555_v20  ;;  %v1535_v49 = vadd.f32 %v1534_v14, %v1402_v51 }
0x1695   :  { %v1428_v44 = vpop.f32.mrf.mxu0  ;;  %v1578_v42 = vpop.f32.mrf.mxu1 }
0x1696   :  { %v1561_v43 = vadd.f32 %v1560_v37, %v1428_v44  ;;  %v4237_v50 = vadd.f32 %v1585_v26, %v1559_v2  ;;  %v1592_v35 = vadd.f32 %v1585_v26, %v1535_v49 }
0x1697   :  { %v1432_v56 = vpop.f32.mrf.mxu0 }
0x1698   :  { %v1565_v60 = vadd.f32 %v1564_v11, %v1432_v56  ;;  %v4239_v19 = vadd.f32 %v1589_v38, %v1561_v43 }
0x1699   :  { %v1434_v61 = vpop.f32.mrf.mxu0 }
0x169a   :  { %v1567_v55 = vadd.f32 %v1566_v40, %v1434_v61  ;;  %v4241_v57 = vadd.f32 %v1585_v26, %v1565_v60 }
0x169b   :  { %v1438_v46 = vpop.f32.mrf.mxu0 }
0x169c   :  { %v1571_v48 = vadd.f32 %v1570_v7, %v1438_v46  ;;  %v4243_v9 = vadd.f32 %v1589_v38, %v1567_v55 }
0x169d   :  { %v1440_v0 = vpop.f32.mrf.mxu0 }
0x169e   :  { %v1573_v25 = vadd.f32 %v1572_v45, %v1440_v0  ;;  %v4245_v52 = vadd.f32 %v1585_v26, %v1571_v48 }
0x169f   :  { %v1444_v62 = vpop.f32.mrf.mxu0 }
0x16a0   :  { %v1577_v36 = vadd.f32 %v1576_v54, %v1444_v62  ;;  %v4247_v37 = vadd.f32 %v1589_v38, %v1573_v25 }
0x16a1   :  { %v1446_v4 = vpop.f32.mrf.mxu0 }
0x16a2   :  { %v1579_v31 = vadd.f32 %v1578_v42, %v1446_v4  ;;  %v4249_v11 = vadd.f32 %v1585_v26, %v1577_v36 }
0x16a3   :  { %v1674_v12 = vpop.f32.mrf.mxu0 }
0x16a4   :  { %v1679_v18 = vadd.f32 %v1674_v12, %v1592_v35  ;;  %v1607_v33 = vadd.f32 %v1589_v38, %v1579_v31 }
0x16a5   :  { %v1676_v20 = vpop.f32.mrf.mxu0 }
0x16a6   :  { %3284 = vtanh.f32 %v1679_v18  ;;  %v1680_v40 = vadd.f32 %v1676_v20, %v1607_v33  ;;  %v3040_v24 = vmul.f32 -1.442695, %v1679_v18 }
0x16a8   :  { %3286 = vtanh.f32 %v1680_v40  ;;  %v3041_v2 = vmul.f32 -1.442695, %v1680_v40 }
0x16a9   :  { %3288 = vpow2.f32 %v3040_v24 }
0x16aa   :  { %3290 = vpow2.f32 %v3041_v2 }
0x16b3   :  { %v3285_v14 = vpop.eup %3284 }
0x16b4   :  { %1697 = vrot.lane.b32.xlu1 %v3285_v14, %s3413_s3 }
0x16b5   :  { %v3287_v51 = vpop.eup %3286 }
0x16b6   :  { %1708 = vrot.lane.b32.xlu0 %v3287_v51, %s3413_s3  ;;  %v3289_v44 = vpop.eup %3288 }
0x16b7   :  { %v3291_v26 = vpop.eup %3290  ;;  %v1687_v43 = vadd.f32 1.0, %v3289_v44 }
0x16b8   :  { %v1688_v7 = vadd.f32 1.0, %v3291_v26 }
0x16b9   :  { %3292 = vrcp.f32 %v1687_v43 }
0x16ba   :  { %3294 = vrcp.f32 %v1688_v7 }
0x16c6   :  { %v3293_v38 = vpop.eup %3292 }
0x16c7   :  { %v3295_v61 = vpop.eup %3294  ;;  %v1695_v46 = vmul.f32 0.0, %v3293_v38 }
0x16c8   :  { %v1706_v0 = vmul.f32 0.0, %v3295_v61 }
0x1726   :  { %v1698_v56 = vpop.permute.xlu1 %1697 }
0x1727   :  { %v1700_v60 = vmul.f32 %v3293_v38, %v1698_v56 }
0x1728   :  { %v1709_v55 = vpop.permute.xlu0 %1708 }
0x1729   :  { %1702 = vrot.lane.b32.xlu1 %v1700_v60, %s3414_s14  ;;  %v1711_v45 = vmul.f32 %v3295_v61, %v1709_v55 }
0x172b   :  { %1713 = vrot.lane.b32.xlu0 %v1711_v45, %s3414_s14 }
0x179b   :  { %v1703_v48 = vpop.permute.xlu1 %1702 }
0x179c   :  { %v4255_v54 = vadd.f32 %v1703_v48, %v1695_v46 }
0x179d   :  { %v1714_v49 = vpop.permute.xlu0 %1713 }
0x179e   :  { %3296 = vtanh.f32 %v4255_v54  ;;  %v4258_v25 = vadd.f32 %v1714_v49, %v1706_v0 }
0x17a0   :  { %3298 = vtanh.f32 %v4258_v25 }
0x17ab   :  { %v3297_v62 = vpop.eup %3296 }
0x17ac   :  { %1719 = vrot.lane.b32.xlu1 %v3297_v62, %s3413_s3 }
0x17ad   :  { %v3299_v36 = vpop.eup %3298 }
0x17ae   :  { %1725 = vrot.lane.b32.xlu0 %v3299_v36, %s3413_s3 }
0x181e   :  { %v1720_v42 = vpop.permute.xlu1 %1719 }
0x181f   :  { %v1722_v4 = vmul.f32 %v3293_v38, %v1720_v42 }
0x1820   :  { %v1726_v31 = vpop.permute.xlu0 %1725 }
0x1821   :  { %1730 = vrot.lane.b32.xlu1 %v1722_v4, %s3414_s14  ;;  %v4264_v35 = vmul.f32 %v3295_v61, %v1726_v31 }
0x1823   :  { %1734 = vrot.lane.b32.xlu0 %v4264_v35, %s3413_s3 }
0x1893   :  { %v4268_v12 = vpop.permute.xlu1 %1730 }
0x1895   :  { %v1735_v18 = vpop.permute.xlu0 %1734 }
0x1896   :  { %v1737_v33 = vsel %vm346_vm1, %v4268_v12, %v1735_v18 }
0x1897   :  { %3042 = vmatmul.mubr.msk.f32.vlgmr.msra.gmra.mxu1 %vm213_vm2, %v1737_v33 }
0x1898   :  { %2024 = vmatpush1.msra.mxu1 %v4059_v27  ;;  %2071 = vmatprep.mubr.f32.mxu1 %v3412_v3 }
0x1899   :  { %2025 = vmatprep.subr.mxu1 %v4064_v13 }
0x189a   :  { %2026 = vmatpush1.msra.mxu1 %v4071_v5 }
0x189b   :  { %2027 = vmatprep.subr.mxu1 %v4076_v15 }
0x189c   :  { %2028 = vmatpush1.msra.mxu1 %v4083_v16 }
0x189d   :  { %2029 = vmatprep.subr.mxu1 %v4088_v17 }
0x189e   :  { %2030 = vmatpush1.msra.mxu1 %v4095_v21 }
0x189f   :  { %2031 = vmatprep.subr.mxu1 %v4101_v22 }
0x18a0   :  { %2032 = vmatpush1.msra.mxu1 %v4108_v23 }
0x18a1   :  { %2033 = vmatprep.subr.mxu1 %v4115_v47 }
0x18a2   :  { %2034 = vmatpush1.msra.mxu1 %v4122_v59 }
0x18a3   :  { %2035 = vmatprep.subr.mxu1 %v4129_v53 }
0x18a4   :  { %2036 = vmatpush1.msra.mxu1 %v4136_v41 }
0x18a5   :  { %2037 = vmatprep.subr.mxu1 %v4143_v29 }
0x18a6   :  { %2038 = vmatpush1.msra.mxu1 %v4151_v34 }
0x18a7   :  { %2289 = vmatprep.subr.mxu1 %v4039_v8 }
0x1957   :  { %v1807_v20 = vpop.f32.mrf.mxu1 }
0x1958   :  { %v1812_v40 = vadd.f32 %v1807_v20, %v4225_v63 }
0x1959   :  { %v1809_v14 = vpop.f32.mrf.mxu1 }
0x195a   :  { %3300 = vtanh.f32 %v1812_v40  ;;  %v1813_v51 = vadd.f32 %v1809_v14, %v4247_v37  ;;  %v3043_v44 = vmul.f32 -1.442695, %v1812_v40 }
0x195c   :  { %3302 = vtanh.f32 %v1813_v51  ;;  %v3044_v26 = vmul.f32 -1.442695, %v1813_v51 }
0x195d   :  { %3304 = vpow2.f32 %v3043_v44 }
0x195e   :  { %3306 = vpow2.f32 %v3044_v26 }
0x1967   :  { %v3301_v24 = vpop.eup %3300 }
0x1968   :  { %1830 = vrot.lane.b32.xlu1 %v3301_v24, %s3413_s3 }
0x1969   :  { %v3303_v2 = vpop.eup %3302 }
0x196a   :  { %1841 = vrot.lane.b32.xlu0 %v3303_v2, %s3413_s3  ;;  %v3305_v43 = vpop.eup %3304 }
0x196b   :  { %v3307_v7 = vpop.eup %3306  ;;  %v1820_v38 = vadd.f32 1.0, %v3305_v43 }
0x196c   :  { %v1821_v56 = vadd.f32 1.0, %v3307_v7 }
0x196d   :  { %3308 = vrcp.f32 %v1820_v38 }
0x196e   :  { %3310 = vrcp.f32 %v1821_v56 }
0x197a   :  { %v3309_v63 = vpop.eup %3308 }
0x197b   :  { %v3311_v61 = vpop.eup %3310  ;;  %v1828_v46 = vmul.f32 %v3309_v63, %v4255_v54 }
0x197c   :  { %v1839_v49 = vmul.f32 %v3311_v61, %v4258_v25 }
0x19da   :  { %v1831_v60 = vpop.permute.xlu1 %1830 }
0x19db   :  { %v1833_v37 = vmul.f32 %v3309_v63, %v1831_v60 }
0x19dc   :  { %v1842_v55 = vpop.permute.xlu0 %1841 }
0x19dd   :  { %1835 = vrot.lane.b32.xlu1 %v1833_v37, %s3414_s14  ;;  %v1844_v45 = vmul.f32 %v3311_v61, %v1842_v55 }
0x19df   :  { %1846 = vrot.lane.b32.xlu0 %v1844_v45, %s3414_s14 }
0x1a4f   :  { %v1836_v48 = vpop.permute.xlu1 %1835 }
0x1a50   :  { %v4297_v0 = vadd.f32 %v1836_v48, %v1828_v46 }
0x1a51   :  { %v1847_v62 = vpop.permute.xlu0 %1846 }
0x1a52   :  { %3312 = vtanh.f32 %v4297_v0  ;;  %v4301_v36 = vadd.f32 %v1847_v62, %v1839_v49 }
0x1a54   :  { %3314 = vtanh.f32 %v4301_v36 }
0x1a5f   :  { %v3313_v42 = vpop.eup %3312 }
0x1a60   :  { %1852 = vrot.lane.b32.xlu1 %v3313_v42, %s3413_s3 }
0x1a61   :  { %v3315_v4 = vpop.eup %3314 }
0x1a62   :  { %1858 = vrot.lane.b32.xlu0 %v3315_v4, %s3413_s3 }
0x1ad2   :  { %v1853_v31 = vpop.permute.xlu1 %1852 }
0x1ad3   :  { %v1855_v54 = vmul.f32 %v3309_v63, %v1853_v31 }
0x1ad4   :  { %v1859_v18 = vpop.permute.xlu0 %1858 }
0x1ad5   :  { %1863 = vrot.lane.b32.xlu1 %v1855_v54, %s3414_s14  ;;  %v4307_v33 = vmul.f32 %v3311_v61, %v1859_v18 }
0x1ad7   :  { %1867 = vrot.lane.b32.xlu0 %v4307_v33, %s3413_s3 }
0x1b47   :  { %v4311_v25 = vpop.permute.xlu1 %1863 }
0x1b49   :  { %v1868_v20 = vpop.permute.xlu0 %1867 }
0x1b4a   :  { %v1870_v40 = vsel %vm346_vm1, %v4311_v25, %v1868_v20 }
0x1b4b   :  { %3045 = vmatmul.mubr.msk.f32.vlgmr.msra.gmra.mxu0 %vm213_vm2, %v1870_v40 }
0x1b4c   :  { %2157 = vmatpush1.msra.mxu0 %v4059_v27  ;;  %2204 = vmatprep.mubr.f32.mxu0 %v3412_v3 }
0x1b4d   :  { %2158 = vmatprep.subr.mxu0 %v4064_v13 }
0x1b4e   :  { %2159 = vmatpush1.msra.mxu0 %v4071_v5 }
0x1b4f   :  { %2160 = vmatprep.subr.mxu0 %v4076_v15 }
0x1b50   :  { %2161 = vmatpush1.msra.mxu0 %v4083_v16 }
0x1b51   :  { %2162 = vmatprep.subr.mxu0 %v4088_v17 }
0x1b52   :  { %2163 = vmatpush1.msra.mxu0 %v4095_v21 }
0x1b53   :  { %2164 = vmatprep.subr.mxu0 %v4101_v22 }
0x1b54   :  { %2165 = vmatpush1.msra.mxu0 %v4108_v23 }
0x1b55   :  { %2166 = vmatprep.subr.mxu0 %v4115_v47 }
0x1b56   :  { %2167 = vmatpush1.msra.mxu0 %v4122_v59 }
0x1b57   :  { %2168 = vmatprep.subr.mxu0 %v4129_v53 }
0x1b58   :  { %2169 = vmatpush1.msra.mxu0 %v4136_v41 }
0x1b59   :  { %2170 = vmatprep.subr.mxu0 %v4143_v29 }
0x1b5a   :  { %2171 = vmatpush1.msra.mxu0 %v4151_v34 }
0x1b5b   :  { %2422 = vmatprep.subr.mxu0 %v4039_v8 }
0x1c0b   :  { %v1940_v14 = vpop.f32.mrf.mxu0 }
0x1c0c   :  { %v1945_v51 = vadd.f32 %v1940_v14, %v4229_v10 }
0x1c0d   :  { %v1942_v24 = vpop.f32.mrf.mxu0 }
0x1c0e   :  { %3316 = vtanh.f32 %v1945_v51  ;;  %v1946_v2 = vadd.f32 %v1942_v24, %v4243_v9  ;;  %v3046_v43 = vmul.f32 -1.442695, %v1945_v51 }
0x1c10   :  { %3318 = vtanh.f32 %v1946_v2  ;;  %v3047_v7 = vmul.f32 -1.442695, %v1946_v2 }
0x1c11   :  { %3320 = vpow2.f32 %v3046_v43 }
0x1c12   :  { %3322 = vpow2.f32 %v3047_v7 }
0x1c1b   :  { %v3317_v44 = vpop.eup %3316 }
0x1c1c   :  { %1963 = vrot.lane.b32.xlu1 %v3317_v44, %s3413_s3 }
0x1c1d   :  { %v3319_v26 = vpop.eup %3318 }
0x1c1e   :  { %1974 = vrot.lane.b32.xlu0 %v3319_v26, %s3413_s3  ;;  %v3321_v38 = vpop.eup %3320 }
0x1c1f   :  { %v3323_v56 = vpop.eup %3322  ;;  %v1953_v63 = vadd.f32 1.0, %v3321_v38 }
0x1c20   :  { %v1954_v60 = vadd.f32 1.0, %v3323_v56 }
0x1c21   :  { %3324 = vrcp.f32 %v1953_v63 }
0x1c22   :  { %3326 = vrcp.f32 %v1954_v60 }
0x1c2e   :  { %v3325_v10 = vpop.eup %3324 }
0x1c2f   :  { %v3327_v61 = vpop.eup %3326  ;;  %v1961_v46 = vmul.f32 %v3325_v10, %v4297_v0 }
0x1c30   :  { %v1972_v62 = vmul.f32 %v3327_v61, %v4301_v36 }
0x1c8e   :  { %v1964_v37 = vpop.permute.xlu1 %1963 }
0x1c8f   :  { %v1966_v9 = vmul.f32 %v3325_v10, %v1964_v37 }
0x1c90   :  { %v1975_v55 = vpop.permute.xlu0 %1974 }
0x1c91   :  { %1968 = vrot.lane.b32.xlu1 %v1966_v9, %s3414_s14  ;;  %v1977_v45 = vmul.f32 %v3327_v61, %v1975_v55 }
0x1c93   :  { %1979 = vrot.lane.b32.xlu0 %v1977_v45, %s3414_s14 }
0x1d03   :  { %v1969_v48 = vpop.permute.xlu1 %1968 }
0x1d04   :  { %v4340_v49 = vadd.f32 %v1969_v48, %v1961_v46 }
0x1d05   :  { %v1980_v42 = vpop.permute.xlu0 %1979 }
0x1d06   :  { %3328 = vtanh.f32 %v4340_v49  ;;  %v4344_v4 = vadd.f32 %v1980_v42, %v1972_v62 }
0x1d08   :  { %3330 = vtanh.f32 %v4344_v4 }
0x1d13   :  { %v3329_v31 = vpop.eup %3328 }
0x1d14   :  { %1985 = vrot.lane.b32.xlu1 %v3329_v31, %s3413_s3 }
0x1d15   :  { %v3331_v54 = vpop.eup %3330 }
0x1d16   :  { %1991 = vrot.lane.b32.xlu0 %v3331_v54, %s3413_s3 }
0x1d86   :  { %v1986_v18 = vpop.permute.xlu1 %1985 }
0x1d87   :  { %v1988_v0 = vmul.f32 %v3325_v10, %v1986_v18 }
0x1d88   :  { %v1992_v20 = vpop.permute.xlu0 %1991 }
0x1d89   :  { %1996 = vrot.lane.b32.xlu1 %v1988_v0, %s3414_s14  ;;  %v4350_v40 = vmul.f32 %v3327_v61, %v1992_v20 }
0x1d8b   :  { %2000 = vrot.lane.b32.xlu0 %v4350_v40, %s3413_s3 }
0x1dfb   :  { %v4354_v36 = vpop.permute.xlu1 %1996 }
0x1dfd   :  { %v2001_v14 = vpop.permute.xlu0 %2000 }
0x1dfe   :  { %v2003_v51 = vsel %vm346_vm1, %v4354_v36, %v2001_v14 }
0x1dff   :  { %3048 = vmatmul.mubr.msk.f32.vlgmr.msra.gmra.mxu1 %vm213_vm2, %v2003_v51 }
0x1e00   :  { %2290 = vmatpush1.msra.mxu1 %v4059_v27  ;;  %2337 = vmatprep.mubr.f32.mxu1 %v3412_v3 }
0x1e01   :  { %2291 = vmatprep.subr.mxu1 %v4064_v13 }
0x1e02   :  { %2292 = vmatpush1.msra.mxu1 %v4071_v5 }
0x1e03   :  { %2293 = vmatprep.subr.mxu1 %v4076_v15 }
0x1e04   :  { %2294 = vmatpush1.msra.mxu1 %v4083_v16 }
0x1e05   :  { %2295 = vmatprep.subr.mxu1 %v4088_v17 }
0x1e06   :  { %2296 = vmatpush1.msra.mxu1 %v4095_v21 }
0x1e07   :  { %2297 = vmatprep.subr.mxu1 %v4101_v22 }
0x1e08   :  { %2298 = vmatpush1.msra.mxu1 %v4108_v23 }
0x1e09   :  { %2299 = vmatprep.subr.mxu1 %v4115_v47 }
0x1e0a   :  { %2300 = vmatpush1.msra.mxu1 %v4122_v59 }
0x1e0b   :  { %2301 = vmatprep.subr.mxu1 %v4129_v53 }
0x1e0c   :  { %2302 = vmatpush1.msra.mxu1 %v4136_v41 }
0x1e0d   :  { %2303 = vmatprep.subr.mxu1 %v4143_v29 }
0x1e0e   :  { %2304 = vmatpush1.msra.mxu1 %v4151_v34 }
0x1e0f   :  { %2555 = vmatprep.subr.mxu1 %v4039_v8 }
0x1ebf   :  { %v2073_v24 = vpop.f32.mrf.mxu1 }
0x1ec0   :  { %v2078_v2 = vadd.f32 %v2073_v24, %v4233_v39 }
0x1ec1   :  { %v2075_v44 = vpop.f32.mrf.mxu1 }
0x1ec2   :  { %3332 = vtanh.f32 %v2078_v2  ;;  %v2079_v26 = vadd.f32 %v2075_v44, %v4239_v19  ;;  %v3049_v38 = vmul.f32 -1.442695, %v2078_v2 }
0x1ec4   :  { %3334 = vtanh.f32 %v2079_v26  ;;  %v3050_v56 = vmul.f32 -1.442695, %v2079_v26 }
0x1ec5   :  { %3336 = vpow2.f32 %v3049_v38 }
0x1ec6   :  { %3338 = vpow2.f32 %v3050_v56 }
0x1ecf   :  { %v3333_v43 = vpop.eup %3332 }
0x1ed0   :  { %2096 = vrot.lane.b32.xlu1 %v3333_v43, %s3413_s3 }
0x1ed1   :  { %v3335_v7 = vpop.eup %3334 }
0x1ed2   :  { %2107 = vrot.lane.b32.xlu0 %v3335_v7, %s3413_s3  ;;  %v3337_v63 = vpop.eup %3336 }
0x1ed3   :  { %v3339_v8 = vpop.eup %3338  ;;  %v2086_v60 = vadd.f32 1.0, %v3337_v63 }
0x1ed4   :  { %v2087_v10 = vadd.f32 1.0, %v3339_v8 }
0x1ed5   :  { %3340 = vrcp.f32 %v2086_v60 }
0x1ed6   :  { %3342 = vrcp.f32 %v2087_v10 }
0x1ee2   :  { %v3341_v39 = vpop.eup %3340 }
0x1ee3   :  { %v3343_v9 = vpop.eup %3342  ;;  %v2094_v45 = vmul.f32 %v3341_v39, %v4340_v49 }
0x1ee4   :  { %v2105_v62 = vmul.f32 %v3343_v9, %v4344_v4 }
0x1f42   :  { %v2097_v37 = vpop.permute.xlu1 %2096 }
0x1f43   :  { %v2099_v19 = vmul.f32 %v3341_v39, %v2097_v37 }
0x1f44   :  { %v2108_v61 = vpop.permute.xlu0 %2107 }
0x1f45   :  { %2101 = vrot.lane.b32.xlu1 %v2099_v19, %s3414_s14  ;;  %v2110_v55 = vmul.f32 %v3343_v9, %v2108_v61 }
0x1f47   :  { %2112 = vrot.lane.b32.xlu0 %v2110_v55, %s3414_s14 }
0x1fb7   :  { %v2102_v46 = vpop.permute.xlu1 %2101 }
0x1fb8   :  { %v4383_v48 = vadd.f32 %v2102_v46, %v2094_v45 }
0x1fb9   :  { %v2113_v42 = vpop.permute.xlu0 %2112 }
0x1fba   :  { %3344 = vtanh.f32 %v4383_v48  ;;  %v4387_v31 = vadd.f32 %v2113_v42, %v2105_v62 }
0x1fbc   :  { %3346 = vtanh.f32 %v4387_v31 }
0x1fc7   :  { %v3345_v54 = vpop.eup %3344 }
0x1fc8   :  { %2118 = vrot.lane.b32.xlu1 %v3345_v54, %s3413_s3 }
0x1fc9   :  { %v3347_v18 = vpop.eup %3346 }
0x1fca   :  { %2124 = vrot.lane.b32.xlu0 %v3347_v18, %s3413_s3 }
0x203a   :  { %v2119_v0 = vpop.permute.xlu1 %2118 }
0x203b   :  { %v2121_v49 = vmul.f32 %v3341_v39, %v2119_v0 }
0x203c   :  { %v2125_v20 = vpop.permute.xlu0 %2124 }
0x203d   :  { %2129 = vrot.lane.b32.xlu1 %v2121_v49, %s3414_s14  ;;  %v4393_v14 = vmul.f32 %v3343_v9, %v2125_v20 }
0x203f   :  { %2133 = vrot.lane.b32.xlu0 %v4393_v14, %s3413_s3 }
0x20af   :  { %v4397_v4 = vpop.permute.xlu1 %2129 }
0x20b1   :  { %v2134_v51 = vpop.permute.xlu0 %2133 }
0x20b2   :  { %v2136_v24 = vsel %vm346_vm1, %v4397_v4, %v2134_v51 }
0x20b3   :  { %3051 = vmatmul.mubr.msk.f32.vlgmr.msra.gmra.mxu0 %vm213_vm2, %v2136_v24 }
0x20b4   :  { %2423 = vmatpush1.msra.mxu0 %v4059_v27  ;;  %2470 = vmatprep.mubr.f32.mxu0 %v3412_v3 }
0x20b5   :  { %2424 = vmatprep.subr.mxu0 %v4064_v13 }
0x20b6   :  { %2425 = vmatpush1.msra.mxu0 %v4071_v5 }
0x20b7   :  { %2426 = vmatprep.subr.mxu0 %v4076_v15 }
0x20b8   :  { %2427 = vmatpush1.msra.mxu0 %v4083_v16 }
0x20b9   :  { %2428 = vmatprep.subr.mxu0 %v4088_v17 }
0x20ba   :  { %2429 = vmatpush1.msra.mxu0 %v4095_v21 }
0x20bb   :  { %2430 = vmatprep.subr.mxu0 %v4101_v22 }
0x20bc   :  { %2431 = vmatpush1.msra.mxu0 %v4108_v23 }
0x20bd   :  { %2432 = vmatprep.subr.mxu0 %v4115_v47 }
0x20be   :  { %2433 = vmatpush1.msra.mxu0 %v4122_v59 }
0x20bf   :  { %2434 = vmatprep.subr.mxu0 %v4129_v53 }
0x20c0   :  { %2435 = vmatpush1.msra.mxu0 %v4136_v41 }
0x20c1   :  { %2436 = vmatprep.subr.mxu0 %v4143_v29 }
0x20c2   :  { %2437 = vmatpush1.msra.mxu0 %v4151_v34 }
0x2173   :  { %v2206_v2 = vpop.f32.mrf.mxu0 }
0x2174   :  { %v2211_v44 = vadd.f32 %v2206_v2, %v4237_v50 }
0x2175   :  { %v2208_v26 = vpop.f32.mrf.mxu0 }
0x2176   :  { %3348 = vtanh.f32 %v2211_v44  ;;  %v2212_v43 = vadd.f32 %v2208_v26, %v4235_v1  ;;  %v3052_v56 = vmul.f32 -1.442695, %v2211_v44 }
0x2178   :  { %3350 = vtanh.f32 %v2212_v43  ;;  %v3053_v63 = vmul.f32 -1.442695, %v2212_v43 }
0x2179   :  { %3352 = vpow2.f32 %v3052_v56 }
0x217a   :  { %3354 = vpow2.f32 %v3053_v63 }
0x2183   :  { %v3349_v7 = vpop.eup %3348 }
0x2184   :  { %2229 = vrot.lane.b32.xlu1 %v3349_v7, %s3413_s3 }
0x2185   :  { %v3351_v38 = vpop.eup %3350 }
0x2186   :  { %2240 = vrot.lane.b32.xlu0 %v3351_v38, %s3413_s3  ;;  %v3353_v8 = vpop.eup %3352 }
0x2187   :  { %v3355_v60 = vpop.eup %3354  ;;  %v2219_v10 = vadd.f32 1.0, %v3353_v8 }
0x2188   :  { %v2220_v39 = vadd.f32 1.0, %v3355_v60 }
0x2189   :  { %3356 = vrcp.f32 %v2219_v10 }
0x218a   :  { %3358 = vrcp.f32 %v2220_v39 }
0x2196   :  { %v3357_v50 = vpop.eup %3356 }
0x2197   :  { %v3359_v19 = vpop.eup %3358  ;;  %v2227_v55 = vmul.f32 %v3357_v50, %v4383_v48 }
0x2198   :  { %v2238_v62 = vmul.f32 %v3359_v19, %v4387_v31 }
0x21f6   :  { %v2230_v37 = vpop.permute.xlu1 %2229 }
0x21f7   :  { %v2232_v1 = vmul.f32 %v3357_v50, %v2230_v37 }
0x21f8   :  { %v2241_v9 = vpop.permute.xlu0 %2240 }
0x21f9   :  { %2234 = vrot.lane.b32.xlu1 %v2232_v1, %s3414_s14  ;;  %v2243_v61 = vmul.f32 %v3359_v19, %v2241_v9 }
0x21fb   :  { %2245 = vrot.lane.b32.xlu0 %v2243_v61, %s3414_s14 }
0x226b   :  { %v2235_v45 = vpop.permute.xlu1 %2234 }
0x226c   :  { %v4425_v46 = vadd.f32 %v2235_v45, %v2227_v55 }
0x226d   :  { %v2246_v42 = vpop.permute.xlu0 %2245 }
0x226e   :  { %3360 = vtanh.f32 %v4425_v46  ;;  %v4429_v54 = vadd.f32 %v2246_v42, %v2238_v62 }
0x2270   :  { %3362 = vtanh.f32 %v4429_v54 }
0x227b   :  { %v3361_v18 = vpop.eup %3360 }
0x227c   :  { %2251 = vrot.lane.b32.xlu1 %v3361_v18, %s3413_s3 }
0x227d   :  { %v3363_v0 = vpop.eup %3362 }
0x227e   :  { %2257 = vrot.lane.b32.xlu0 %v3363_v0, %s3413_s3 }
0x22ee   :  { %v2252_v49 = vpop.permute.xlu1 %2251 }
0x22ef   :  { %v2254_v48 = vmul.f32 %v3357_v50, %v2252_v49 }
0x22f0   :  { %v2258_v20 = vpop.permute.xlu0 %2257 }
0x22f1   :  { %2262 = vrot.lane.b32.xlu1 %v2254_v48, %s3414_s14  ;;  %v4435_v51 = vmul.f32 %v3359_v19, %v2258_v20 }
0x22f3   :  { %2266 = vrot.lane.b32.xlu0 %v4435_v51, %s3413_s3 }
0x2363   :  { %v4439_v31 = vpop.permute.xlu1 %2262 }
0x2365   :  { %v2267_v24 = vpop.permute.xlu0 %2266 }
0x2366   :  { %v2269_v2 = vsel %vm346_vm1, %v4439_v31, %v2267_v24 }
0x2367   :  { %3054 = vmatmul.mubr.msk.f32.vlgmr.msra.gmra.mxu1 %vm213_vm2, %v2269_v2 }
0x2368   :  { %2556 = vmatpush1.msra.mxu1 %v4059_v27  ;;  %2603 = vmatprep.mubr.f32.mxu1 %v3412_v3 }
0x2369   :  { %2557 = vmatprep.subr.mxu1 %v4064_v13 }
0x236a   :  { %2558 = vmatpush1.msra.mxu1 %v4071_v5 }
0x236b   :  { %2559 = vmatprep.subr.mxu1 %v4076_v15 }
0x236c   :  { %2560 = vmatpush1.msra.mxu1 %v4083_v16 }
0x236d   :  { %2561 = vmatprep.subr.mxu1 %v4088_v17 }
0x236e   :  { %2562 = vmatpush1.msra.mxu1 %v4095_v21 }
0x236f   :  { %2563 = vmatprep.subr.mxu1 %v4101_v22 }
0x2370   :  { %2564 = vmatpush1.msra.mxu1 %v4108_v23 }
0x2371   :  { %2565 = vmatprep.subr.mxu1 %v4115_v47 }
0x2372   :  { %2566 = vmatpush1.msra.mxu1 %v4122_v59 }
0x2373   :  { %2567 = vmatprep.subr.mxu1 %v4129_v53 }
0x2374   :  { %2568 = vmatpush1.msra.mxu1 %v4136_v41 }
0x2375   :  { %2569 = vmatprep.subr.mxu1 %v4143_v29 }
0x2376   :  { %2570 = vmatpush1.msra.mxu1 %v4151_v34 }
0x2427   :  { %v2339_v3 = vpop.f32.mrf.mxu1 }
0x2428   :  { %v2344_v27 = vadd.f32 %v2339_v3, %v4241_v57 }
0x2429   :  { %v2341_v13 = vpop.f32.mrf.mxu1 }
0x242a   :  { %3364 = vtanh.f32 %v2344_v27  ;;  %v2345_v5 = vadd.f32 %v2341_v13, %v4231_v30  ;;  %v3055_v17 = vmul.f32 -1.442695, %v2344_v27 }
0x242c   :  { %3366 = vtanh.f32 %v2345_v5  ;;  %v3056_v21 = vmul.f32 -1.442695, %v2345_v5 }
0x242d   :  { %3368 = vpow2.f32 %v3055_v17 }
0x242e   :  { %3370 = vpow2.f32 %v3056_v21 }
0x2437   :  { %v3365_v15 = vpop.eup %3364 }
0x2438   :  { %2362 = vrot.lane.b32.xlu1 %v3365_v15, %s3413_s3 }
0x2439   :  { %v3367_v16 = vpop.eup %3366 }
0x243a   :  { %2373 = vrot.lane.b32.xlu0 %v3367_v16, %s3413_s3  ;;  %v3369_v22 = vpop.eup %3368 }
0x243b   :  { %v3371_v23 = vpop.eup %3370  ;;  %v2352_v47 = vadd.f32 1.0, %v3369_v22 }
0x243c   :  { %v2353_v59 = vadd.f32 1.0, %v3371_v23  ;;  %v4497_v23 = vld [vmem:[%s4654_s7 + $0x18] sm:$0xff] }
0x243d   :  { %3372 = vrcp.f32 %v2352_v47  ;;  %3144 = vmatprep.subr.mxu1 %v4497_v23 }
0x243e   :  { %3374 = vrcp.f32 %v2353_v59 }
0x244a   :  { %v3373_v53 = vpop.eup %3372 }
0x244b   :  { %v3375_v34 = vpop.eup %3374  ;;  %v2360_v44 = vmul.f32 %v3373_v53, %v4425_v46 }
0x244c   :  { %v2371_v7 = vmul.f32 %v3375_v34, %v4429_v54 }
0x24aa   :  { %v2363_v41 = vpop.permute.xlu1 %2362 }
0x24ab   :  { %v2365_v29 = vmul.f32 %v3373_v53, %v2363_v41 }
0x24ac   :  { %v2374_v30 = vpop.permute.xlu0 %2373 }
0x24ad   :  { %2367 = vrot.lane.b32.xlu1 %v2365_v29, %s3414_s14  ;;  %v2376_v57 = vmul.f32 %v3375_v34, %v2374_v30 }
0x24af   :  { %2378 = vrot.lane.b32.xlu0 %v2376_v57, %s3414_s14  ;;  %v4506_v57 = vld [vmem:[%s4654_s7 + $0x10] sm:$0xff] }
0x251f   :  { %v2368_v26 = vpop.permute.xlu1 %2367 }
0x2520   :  { %v2370_v43 = vadd.f32 %v2368_v26, %v2360_v44  ;;  %v4515_v44 = vld [vmem:[%s4654_s7 + $0x8] sm:$0xff]  ;;  %v4522_v26 = vld [vmem:[%s4654_s7] sm:$0xff] }
0x2521   :  { %v2379_v38 = vpop.permute.xlu0 %2378 }
0x2522   :  { %3376 = vtanh.f32 %v2370_v43  ;;  %v2381_v56 = vadd.f32 %v2379_v38, %v2371_v7 }
0x2524   :  { %3378 = vtanh.f32 %v2381_v56 }
0x252f   :  { %v3377_v63 = vpop.eup %3376 }
0x2530   :  { %2384 = vrot.lane.b32.xlu1 %v3377_v63, %s3413_s3 }
0x2531   :  { %v3379_v8 = vpop.eup %3378 }
0x2532   :  { %2390 = vrot.lane.b32.xlu0 %v3379_v8, %s3413_s3 }
0x25a2   :  { %v2385_v60 = vpop.permute.xlu1 %2384 }
0x25a3   :  { %v2387_v10 = vmul.f32 %v3373_v53, %v2385_v60 }
0x25a4   :  { %v2391_v39 = vpop.permute.xlu0 %2390 }
0x25a5   :  { %2395 = vrot.lane.b32.xlu1 %v2387_v10, %s3414_s14  ;;  %v4471_v50 = vmul.f32 %v3375_v34, %v2391_v39 }
0x25a7   :  { %2399 = vrot.lane.b32.xlu0 %v4471_v50, %s3413_s3 }
0x2617   :  { %v4475_v37 = vpop.permute.xlu1 %2395 }
0x2619   :  { %v2400_v1 = vpop.permute.xlu0 %2399 }
0x261a   :  { %v2402_v19 = vsel %vm346_vm1, %v4475_v37, %v2400_v1 }
0x261b   :  { %3057 = vmatmul.mubr.msk.f32.vlgmr.msra.gmra.mxu0 %vm213_vm2, %v2402_v19 }
0x26db   :  { %v2472_v9 = vpop.f32.mrf.mxu0 }
0x26dc   :  { %v2477_v61 = vadd.f32 %v2472_v9, %v4245_v52 }
0x26dd   :  { %v2474_v55 = vpop.f32.mrf.mxu0 }
0x26de   :  { %3380 = vtanh.f32 %v2477_v61  ;;  %v2478_v45 = vadd.f32 %v2474_v55, %v4227_v6  ;;  %v3058_v42 = vmul.f32 -1.442695, %v2477_v61 }
0x26e0   :  { %3382 = vtanh.f32 %v2478_v45  ;;  %v3059_v54 = vmul.f32 -1.442695, %v2478_v45 }
0x26e1   :  { %3384 = vpow2.f32 %v3058_v42 }
0x26e2   :  { %3386 = vpow2.f32 %v3059_v54 }
0x26eb   :  { %v3381_v46 = vpop.eup %3380 }
0x26ec   :  { %2495 = vrot.lane.b32.xlu1 %v3381_v46, %s3413_s3 }
0x26ed   :  { %v3383_v62 = vpop.eup %3382 }
0x26ee   :  { %2506 = vrot.lane.b32.xlu0 %v3383_v62, %s3413_s3  ;;  %v3385_v18 = vpop.eup %3384 }
0x26ef   :  { %v3387_v0 = vpop.eup %3386  ;;  %v2485_v49 = vadd.f32 1.0, %v3385_v18 }
0x26f0   :  { %v2486_v48 = vadd.f32 1.0, %v3387_v0  ;;  %v2667_v0 = vld [vmem:[%s4654_s7 + $0x38] sm:$0xff] }
0x26f1   :  { %3388 = vrcp.f32 %v2485_v49  ;;  %v2666_v49 = vld [vmem:[%s4654_s7 + $0x30] sm:$0xff]  ;;  %3104 = vmatprep.subr.mxu0 %v2667_v0 }
0x26f2   :  { %3390 = vrcp.f32 %v2486_v48  ;;  %3105 = vmatpush3.msra.mxu0 %v2667_v0 }
0x26f3   :  { %3106 = vmatprep.subr.mxu0 %v2666_v49 }
0x26f4   :  { %3107 = vmatpush3.msra.mxu0 %v2666_v49 }
0x26fe   :  { %v3389_v52 = vpop.eup %3388 }
0x26ff   :  { %v3391_v24 = vpop.eup %3390  ;;  %v2493_v27 = vmul.f32 %v3389_v52, %v2370_v43 }
0x2700   :  { %v2504_v15 = vmul.f32 %v3391_v24, %v2381_v56 }
0x275e   :  { %v2496_v20 = vpop.permute.xlu1 %2495 }
0x275f   :  { %v2498_v6 = vmul.f32 %v3389_v52, %v2496_v20 }
0x2760   :  { %v2507_v2 = vpop.permute.xlu0 %2506 }
0x2761   :  { %2500 = vrot.lane.b32.xlu1 %v2498_v6, %s3414_s14  ;;  %v2509_v3 = vmul.f32 %v3391_v24, %v2507_v2 }
0x2763   :  { %2511 = vrot.lane.b32.xlu0 %v2509_v3, %s3414_s14 }
0x27d3   :  { %v2501_v13 = vpop.permute.xlu1 %2500 }
0x27d4   :  { %v4486_v5 = vadd.f32 %v2501_v13, %v2493_v27 }
0x27d5   :  { %v2512_v16 = vpop.permute.xlu0 %2511 }
0x27d6   :  { %3392 = vtanh.f32 %v4486_v5  ;;  %v4489_v17 = vadd.f32 %v2512_v16, %v2504_v15 }
0x27d8   :  { %3394 = vtanh.f32 %v4489_v17 }
0x27e3   :  { %v3393_v21 = vpop.eup %3392 }
0x27e4   :  { %2517 = vrot.lane.b32.xlu1 %v3393_v21, %s3413_s3 }
0x27e5   :  { %v3395_v22 = vpop.eup %3394 }
0x27e6   :  { %2523 = vrot.lane.b32.xlu0 %v3395_v22, %s3413_s3 }
0x2856   :  { %v2518_v47 = vpop.permute.xlu1 %2517 }
0x2857   :  { %v2520_v59 = vmul.f32 %v3389_v52, %v2518_v47 }
0x2858   :  { %v2524_v53 = vpop.permute.xlu0 %2523 }
0x2859   :  { %2528 = vrot.lane.b32.xlu1 %v2520_v59, %s3414_s14  ;;  %v2526_v41 = vmul.f32 %v3391_v24, %v2524_v53 }
0x285b   :  { %2532 = vrot.lane.b32.xlu0 %v2526_v41, %s3413_s3 }
0x28cb   :  { %v2529_v29 = vpop.permute.xlu1 %2528 }
0x28cd   :  { %v2533_v34 = vpop.permute.xlu0 %2532 }
0x28ce   :  { %v2535_v30 = vsel %vm346_vm1, %v2529_v29, %v2533_v34 }
0x28cf   :  { %3060 = vmatmul.mubr.msk.f32.vlgmr.msra.gmra.mxu1 %vm213_vm2, %v2535_v30 }
0x28d0   :  { %3148 = vmatpush3.msra.mxu1 %v4497_v23  ;;  %3135 = vmatprep.mubr.msk.f32.mxu1 %vm346_vm1, %v4354_v36 }
0x28d1   :  { %3145 = vmatprep.subr.mxu1 %v4506_v57 }
0x28d2   :  { %3149 = vmatpush3.msra.mxu1 %v4506_v57 }
0x28d3   :  { %3146 = vmatprep.subr.mxu1 %v4515_v44 }
0x28d4   :  { %3150 = vmatpush3.msra.mxu1 %v4515_v44 }
0x28d5   :  { %3147 = vmatprep.subr.mxu1 %v4522_v26 }
0x28d6   :  { %3151 = vmatpush3.msra.mxu1 %v4522_v26 }
0x28d7   :  { %3136 = vmatmul.mubr.msk.f32.vlgmr.msra.gmra.mxu1 %vm346_vm1, %v4397_v4 }
0x28d8   :  { %3138 = vmatprep.mubr.msk.f32.mxu1 %vm346_vm1, %v4439_v31 }
0x28db   :  { %3139 = vmatmul.mubr.msk.f32.gmra.mxu1 %vm346_vm1, %v4475_v37 }
0x28dc   :  { %3141 = vmatprep.mubr.msk.f32.mxu1 %vm346_vm1, %v2529_v29 }
0x298f   :  { %v2605_v36 = vpop.f32.mrf.mxu1 }
0x2990   :  { %v2610_v43 = vadd.f32 %v2605_v36, %v4249_v11 }
0x2991   :  { %v2607_v7 = vpop.f32.mrf.mxu1 }
0x2992   :  { %3396 = vtanh.f32 %v2610_v43  ;;  %v2611_v38 = vadd.f32 %v2607_v7, %v4223_v28  ;;  %v3061_v31 = vmul.f32 -1.442695, %v2610_v43 }
0x2994   :  { %3398 = vtanh.f32 %v2611_v38  ;;  %v3062_v63 = vmul.f32 -1.442695, %v2611_v38 }
0x2995   :  { %3400 = vpow2.f32 %v3061_v31 }
0x2996   :  { %3402 = vpow2.f32 %v3062_v63 }
0x299f   :  { %v3397_v56 = vpop.eup %3396 }
0x29a0   :  { %2628 = vrot.lane.b32.xlu0 %v3397_v56, %s3413_s3 }
0x29a1   :  { %v3399_v4 = vpop.eup %3398 }
0x29a2   :  { %2639 = vrot.lane.b32.xlu1 %v3399_v4, %s3413_s3  ;;  %v3401_v8 = vpop.eup %3400 }
0x29a3   :  { %v3403_v60 = vpop.eup %3402  ;;  %v2618_v10 = vadd.f32 1.0, %v3401_v8 }
0x29a4   :  { %v2619_v39 = vadd.f32 1.0, %v3403_v60 }
0x29a5   :  { %3404 = vrcp.f32 %v2618_v10 }
0x29a6   :  { %3406 = vrcp.f32 %v2619_v39 }
0x29b2   :  { %v3405_v11 = vpop.eup %3404 }
0x29b3   :  { %v3407_v1 = vpop.eup %3406  ;;  %v2626_v61 = vmul.f32 %v3405_v11, %v4486_v5 }
0x29b4   :  { %v2637_v46 = vmul.f32 %v3407_v1, %v4489_v17 }
0x2a12   :  { %v2629_v37 = vpop.permute.xlu0 %2628 }
0x2a13   :  { %v2631_v28 = vmul.f32 %v3405_v11, %v2629_v37 }
0x2a14   :  { %v2640_v19 = vpop.permute.xlu1 %2639 }
0x2a15   :  { %2633 = vrot.lane.b32.xlu0 %v2631_v28, %s3414_s14  ;;  %v2642_v9 = vmul.f32 %v3407_v1, %v2640_v19 }
0x2a17   :  { %2644 = vrot.lane.b32.xlu1 %v2642_v9, %s3414_s14 }
0x2a87   :  { %v2634_v55 = vpop.permute.xlu0 %2633 }
0x2a88   :  { %v2636_v45 = vadd.f32 %v2634_v55, %v2626_v61 }
0x2a89   :  { %v2645_v62 = vpop.permute.xlu1 %2644 }
0x2a8a   :  { %3408 = vtanh.f32 %v2636_v45  ;;  %v2647_v42 = vadd.f32 %v2645_v62, %v2637_v46 }
0x2a8c   :  { %3410 = vtanh.f32 %v2647_v42 }
0x2a97   :  { %v3409_v54 = vpop.eup %3408 }
0x2a98   :  { %2650 = vrot.lane.b32.xlu0 %v3409_v54, %s3413_s3 }
0x2a99   :  { %v3411_v18 = vpop.eup %3410 }
0x2a9a   :  { %2656 = vrot.lane.b32.xlu1 %v3411_v18, %s3413_s3 }
0x2a9c   :  { %2671 = vrot.lane.b32.xlu0 %v2526_v41, %s3414_s14 }
0x2aa0   :  { %2675 = vrot.lane.b32.xlu0 %v4435_v51, %s3414_s14  ;;  %v2665_v51 = vld [vmem:[%s4654_s7 + $0x28] sm:$0xff] }
0x2aa1   :  { %3108 = vmatprep.subr.mxu0 %v2665_v51 }
0x2aa2   :  { %3109 = vmatpush3.msra.mxu0 %v2665_v51 }
0x2aa4   :  { %2679 = vrot.lane.b32.xlu0 %v4350_v40, %s3414_s14 }
0x2aa8   :  { %2683 = vrot.lane.b32.xlu0 %v4264_v35, %s3414_s14  ;;  %v2664_v35 = vld [vmem:[%s4654_s7 + $0x20] sm:$0xff] }
0x2aa9   :  { %3110 = vmatprep.subr.mxu0 %v2664_v35 }
0x2aaa   :  { %3111 = vmatpush3.msra.mxu0 %v2664_v35 }
0x2aab   :  { %3124 = vmatprep.subr.mxu0 %v4497_v23 }
0x2aac   :  { %2965 = vrot.lane.b32.xlu0 %v4008_v58, %s3415_s29 }
0x2ab0   :  { %2969 = vrot.lane.b32.xlu0 %v2636_v45, %s3415_s29 }
0x2b0a   :  { %v2651_v40 = vpop.permute.xlu0 %2650 }
0x2b0b   :  { %v2653_v2 = vmul.f32 %v3405_v11, %v2651_v40 }
0x2b0c   :  { %v2657_v48 = vpop.permute.xlu1 %2656 }
0x2b0d   :  { %v2659_v52 = vmul.f32 %v3407_v1, %v2657_v48 }
0x2b0e   :  { %v2672_v20 = vpop.permute.xlu0 %2671 }
0x2b0f   :  { %2669 = vrot.lane.b32.xlu1 %v2659_v52, %s3414_s14 }
0x2b12   :  { %v2676_v6 = vpop.permute.xlu0 %2675 }
0x2b13   :  { %2673 = vrot.lane.b32.xlu1 %v4471_v50, %s3414_s14 }
0x2b16   :  { %v2680_v58 = vpop.permute.xlu0 %2679 }
0x2b17   :  { %2677 = vrot.lane.b32.xlu1 %v4393_v14, %s3414_s14 }
0x2b1a   :  { %v2684_v24 = vpop.permute.xlu0 %2683 }
0x2b1b   :  { %2681 = vrot.lane.b32.xlu1 %v4307_v33, %s3414_s14 }
0x2b1e   :  { %v2966_v3 = vpop.permute.xlu0 %2965 }
0x2b1f   :  { %2977 = vst.msk [vmem:[%s4655_s11] sm:$0xff] %vm346_vm1, %v2966_v3  ;;  %2807 = vrot.lane.b32.xlu1 %v2653_v2, %s3414_s14 }
0x2b22   :  { %v2970_v27 = vpop.permute.xlu0 %2969 }
0x2b23   :  { %2979 = vst.msk [vmem:[%s4655_s11 + $0x10] sm:$0xff] %vm346_vm1, %v2970_v27  ;;  %2967 = vrot.lane.b32.xlu1 %v4012_v32, %s3415_s29 }
0x2b27   :  { %2971 = vrot.lane.b32.xlu1 %v2647_v42, %s3415_s29 }
0x2b81   :  { %v2670_v14 = vpop.permute.xlu1 %2669 }
0x2b82   :  { %2960 = vst.msk [vmem:[%s4652_s10 + $0x18] sm:$0xff] %vm346_vm1, %v2670_v14  ;;  %3112 = vmatprep.mubr.msk.f32.mxu0 %vm346_vm1, %v2670_v14 }
0x2b83   :  { %3113 = vmatmul.mubr.msk.f32.vlgmr.msra.gmra.mxu0 %vm346_vm1, %v2672_v20 }
0x2b84   :  { %3125 = vmatpush3.msra.mxu0 %v4497_v23 }
0x2b85   :  { %v2674_v33 = vpop.permute.xlu1 %2673  ;;  %3126 = vmatprep.subr.mxu0 %v4506_v57 }
0x2b86   :  { %3115 = vmatprep.mubr.msk.f32.mxu0 %vm346_vm1, %v2674_v33  ;;  %3127 = vmatpush3.msra.mxu0 %v4506_v57 }
0x2b87   :  { %3116 = vmatmul.mubr.msk.f32.gmra.mxu0 %vm346_vm1, %v2676_v6  ;;  %3128 = vmatprep.subr.mxu0 %v4515_v44 }
0x2b88   :  { %3129 = vmatpush3.msra.mxu0 %v4515_v44 }
0x2b89   :  { %v2678_v32 = vpop.permute.xlu1 %2677  ;;  %3130 = vmatprep.subr.mxu0 %v4522_v26 }
0x2b8a   :  { %3118 = vmatprep.mubr.msk.f32.mxu0 %vm346_vm1, %v2678_v32  ;;  %3131 = vmatpush3.msra.mxu0 %v4522_v26 }
0x2b8b   :  { %3119 = vmatmul.mubr.msk.f32.gmra.mxu0 %vm346_vm1, %v2680_v58 }
0x2b8d   :  { %v2682_v50 = vpop.permute.xlu1 %2681 }
0x2b8e   :  { %3121 = vmatprep.mubr.msk.f32.mxu0 %vm346_vm1, %v2682_v50 }
0x2b8f   :  { %3122 = vmatmul.mubr.msk.f32.gmra.mxu0 %vm346_vm1, %v2684_v24 }
0x2b90   :  { %3132 = vmatprep.mubr.msk.f32.mxu0 %vm346_vm1, %v4268_v12  ;;  %v3137_v12 = vpop.f32.mrf.mxu1 }
0x2b91   :  { %v2808_v13 = vpop.permute.xlu1 %2807 }
0x2b92   :  { %2959 = vst.msk [vmem:[%s4652_s10 + $0x10] sm:$0xff] %vm346_vm1, %v2808_v13  ;;  %3142 = vmatmul.mubr.msk.f32.gmra.mxu1 %vm346_vm1, %v2808_v13  ;;  %v2901_v17 = vpop.f32.mrf.mxu1 }
0x2b93   :  { %3133 = vmatmul.mubr.msk.f32.vlgmr.msra.gmra.mxu0 %vm346_vm1, %v4311_v25  ;;  %v3079_v25 = vld [vmem:[%s4656_s8] ss:$0 sm:$0xff] }
0x2b94   :  { %v3140_v47 = vpop.f32.mrf.mxu1 }
0x2b95   :  { %v2968_v5 = vpop.permute.xlu1 %2967 }
0x2b96   :  { %2978 = vst.msk [vmem:[%s4655_s11 + $0x8] sm:$0xff] %vm346_vm1, %v2968_v5  ;;  %v2911_v57 = vpop.f32.mrf.mxu1 }
0x2b99   :  { %v2972_v15 = vpop.permute.xlu1 %2971 }
0x2b9a   :  { %2980 = vst.msk [vmem:[%s4655_s11 + $0x18] sm:$0xff] %vm346_vm1, %v2972_v15 }
0x2c43   :  { %v3114_v16 = vpop.f32.mrf.mxu0 }
0x2c45   :  { %v2767_v21 = vpop.f32.mrf.mxu0 }
0x2c47   :  { %v3117_v22 = vpop.f32.mrf.mxu0 }
0x2c48   :  { %v2907_v23 = vadd.f32 %v3137_v12, %v3117_v22 }
0x2c49   :  { %v2777_v59 = vpop.f32.mrf.mxu0 }
0x2c4a   :  { %v2940_v53 = vadd.f32 %v3079_v25, %v2907_v23  ;;  %v2902_v41 = vadd.f32 %v2901_v17, %v2777_v59 }
0x2c4b   :  { %v3120_v29 = vpop.f32.mrf.mxu0 }
0x2c4c   :  { %2948 = vst [vmem:[%s4657_s9 + $0x18] sm:$0xff] %v2940_v53  ;;  %v2939_v34 = vadd.f32 %v3079_v25, %v2902_v41  ;;  %v2917_v30 = vadd.f32 %v3140_v47, %v3120_v29 }
0x2c4d   :  { %v2787_v44 = vpop.f32.mrf.mxu0 }
0x2c4e   :  { %2947 = vst [vmem:[%s4657_s9 + $0x10] sm:$0xff] %v2939_v34  ;;  %v2942_v26 = vadd.f32 %v3079_v25, %v2917_v30  ;;  %v2912_v36 = vadd.f32 %v2911_v57, %v2787_v44 }
0x2c4f   :  { %v3123_v43 = vpop.f32.mrf.mxu0 }
0x2c50   :  { %2950 = vst [vmem:[%s4657_s9 + $0x28] sm:$0xff] %v2942_v26  ;;  %v2941_v7 = vadd.f32 %v3079_v25, %v2912_v36 }
0x2c51   :  { %v2797_v38 = vpop.f32.mrf.mxu0 }
0x2c52   :  { %2949 = vst [vmem:[%s4657_s9 + $0x20] sm:$0xff] %v2941_v7  ;;  %v3143_v56 = vpop.f32.mrf.mxu1 }
0x2c53   :  { %v2927_v4 = vadd.f32 %v3143_v56, %v3123_v43  ;;  %v3134_v31 = vpop.f32.mrf.mxu0 }
0x2c54   :  { %v2897_v63 = vadd.f32 %v3134_v31, %v3114_v16  ;;  %v2921_v8 = vpop.f32.mrf.mxu1 }
0x2c55   :  { %v2944_v60 = vadd.f32 %v3079_v25, %v2927_v4  ;;  %v2922_v10 = vadd.f32 %v2921_v8, %v2797_v38  ;;  %v2891_v39 = vpop.f32.mrf.mxu0 }
0x2c56   :  { %v2938_v11 = vadd.f32 %v3079_v25, %v2897_v63  ;;  %v2892_v37 = vadd.f32 %v2891_v39, %v2767_v21 }
0x2c57   :  { %2952 = vst [vmem:[%s4657_s9 + $0x38] sm:$0xff] %v2944_v60  ;;  %v2943_v28 = vadd.f32 %v3079_v25, %v2922_v10 }
0x2c58   :  { %2946 = vst [vmem:[%s4657_s9 + $0x8] sm:$0xff] %v2938_v11  ;;  %v2937_v1 = vadd.f32 %v3079_v25, %v2892_v37 }
0x2c59   :  { %2951 = vst [vmem:[%s4657_s9 + $0x30] sm:$0xff] %v2943_v28 }
0x2c5a   :  { %2945 = vst [vmem:[%s4657_s9] sm:$0xff] %v2937_v1 }

</bundles_post_ra>
